<compile_context>
chip_gen: v5e
topology: v5e:2x2
jax: 0.10.0
libtpu: 0.0.40
codegen_flags: <defaults>
</compile_context>

<pallas_src>
import functools

import jax
import jax.numpy as jnp
from jax.experimental import pallas as pl
from jax.experimental.pallas import tpu as pltpu


def mha_kernel(x_ref, wqkv_ref, bqkv_ref, wo_ref, bo_ref, o_ref,
               qkv_scratch, kt_scratch, *,
               num_heads, d_k, d_model, q_block):
    """Grid = (batch, query-tile). Fused QKV projection + attention + output proj.

    NOTE: the query axis MUST stay "arbitrary" (sequential): the qi == 0 step
    writes the per-batch QKV / K^T scratches that later query tiles read.
    """
    qi = pl.program_id(1)

    # ---- Fused QKV projection: once per batch element (first query tile). -----
    @pl.when(qi == 0)
    def _project_qkv():
        # x is already bf16; 1/sqrt(d_k) is pre-folded into W_q / b_q host-side.
        qkv_f32 = jnp.dot(x_ref[...], wqkv_ref[...],
                          preferred_element_type=jnp.float32)        # (S, 3D) f32 acc
        qkv_f32 = qkv_f32 + bqkv_ref[...]
        qkv_scratch[...] = qkv_f32.astype(jnp.bfloat16)              # single lane-dense store
        # Pre-transpose K once per batch: rows h*d_k:(h+1)*d_k of K^T are K_h^T,
        # so the per-tile score matmuls below need no XLU transpose.
        kt_scratch[...] = qkv_f32[:, d_model:2 * d_model].T.astype(jnp.bfloat16)

    # ---- Attention for this query tile. ----------------------------------------
    i0 = pl.multiple_of(qi * q_block, q_block)
    q_tile = qkv_scratch[pl.ds(i0, q_block), 0:d_model]              # (tq, D) bf16 (pre-scaled Q)
    v_all = qkv_scratch[:, 2 * d_model:3 * d_model]                  # (S,  D) bf16

    attn_heads = []
    for h in range(num_heads):
        lo = h * d_k
        s = jnp.dot(q_tile[:, lo:lo + d_k], kt_scratch[lo:lo + d_k, :],
                    preferred_element_type=jnp.float32)              # (tq, S) f32
        s = s - jnp.max(s, axis=-1, keepdims=True)
        p = jnp.exp(s)
        denom = jnp.sum(p, axis=-1, keepdims=True)                   # (tq, 1)
        pv = jnp.dot(p.astype(jnp.bfloat16), v_all[:, lo:lo + d_k],
                     preferred_element_type=jnp.float32)             # (tq, d_k) f32
        # Normalize AFTER the PV matmul: (tq, d_k) multiplies instead of (tq, S).
        attn_heads.append(pv * pl.reciprocal(denom, approx=True))
    # TODO(synk): dropout on attention probabilities omitted (p=0 / eval mode).
    # TODO(synk): optional `mask` argument not implemented (mask=None path only).

    attn = jnp.concatenate(attn_heads, axis=-1).astype(jnp.bfloat16)  # (tq, D) lane-packed

    # ---- Output projection: single full-depth matmul (contraction = d_model). --
    out = jnp.dot(attn, wo_ref[...], preferred_element_type=jnp.float32)
    o_ref[...] = (out + bo_ref[...]).astype(o_ref.dtype)


def multi_head_attention(x, params, num_heads, *, q_block=128):
    """x: (B, S, D). params: pre-transposed (in, out) weights and (1, out) biases."""
    B, S, D = x.shape
    assert D % num_heads == 0, "d_model must be divisible by num_heads"
    d_k = D // num_heads
    assert d_k % 8 == 0, "per-head width must be sublane/lane aligned"
    q_block = min(q_block, S)
    assert S % q_block == 0 and q_block % 8 == 0
    nq = S // q_block

    # Fold the softmax scale into W_q / b_q (free, done in f32 before the bf16
    # cast), then fuse the three projections into one (D, 3D) bf16 weight.
    scale = jnp.float32(d_k) ** -0.5
    wqkv = jnp.concatenate(
        [params["wq"] * scale, params["wk"], params["wv"]], axis=1).astype(jnp.bfloat16)
    bqkv = jnp.concatenate(
        [params["bq"] * scale, params["bk"], params["bv"]], axis=1).astype(jnp.float32)
    wo = params["wo"].astype(jnp.bfloat16)
    bo = params["bo"].astype(jnp.float32)
    x_bf16 = x.astype(jnp.bfloat16)          # halve the per-batch HBM->VMEM DMA

    kernel = functools.partial(mha_kernel, num_heads=num_heads, d_k=d_k,
                               d_model=D, q_block=q_block)

    # Whole-array VMEM residency for constant-index weights/biases: one copy,
    # no per-step double-buffering.
    vmem_whole = pl.BlockSpec(memory_space=pltpu.MemorySpace.VMEM)

    # VMEM footprint (bytes): resident weights + double-buffered x/out blocks +
    # persistent scratches; limit capped at 48 MiB for v7x (64 MiB physical).
    out_itemsize = jnp.dtype(x.dtype).itemsize
    footprint = (
        D * 3 * D * 2 + 3 * D * 4 + D * D * 2 + D * 4      # weights / biases
        + 2 * S * D * 2                                     # x block (double-buffered)
        + 2 * q_block * D * out_itemsize                    # out block (double-buffered)
        + S * 3 * D * 2 + D * S * 2                         # QKV + K^T scratch
    )
    vmem_limit = min(max(int(1.5 * footprint), 16 * 1024 * 1024), 48 * 1024 * 1024)

    # TODO(synk): for v7x with B == 1, add a head-group parallel axis so the
    # second TensorCore has work; for very long S, switch the (tq, S) score block
    # to a flash-style K-tiled inner loop.
    return pl.pallas_call(
        kernel,
        out_shape=jax.ShapeDtypeStruct((B, S, D), x.dtype),
        grid_spec=pltpu.PrefetchScalarGridSpec(
            num_scalar_prefetch=0,
            grid=(B, nq),
            in_specs=[
                pl.BlockSpec((None, S, D), lambda b, q: (b, 0, 0)),   # x: full seq per batch
                vmem_whole, vmem_whole,                               # W_qkv, b_qkv
                vmem_whole, vmem_whole,                               # W_o,  b_o
            ],
            out_specs=pl.BlockSpec((None, q_block, D), lambda b, q: (b, q, 0)),
            scratch_shapes=[
                pltpu.VMEM((S, 3 * D), jnp.bfloat16),   # fused QKV (Q pre-scaled), lane-dense
                pltpu.VMEM((D, S), jnp.bfloat16),       # K^T (head-blocked rows)
            ],
        ),
        compiler_params=pltpu.CompilerParams(
            # q axis must be "arbitrary": qi==0 writes scratch later q tiles read.
            dimension_semantics=("parallel", "arbitrary"),
            vmem_limit_bytes=vmem_limit,
        ),
    )(x_bf16, wqkv, bqkv, wo, bo)


def reference_mha(x, params, num_heads):
    """Pure fp32 JAX reference mirroring the PyTorch module."""
    B, S, D = x.shape
    d_k = D // num_heads

    def linear(t, w, b):
        return t @ w + b

    q = linear(x, params["wq"], params["bq"])
    k = linear(x, params["wk"], params["bk"])
    v = linear(x, params["wv"], params["bv"])

    def split(t):  # (B,S,D) -> (B,H,S,d_k)
        return t.reshape(B, S, num_heads, d_k).transpose(0, 2, 1, 3)

    q, k, v = split(q), split(k), split(v)
    scores = jnp.einsum("bhqd,bhkd->bhqk", q, k) / jnp.sqrt(jnp.float32(d_k))
    probs = jax.nn.softmax(scores, axis=-1)
    attn = jnp.einsum("bhqk,bhkd->bhqd", probs, v)
    attn = attn.transpose(0, 2, 1, 3).reshape(B, S, D)
    return linear(attn, params["wo"], params["bo"])


def reference_mha_bf16(x, params, num_heads):
    """Reference mirroring the kernel's bf16-input / fp32-accumulation strategy."""
    B, S, D = x.shape
    d_k = D // num_heads
    bf16, f32 = jnp.bfloat16, jnp.float32
    scale = jnp.float32(d_k) ** -0.5

    wqkv = jnp.concatenate([params["wq"] * scale, params["wk"], params["wv"]],
                           axis=1).astype(bf16)
    bqkv = jnp.concatenate([params["bq"] * scale, params["bk"], params["bv"]],
                           axis=1).astype(f32)
    qkv = jnp.einsum("bsd,df->bsf", x.astype(bf16), wqkv,
                     preferred_element_type=f32) + bqkv
    qkv = qkv.astype(bf16)
    q, k, v = qkv[..., :D], qkv[..., D:2 * D], qkv[..., 2 * D:]

    def split(t):  # (B,S,D) -> (B,H,S,d_k)
        return t.reshape(B, S, num_heads, d_k).transpose(0, 2, 1, 3)

    q, k, v = split(q), split(k), split(v)
    s = jnp.einsum("bhqd,bhkd->bhqk", q, k, preferred_element_type=f32)
    s = s - jnp.max(s, axis=-1, keepdims=True)
    p = jnp.exp(s)
    denom = jnp.sum(p, axis=-1, keepdims=True)
    attn = jnp.einsum("bhqk,bhkd->bhqd", p.astype(bf16), v,
                      preferred_element_type=f32) / denom
    attn = attn.transpose(0, 2, 1, 3).reshape(B, S, D).astype(bf16)
    return jnp.einsum("bsd,df->bsf", attn, params["wo"].astype(bf16),
                      preferred_element_type=f32) + params["bo"].astype(f32)


if __name__ == "__main__":
    B, S, D = 2, 256, 128
    NUM_HEADS = 4

    key = jax.random.PRNGKey(0)
    keys = jax.random.split(key, 9)
    wscale = 1.0 / jnp.sqrt(jnp.float32(D))
    params = {
        # weights stored as (in_features, out_features) == torch weight.T
        "wq": jax.random.normal(keys[0], (D, D), jnp.float32) * wscale,
        "bq": jax.random.normal(keys[1], (1, D), jnp.float32) * wscale,
        "wk": jax.random.normal(keys[2], (D, D), jnp.float32) * wscale,
        "bk": jax.random.normal(keys[3], (1, D), jnp.float32) * wscale,
        "wv": jax.random.normal(keys[4], (D, D), jnp.float32) * wscale,
        "bv": jax.random.normal(keys[5], (1, D), jnp.float32) * wscale,
        "wo": jax.random.normal(keys[6], (D, D), jnp.float32) * wscale,
        "bo": jax.random.normal(keys[7], (1, D), jnp.float32) * wscale,
    }
    x = jax.random.normal(keys[8], (B, S, D), jnp.float32)

    out = multi_head_attention(x, params, NUM_HEADS)   # grid = (2 batches, 2 q-tiles)
    out = jax.block_until_ready(out)
    assert out.shape == (B, S, D)

    # Tight check vs a reference using the same bf16-input / fp32-acc strategy.
    ref_matched = reference_mha_bf16(x, params, NUM_HEADS)
    assert jnp.allclose(out, ref_matched, atol=1e-2, rtol=1e-2), "mismatch vs bf16-matched reference"

    # Looser check vs the pure fp32 PyTorch-equivalent reference (bf16 MXU drift).
    ref_f32 = reference_mha(x, params, NUM_HEADS)
    assert jnp.allclose(out, ref_f32, atol=5e-2, rtol=5e-2), "mismatch vs fp32 reference"

    print("KERNEL_OK")
</pallas_src>

<mosaic_0001>
module attributes {stable_mosaic.version = 11 : i64} {
  func.func @mha_kernel(%arg0: i32, %arg1: i32, %arg2: memref<1x256x128xbf16, #tpu.memory_space<vmem>>, %arg3: memref<128x384xbf16, #tpu.memory_space<vmem>>, %arg4: memref<1x384xf32, #tpu.memory_space<vmem>>, %arg5: memref<128x128xbf16, #tpu.memory_space<vmem>>, %arg6: memref<1x128xf32, #tpu.memory_space<vmem>>, %arg7: memref<1x128x128xf32, #tpu.memory_space<vmem>>, %arg8: memref<256x384xbf16, #tpu.memory_space<vmem>>, %arg9: memref<128x256xbf16, #tpu.memory_space<vmem>>) attributes {dimension_semantics = [#tpu.dimension_semantics<parallel>, #tpu.dimension_semantics<arbitrary>], iteration_bounds = array<i64: 2, 2>, scalar_prefetch = 0 : i64, scratch_operands = 2 : i64, tpu.core_type = #tpu.core_type<tc>, window_params = [{transform_indices = @transform_0, window_bounds = array<i64: 1, 256, 128>}, {pipeline_mode = #tpu.pipeline_mode<synchronous>, transform_indices = @transform_1, window_bounds = array<i64: 128, 384>}, {pipeline_mode = #tpu.pipeline_mode<synchronous>, transform_indices = @transform_2, window_bounds = array<i64: 1, 384>}, {pipeline_mode = #tpu.pipeline_mode<synchronous>, transform_indices = @transform_3, window_bounds = array<i64: 128, 128>}, {pipeline_mode = #tpu.pipeline_mode<synchronous>, transform_indices = @transform_4, window_bounds = array<i64: 1, 128>}, {transform_indices = @transform_5, window_bounds = array<i64: 1, 128, 128>}]} {
    %c0_i32 = arith.constant 0 : i32
    %0 = arith.cmpi eq, %arg1, %c0_i32 : i32
    %1 = arith.extui %0 : i1 to i32
    %c0_i32_0 = arith.constant 0 : i32
    %2 = arith.cmpi ne, %1, %c0_i32_0 : i32
    scf.if %2 {
      %c0_30 = arith.constant 0 : index
      %c0_31 = arith.constant 0 : index
      %c0_32 = arith.constant 0 : index
      %82 = vector.load %arg2[%c0_30, %c0_31, %c0_32] : memref<1x256x128xbf16, #tpu.memory_space<vmem>>, vector<1x256x128xbf16>
      %83 = vector.shape_cast %82 : vector<1x256x128xbf16> to vector<256x128xbf16>
      %c0_33 = arith.constant 0 : index
      %c0_34 = arith.constant 0 : index
      %84 = vector.load %arg3[%c0_33, %c0_34] : memref<128x384xbf16, #tpu.memory_space<vmem>>, vector<128x384xbf16>
      %cst_35 = arith.constant dense<0.000000e+00> : vector<256x384xf32>
      %85 = tpu.matmul %83, %84, %cst_35 {dimension_numbers = #tpu.dot_dimension_numbers<[1], [0], [0], [1], [0, 0, 1, 1], [], []>} : vector<256x128xbf16>, vector<128x384xbf16>, vector<256x384xf32> -> vector<256x384xf32>
      %c0_36 = arith.constant 0 : index
      %c0_37 = arith.constant 0 : index
      %86 = vector.load %arg4[%c0_36, %c0_37] : memref<1x384xf32, #tpu.memory_space<vmem>>, vector<1x384xf32>
      %87 = vector.broadcast %86 : vector<1x384xf32> to vector<256x384xf32>
      %88 = arith.addf %85, %87 : vector<256x384xf32>
      %89 = arith.truncf %88 : vector<256x384xf32> to vector<256x384xbf16>
      %c0_38 = arith.constant 0 : index
      %c0_39 = arith.constant 0 : index
      %90 = vector.load %arg8[%c0_38, %c0_39] : memref<256x384xbf16, #tpu.memory_space<vmem>>, vector<256x384xbf16>
      tpu.vector_store %arg8[%c0_38, %c0_39], %89 {strides = array<i32>} : memref<256x384xbf16, #tpu.memory_space<vmem>>, vector<256x384xbf16>,
      %91 = vector.extract_strided_slice %88 {offsets = [0, 128], sizes = [256, 128], strides = [1, 1]} : vector<256x384xf32> to vector<256x128xf32>
      %92 = tpu.transpose %91, [1, 0] : vector<256x128xf32> -> vector<128x256xf32>
      %93 = arith.truncf %92 : vector<128x256xf32> to vector<128x256xbf16>
      %c0_40 = arith.constant 0 : index
      %c0_41 = arith.constant 0 : index
      %94 = vector.load %arg9[%c0_40, %c0_41] : memref<128x256xbf16, #tpu.memory_space<vmem>>, vector<128x256xbf16>
      tpu.vector_store %arg9[%c0_40, %c0_41], %93 {strides = array<i32>} : memref<128x256xbf16, #tpu.memory_space<vmem>>, vector<128x256xbf16>,
    } else {
    }
    %c128_i32 = arith.constant 128 : i32
    %3 = arith.muli %arg1, %c128_i32 : i32
    %4 = tpu.assume_multiple %3, 128 : i32
    %5 = arith.index_cast %4 : i32 to index
    %c0 = arith.constant 0 : index
    %6 = vector.load %arg8[%5, %c0] : memref<256x384xbf16, #tpu.memory_space<vmem>>, vector<128x128xbf16>
    %c0_1 = arith.constant 0 : index
    %c256 = arith.constant 256 : index
    %7 = vector.load %arg8[%c0_1, %c256] : memref<256x384xbf16, #tpu.memory_space<vmem>>, vector<256x128xbf16>
    %8 = vector.extract_strided_slice %6 {offsets = [0, 0], sizes = [128, 32], strides = [1, 1]} : vector<128x128xbf16> to vector<128x32xbf16>
    %c0_2 = arith.constant 0 : index
    %c0_3 = arith.constant 0 : index
    %9 = vector.load %arg9[%c0_2, %c0_3] : memref<128x256xbf16, #tpu.memory_space<vmem>>, vector<32x256xbf16>
    %cst = arith.constant dense<0.000000e+00> : vector<128x256xf32>
    %10 = tpu.matmul %8, %9, %cst {dimension_numbers = #tpu.dot_dimension_numbers<[1], [0], [0], [1], [0, 0, 1, 1], [], []>} : vector<128x32xbf16>, vector<32x256xbf16>, vector<128x256xf32> -> vector<128x256xf32>
    %cst_4 = arith.constant dense<0xFF800000> : vector<128xf32>
    %11 = vector.multi_reduction <maximumf>, %10, %cst_4 [1] : vector<128x256xf32> to vector<128xf32>
    %12 = vector.shape_cast %11 : vector<128xf32> to vector<128x1xf32>
    %13 = vector.broadcast %12 : vector<128x1xf32> to vector<128x256xf32>
    %14 = arith.subf %10, %13 : vector<128x256xf32>
    %15 = math.exp %14 : vector<128x256xf32>
    %cst_5 = arith.constant dense<0.000000e+00> : vector<128xf32>
    %16 = vector.multi_reduction <add>, %15, %cst_5 [1] : vector<128x256xf32> to vector<128xf32>
    %17 = vector.shape_cast %16 : vector<128xf32> to vector<128x1xf32>
    %18 = arith.truncf %15 : vector<128x256xf32> to vector<128x256xbf16>
    %19 = vector.extract_strided_slice %7 {offsets = [0, 0], sizes = [256, 32], strides = [1, 1]} : vector<256x128xbf16> to vector<256x32xbf16>
    %cst_6 = arith.constant dense<0.000000e+00> : vector<128x32xf32>
    %20 = tpu.matmul %18, %19, %cst_6 {dimension_numbers = #tpu.dot_dimension_numbers<[1], [0], [0], [1], [0, 0, 1, 1], [], []>} : vector<128x256xbf16>, vector<256x32xbf16>, vector<128x32xf32> -> vector<128x32xf32>
    %21 = tpu.reciprocal %17 {approx = true} : vector<128x1xf32> -> vector<128x1xf32>
    %22 = vector.broadcast %21 : vector<128x1xf32> to vector<128x32xf32>
    %23 = arith.mulf %20, %22 : vector<128x32xf32>
    %24 = vector.extract_strided_slice %6 {offsets = [0, 32], sizes = [128, 32], strides = [1, 1]} : vector<128x128xbf16> to vector<128x32xbf16>
    %c32 = arith.constant 32 : index
    %c0_7 = arith.constant 0 : index
    %25 = vector.load %arg9[%c32, %c0_7] : memref<128x256xbf16, #tpu.memory_space<vmem>>, vector<32x256xbf16>
    %cst_8 = arith.constant dense<0.000000e+00> : vector<128x256xf32>
    %26 = tpu.matmul %24, %25, %cst_8 {dimension_numbers = #tpu.dot_dimension_numbers<[1], [0], [0], [1], [0, 0, 1, 1], [], []>} : vector<128x32xbf16>, vector<32x256xbf16>, vector<128x256xf32> -> vector<128x256xf32>
    %cst_9 = arith.constant dense<0xFF800000> : vector<128xf32>
    %27 = vector.multi_reduction <maximumf>, %26, %cst_9 [1] : vector<128x256xf32> to vector<128xf32>
    %28 = vector.shape_cast %27 : vector<128xf32> to vector<128x1xf32>
    %29 = vector.broadcast %28 : vector<128x1xf32> to vector<128x256xf32>
    %30 = arith.subf %26, %29 : vector<128x256xf32>
    %31 = math.exp %30 : vector<128x256xf32>
    %cst_10 = arith.constant dense<0.000000e+00> : vector<128xf32>
    %32 = vector.multi_reduction <add>, %31, %cst_10 [1] : vector<128x256xf32> to vector<128xf32>
    %33 = vector.shape_cast %32 : vector<128xf32> to vector<128x1xf32>
    %34 = arith.truncf %31 : vector<128x256xf32> to vector<128x256xbf16>
    %35 = vector.extract_strided_slice %7 {offsets = [0, 32], sizes = [256, 32], strides = [1, 1]} : vector<256x128xbf16> to vector<256x32xbf16>
    %cst_11 = arith.constant dense<0.000000e+00> : vector<128x32xf32>
    %36 = tpu.matmul %34, %35, %cst_11 {dimension_numbers = #tpu.dot_dimension_numbers<[1], [0], [0], [1], [0, 0, 1, 1], [], []>} : vector<128x256xbf16>, vector<256x32xbf16>, vector<128x32xf32> -> vector<128x32xf32>
    %37 = tpu.reciprocal %33 {approx = true} : vector<128x1xf32> -> vector<128x1xf32>
    %38 = vector.broadcast %37 : vector<128x1xf32> to vector<128x32xf32>
    %39 = arith.mulf %36, %38 : vector<128x32xf32>
    %40 = vector.extract_strided_slice %6 {offsets = [0, 64], sizes = [128, 32], strides = [1, 1]} : vector<128x128xbf16> to vector<128x32xbf16>
    %c64 = arith.constant 64 : index
    %c0_12 = arith.constant 0 : index
    %41 = vector.load %arg9[%c64, %c0_12] : memref<128x256xbf16, #tpu.memory_space<vmem>>, vector<32x256xbf16>
    %cst_13 = arith.constant dense<0.000000e+00> : vector<128x256xf32>
    %42 = tpu.matmul %40, %41, %cst_13 {dimension_numbers = #tpu.dot_dimension_numbers<[1], [0], [0], [1], [0, 0, 1, 1], [], []>} : vector<128x32xbf16>, vector<32x256xbf16>, vector<128x256xf32> -> vector<128x256xf32>
    %cst_14 = arith.constant dense<0xFF800000> : vector<128xf32>
    %43 = vector.multi_reduction <maximumf>, %42, %cst_14 [1] : vector<128x256xf32> to vector<128xf32>
    %44 = vector.shape_cast %43 : vector<128xf32> to vector<128x1xf32>
    %45 = vector.broadcast %44 : vector<128x1xf32> to vector<128x256xf32>
    %46 = arith.subf %42, %45 : vector<128x256xf32>
    %47 = math.exp %46 : vector<128x256xf32>
    %cst_15 = arith.constant dense<0.000000e+00> : vector<128xf32>
    %48 = vector.multi_reduction <add>, %47, %cst_15 [1] : vector<128x256xf32> to vector<128xf32>
    %49 = vector.shape_cast %48 : vector<128xf32> to vector<128x1xf32>
    %50 = arith.truncf %47 : vector<128x256xf32> to vector<128x256xbf16>
    %51 = vector.extract_strided_slice %7 {offsets = [0, 64], sizes = [256, 32], strides = [1, 1]} : vector<256x128xbf16> to vector<256x32xbf16>
    %cst_16 = arith.constant dense<0.000000e+00> : vector<128x32xf32>
    %52 = tpu.matmul %50, %51, %cst_16 {dimension_numbers = #tpu.dot_dimension_numbers<[1], [0], [0], [1], [0, 0, 1, 1], [], []>} : vector<128x256xbf16>, vector<256x32xbf16>, vector<128x32xf32> -> vector<128x32xf32>
    %53 = tpu.reciprocal %49 {approx = true} : vector<128x1xf32> -> vector<128x1xf32>
    %54 = vector.broadcast %53 : vector<128x1xf32> to vector<128x32xf32>
    %55 = arith.mulf %52, %54 : vector<128x32xf32>
    %56 = vector.extract_strided_slice %6 {offsets = [0, 96], sizes = [128, 32], strides = [1, 1]} : vector<128x128xbf16> to vector<128x32xbf16>
    %c96 = arith.constant 96 : index
    %c0_17 = arith.constant 0 : index
    %57 = vector.load %arg9[%c96, %c0_17] : memref<128x256xbf16, #tpu.memory_space<vmem>>, vector<32x256xbf16>
    %cst_18 = arith.constant dense<0.000000e+00> : vector<128x256xf32>
    %58 = tpu.matmul %56, %57, %cst_18 {dimension_numbers = #tpu.dot_dimension_numbers<[1], [0], [0], [1], [0, 0, 1, 1], [], []>} : vector<128x32xbf16>, vector<32x256xbf16>, vector<128x256xf32> -> vector<128x256xf32>
    %cst_19 = arith.constant dense<0xFF800000> : vector<128xf32>
    %59 = vector.multi_reduction <maximumf>, %58, %cst_19 [1] : vector<128x256xf32> to vector<128xf32>
    %60 = vector.shape_cast %59 : vector<128xf32> to vector<128x1xf32>
    %61 = vector.broadcast %60 : vector<128x1xf32> to vector<128x256xf32>
    %62 = arith.subf %58, %61 : vector<128x256xf32>
    %63 = math.exp %62 : vector<128x256xf32>
    %cst_20 = arith.constant dense<0.000000e+00> : vector<128xf32>
    %64 = vector.multi_reduction <add>, %63, %cst_20 [1] : vector<128x256xf32> to vector<128xf32>
    %65 = vector.shape_cast %64 : vector<128xf32> to vector<128x1xf32>
    %66 = arith.truncf %63 : vector<128x256xf32> to vector<128x256xbf16>
    %67 = vector.extract_strided_slice %7 {offsets = [0, 96], sizes = [256, 32], strides = [1, 1]} : vector<256x128xbf16> to vector<256x32xbf16>
    %cst_21 = arith.constant dense<0.000000e+00> : vector<128x32xf32>
    %68 = tpu.matmul %66, %67, %cst_21 {dimension_numbers = #tpu.dot_dimension_numbers<[1], [0], [0], [1], [0, 0, 1, 1], [], []>} : vector<128x256xbf16>, vector<256x32xbf16>, vector<128x32xf32> -> vector<128x32xf32>
    %69 = tpu.reciprocal %65 {approx = true} : vector<128x1xf32> -> vector<128x1xf32>
    %70 = vector.broadcast %69 : vector<128x1xf32> to vector<128x32xf32>
    %71 = arith.mulf %68, %70 : vector<128x32xf32>
    %72 = tpu.concatenate %23, %39, %55, %71 in 1 : vector<128x32xf32>, vector<128x32xf32>, vector<128x32xf32>, vector<128x32xf32> -> vector<128x128xf32>
    %73 = arith.truncf %72 : vector<128x128xf32> to vector<128x128xbf16>
    %c0_22 = arith.constant 0 : index
    %c0_23 = arith.constant 0 : index
    %74 = vector.load %arg5[%c0_22, %c0_23] : memref<128x128xbf16, #tpu.memory_space<vmem>>, vector<128x128xbf16>
    %cst_24 = arith.constant dense<0.000000e+00> : vector<128x128xf32>
    %75 = tpu.matmul %73, %74, %cst_24 {dimension_numbers = #tpu.dot_dimension_numbers<[1], [0], [0], [1], [0, 0, 1, 1], [], []>} : vector<128x128xbf16>, vector<128x128xbf16>, vector<128x128xf32> -> vector<128x128xf32>
    %c0_25 = arith.constant 0 : index
    %c0_26 = arith.constant 0 : index
    %76 = vector.load %arg6[%c0_25, %c0_26] : memref<1x128xf32, #tpu.memory_space<vmem>>, vector<1x128xf32>
    %77 = vector.broadcast %76 : vector<1x128xf32> to vector<128x128xf32>
    %78 = arith.addf %75, %77 : vector<128x128xf32>
    %c0_27 = arith.constant 0 : index
    %c0_28 = arith.constant 0 : index
    %c0_29 = arith.constant 0 : index
    %79 = vector.load %arg7[%c0_27, %c0_28, %c0_29] : memref<1x128x128xf32, #tpu.memory_space<vmem>>, vector<1x128x128xf32>
    %80 = vector.shape_cast %79 : vector<1x128x128xf32> to vector<128x128xf32>
    %81 = vector.shape_cast %78 : vector<128x128xf32> to vector<1x128x128xf32>
    tpu.vector_store %arg7[%c0_27, %c0_28, %c0_29], %81 {strides = array<i32>} : memref<1x128x128xf32, #tpu.memory_space<vmem>>, vector<1x128x128xf32>,
    return
  }
  func.func @transform_0(%arg0: i32, %arg1: i32) -> (i32, i32, i32) {
    %c0_i32 = arith.constant 0 : i32
    %c0_i32_0 = arith.constant 0 : i32
    %c0_i32_1 = arith.constant 0 : i32
    return %arg0, %c0_i32, %c0_i32_0 : i32, i32, i32
  }
  func.func @transform_1(%arg0: i32, %arg1: i32) -> (i32, i32) {
    %c0_i32 = arith.constant 0 : i32
    %c0_i32_0 = arith.constant 0 : i32
    %c0_i32_1 = arith.constant 0 : i32
    return %c0_i32, %c0_i32_0 : i32, i32
  }
  func.func @transform_2(%arg0: i32, %arg1: i32) -> (i32, i32) {
    %c0_i32 = arith.constant 0 : i32
    %c0_i32_0 = arith.constant 0 : i32
    %c0_i32_1 = arith.constant 0 : i32
    return %c0_i32, %c0_i32_0 : i32, i32
  }
  func.func @transform_3(%arg0: i32, %arg1: i32) -> (i32, i32) {
    %c0_i32 = arith.constant 0 : i32
    %c0_i32_0 = arith.constant 0 : i32
    %c0_i32_1 = arith.constant 0 : i32
    return %c0_i32, %c0_i32_0 : i32, i32
  }
  func.func @transform_4(%arg0: i32, %arg1: i32) -> (i32, i32) {
    %c0_i32 = arith.constant 0 : i32
    %c0_i32_0 = arith.constant 0 : i32
    %c0_i32_1 = arith.constant 0 : i32
    return %c0_i32, %c0_i32_0 : i32, i32
  }
  func.func @transform_5(%arg0: i32, %arg1: i32) -> (i32, i32, i32) {
    %c0_i32 = arith.constant 0 : i32
    %c0_i32_0 = arith.constant 0 : i32
    return %arg0, %arg1, %c0_i32 : i32, i32, i32
  }
}

</mosaic_0001>

<bundles_post_ra>
// kernel: tpu_custom_call.1
= control target key start
LH: loop header
LB: loop body
LE: loop exit
PB: predicated region body
PF: predicated region fallthrough
CT: control target
= control target key end

     0   :  { %s7631_s0 = inlined_call_operand.hbm [shape: bf16[2,256,128], index: 0, kind: input, shape index: {}]   ;;  %s7632_s1 = inlined_call_operand.hbm [shape: bf16[128,384], index: 1, kind: input, shape index: {}]   ;;  %s7633_s2 = inlined_call_operand.hbm [shape: f32[1,384], index: 2, kind: input, shape index: {}]   ;;  %s7634_s3 = inlined_call_operand.hbm [shape: bf16[128,128], index: 3, kind: input, shape index: {}]   ;;  %s7635_s4 = inlined_call_operand.vmem [shape: f32[1,128], index: 4, kind: input, shape index: {}]   ;;  %s7636_s5 = inlined_call_operand.hbm [shape: f32[2,256,128], index: 5, kind: output, shape index: {}]  }
   0x1   :  { %7668 = sst [smem:[#allocation103_spill]] %s7632_s1 }
   0x2   :  { %7669 = sst [smem:[#allocation104_spill]] %s7633_s2 }
   0x3   :  { %7670 = sst [smem:[#allocation105_spill]] %s7634_s3 }
   0x4   :  { %7671 = sst [smem:[#allocation106_spill]] %s7636_s5 }
   0x5   :  { %10 = vsyncpa [#allocation5], 0 }
   0x6   :  { %12 = vsyncpa [#allocation5 + $0x1], 0 }
   0x7   :  { %13 = vsyncpa [#allocation8], 0 }
   0x8   :  { %14 = vsyncpa [#allocation11], 0 }
   0x9   :  { %15 = vsyncpa [#allocation6], 0 }
   0xa   :  { %17 = vsyncpa [#allocation6 + $0x1], 0  ;;  %s5552_s18 = smov 0   ;;  %s5554_s19 = smov 0  }
   0xb   :  { %s5556_s20 = smov 0   ;;  %s5558_s21 = smov 0  }
   0xc   :  { %s5560_s22 = smov 0   ;;  %s5562_s23 = smov 0  }
   0xd   :  { %s5564_s24 = smov 0   ;;  %s5566_s25 = smov 0  }
   0xe   :  { %s5568_s26 = smov 0   ;;  %s5570_s27 = smov 0  }
   0xf   :  { %s5572_s28 = smov 0  }
  0x10 LB: > { %7672 = sst [smem:[#allocation17_spill]] %s5468_s18  ;;  %s3938_s29 = sadd.s32 4294967295, %s5508_s28   ;;  %s5508_s28 = sphi %s5572_s28, %s23_s28   ;;  %s5504_s27 = sphi %s5570_s27, %s7887_s27   ;;  %s5500_s26 = sphi %s5568_s26, %s7878_s26   ;;  %s5496_s25 = sphi %s5566_s25, %s7886_s25   ;;  %s5492_s24 = sphi %s5564_s24, %s7877_s24   ;;  %s5488_s23 = sphi %s5562_s23, %s7885_s23   ;;  %s5484_s22 = sphi %s5560_s22, %s7884_s22   ;;  %s5480_s21 = sphi %s5558_s21, %s7883_s21   ;;  %s5476_s20 = sphi %s5556_s20, %s7882_s20   ;;  %s5472_s19 = sphi %s5554_s19, %s7881_s19   ;;  %s5468_s18 = sphi %s5552_s18, %s7880_s18  }
  0x11   : > { %7673 = sst [smem:[#allocation18_spill]] %s5500_s26  ;;  %s3939_s30 = sadd.s32 4294967294, %s5508_s28  }
  0x12   : > { %p55_p0 = scmp.ne.s32.totalorder %s5484_s22, %s5480_s21  ;;  %p5608_p1 = scmp.eq.s32.totalorder %s3938_s29, 0 }
  0x13   : > { %p164_p2 = scmp.ne.s32.totalorder %s5476_s20, %s5472_s19  ;;  %p165_p3 = scmp.eq.s32.totalorder %s3938_s29, 3 }
  0x14   : > { %p5616_p4 = por %p5608_p1, %p55_p0  ;;  %p170_p5 = scmp.ne.s32.totalorder %s5472_s19, %s5468_s18 }
  0x15   : > { %p5622_p6 = por %p165_p3, %p164_p2  ;;  %p171_p7 = scmp.eq.s32.totalorder %s3939_s30, 3 }
  0x16   : > { %p3940_p8 = scmp.ge.s32.totalorder %s5508_s28, 1  ;;  %p178_p9 = scmp.lt.s32.totalorder %s5508_s28, 5 }
  0x17   : > { %s7676_s8 = scalar_select %p5622_p6, 1, 0 }
  0x18   : > { %p5628_p10 = por %p171_p7, %p170_p5  ;;  %p5632_p11 = pnand %p3940_p8, %p178_p9 }
  0x19   : > { %7677 = sst [smem:[#allocation19_spill]] %s7676_s8  ;;  %s5510_s14 = smov [#allocation7]  }
  0x1a   : > { %s7678_s9 = scalar_select %p5628_p10, 1, 0 }
  0x1b   : > { %s7681_s1 = sld [smem:[#allocation103_spill]]  ;;  %p4515_p12 = pneg %p5632_p11 }
  0x1c   : > { %7679 = sst [smem:[#allocation20_spill]] %s7678_s9  ;;  %s191_s15 = sshll.u32 %s5510_s14, 4  ;;  %s192_s15 = int_to_ptr.vmem [resolvable:$true] %s191_s15 }
  0x1d   : > { %p5643_p13 = pnand %p4515_p12, %p5608_p1  ;;  %s7683_s2 = sld [smem:[#allocation104_spill]] }
  0x1e   : > { %s5511_s30 = smov 192   ;;  %s5512_s11 = smov 12  }
  0x1f   : > { %s7684_s3 = sld [smem:[#allocation105_spill]]  ;;  %s5513_s9 = smov [#allocation9]  }
  0x20   : > { %s206_s17 = sshll.u32 %s5513_s9, 4  ;;  %s5514_s21 = smov [#allocation10]   ;;  %s207_s17 = int_to_ptr.vmem [resolvable:$true] %s206_s17 }
  0x21   : > { %s189_s13 = sshll.u32 %s7681_s1, 4  ;;  %s32_s9 = sadd.s32 1, %s5500_s26  ;;  %s190_s13 = int_to_ptr.hbm [resolvable:$true] %s189_s13 }
  0x22   : > { %4518 = dma.hbm_to_vmem [thread:$0]  (!%p5643_p13), %s190_s13, 3072, %s192_s15, [#allocation8], %s5511_s30, %s5511_s30, %s5512_s11  }
  0x23   : > { %s204_s29 = sshll.u32 %s7683_s2, 4  ;;  %s217_s2 = sshll.u32 %s5514_s21, 4  ;;  %s205_s29 = int_to_ptr.hbm [resolvable:$true] %s204_s29  ;;  %s218_s2 = int_to_ptr.vmem [resolvable:$true] %s217_s2 }
  0x24   : > { %4521 = dma.hbm_to_vmem [thread:$0]  (!%p5643_p13), %s205_s29, 48, %s207_s17, [#allocation8]  }
  0x25   : > { %s215_s1 = sshll.u32 %s7684_s3, 4  ;;  %s7638_s13 = smov 64   ;;  %s216_s1 = int_to_ptr.hbm [resolvable:$true] %s215_s1 }
  0x26   : > { %s7639_s15 = smov 4   ;;  %s35_s30 = sadd.s32 1, %s5504_s27 }
  0x27   : > { %4524 = dma.hbm_to_vmem [thread:$0]  (!%p5643_p13), %s216_s1, 1024, %s218_s2, [#allocation11], %s7638_s13, %s7638_s13, %s7639_s15  }
  0x28   : > { %p33_p0 = scmp.ge.s32.totalorder %s32_s9, 2  ;;  %s42_s11 = sadd.s32 1, %s5488_s23 }
  0x29   : > { %p49_p2 = scmp.ne.s32.totalorder %s5488_s23, %s5484_s22  ;;  %p50_p3 = scmp.eq.s32.totalorder %s5508_s28, 0 }
  0x2a   : > { %s7889_s9 = smov (%p33_p0, %s32_s9), 0  ;;  %s7891_s30 = smov (!%p33_p0, %s35_s30), %s5504_s27 }
  0x2b   : > { %7685 = sst [smem:[#allocation21_spill]] %s7889_s9  ;;  %p5671_p5 = por %p50_p3, %p49_p2 }
  0x2c   : > { %s150_s29 = ssub.s32 %s5500_s26, %s7889_s9  ;;  %p37_p7 = scmp.ge.s32.totalorder %s7891_s30, 2 }
  0x2d   : > { %s154_s1 = sadd.s32 1, %s5476_s20  ;;  %p4536_p8 = scmp.lt.s32.totalorder %s5508_s28, 4 }
  0x2e   : > { %s234_s2 = sand.u32 1, %s5488_s23   ;;  %s7893_s30 = smov (%p37_p7, %s7891_s30), 0 }
  0x2f   : > { %7687 = sst [smem:[#allocation22_spill]] %s7893_s30  ;;  %s3945_s12 = sshll.u32 %s234_s2, 7 }
  0x30   : > { %s39_s14 = ssub.s32 %s5504_s27, %s7893_s30  ;;  %s4379_s21 = sshll.u32 %s5504_s27, 7 }
  0x31   : > { %p40_p9 = scmp.eq.s32.totalorder %s39_s14, 0  ;;  %s151_s17 = sor.u32 %s150_s29, %s39_s14 }
  0x32   : > { %p152_p12 = scmp.eq.s32.totalorder %s151_s17, 0  ;;  %s243_s26 = scalar_lea.hbm %s7631_s0, %s4379_s21 }
  0x33   : > { %s5686_s13 = scalar_select %p40_p9, %s5488_s23, %s42_s11  }
  0x34   : > { %s5689_s15 = scalar_select %p152_p12, %s5476_s20, %s154_s1  }
  0x35   : > { %s238_s18 = scalar_lea.vmem [#allocation4], %s3945_s12  ;;  %s244_s8 = sshll.u32 %s243_s26, 4  ;;  %s245_s8 = int_to_ptr.hbm [resolvable:$true] %s244_s8 }
  0x36   : > { %s246_s5 = sshll.u32 %s238_s18, 4  ;;  %p4526_p13 = pnand %p4536_p8, %p5671_p5  ;;  %s247_s5 = int_to_ptr.vmem [resolvable:$true] %s246_s5 }
  0x37   : > { %s235_s30 = scalar_lea.sflag [#allocation5], %s234_s2  ;;  %s7688_s29 = smov 4  }
  0x38   : > { %s7689_s14 = smov 64   ;;  %258 = sbr.rel (%p5632_p11) target bundleno = 2435 (0x983), region = 40 }
  0x39   : > { %4528 = dma.hbm_to_vmem [thread:$0]  (!%p4526_p13), %s245_s8, 2048, %s247_s5, %s235_s30, %s7689_s14, %s7689_s14, %s7688_s29  }
  0x3d   : > { %s260_s3 = sand.u32 1, %s5484_s22  }
  0x3e   : > { %s3949_s9 = sshll.u32 %s260_s3, 7  ;;  %s261_s11 = scalar_lea.sflag [#allocation5], %s260_s3 }
  0x3f   : > { %s5704_s18 = scalar_lea.vmem [#allocation4], %s3949_s9 }
  0x40   : > { %5451 = dma.done.wait (%p5616_p4), %s261_s11, 2048  }
  0x41   : > { %5453 = vsyncadd (%p5616_p4), %s261_s11, 4294965248 }
  0x42   : > { %5455 = dma.done.wait (%p5608_p1), [#allocation8], 3120  }
  0x43   : > { %5457 = vsyncadd (%p5608_p1), [#allocation8], 4294964176 }
  0x44   : > { %5459 = dma.done.wait (%p5608_p1), [#allocation11], 1024  }
  0x45   : > { %5461 = vsyncadd (%p5608_p1), [#allocation11], 4294966272  ;;  %s304_s5 = sand.u32 1, %s5472_s19   ;;  %p3954_p4 = scmp.ne.s32.totalorder %s5492_s24, 0 }
  0x46   : > { %s3953_s26 = sshll.u32 %s304_s5, 7 }
  0x47   : > { %s5721_s8 = scalar_lea.vmem [#allocation12], %s3953_s26  ;;  %312 = sbr.rel (%p3954_p4) target bundleno = 659 (0x293), region = 60 }
  0x4c   : > { %v4105_v0 = vld [vmem:[#allocation7 + $0xa8] sm:$0xf]  ;;  %v4418_v1 = vld [vmem:[#allocation7 + $0xb0] sm:$0xf0]  ;;  %v4417_v2 = vld [vmem:[#allocation7 + $0xac] sm:$0xf] }
  0x4d   : > { %v4106_v3 = vor.u32 %v4418_v1, %v4105_v0  ;;  %v4107_v4 = vld [vmem:[#allocation7 + $0xb4] sm:$0xf0]  ;;  %v4093_v5 = vld [vmem:[#allocation7 + $0x90] sm:$0xf]  ;;  %v4415_v6 = vld [vmem:[#allocation7 + $0x98] sm:$0xf0] }
  0x4e   : > { %v5724_v7 = vor.u32 %v4417_v2, %v4107_v4  ;;  %v4414_v8 = vld [vmem:[#allocation7 + $0x94] sm:$0xf]  ;;  %v4095_v9 = vld [vmem:[#allocation7 + $0x9c] sm:$0xf0]  ;;  %v4094_v10 = vor.u32 %v4415_v6, %v4093_v5  ;;  %v4081_v12 = vld [vmem:[#allocation7 + $0x78] sm:$0xf] }
  0x4f   : > { %609 = vmatpush.bf16.msra.mxu0 %v4106_v3  ;;  %4469 = vmatpush.bf16.msra.mxu3 %v4106_v3  ;;  %v5727_v11 = vor.u32 %v4414_v8, %v4095_v9  ;;  %v4412_v13 = vld [vmem:[#allocation7 + $0x80] sm:$0xf0]  ;;  %v4411_v14 = vld [vmem:[#allocation7 + $0x7c] sm:$0xf]  ;;  %v4083_v15 = vld [vmem:[#allocation7 + $0x84] sm:$0xf0] }
  0x50   : > { %698 = vmatpush.bf16.msra.mxu1 %v5724_v7  ;;  %v4082_v16 = vor.u32 %v4412_v13, %v4081_v12  ;;  %v4086_v17 = vor.u32 %v4411_v14, %v4083_v15  ;;  %v4069_v18 = vld [vmem:[#allocation7 + $0x60] sm:$0xf]  ;;  %v4409_v19 = vld [vmem:[#allocation7 + $0x68] sm:$0xf0]  ;;  %v4408_v20 = vld [vmem:[#allocation7 + $0x64] sm:$0xf] }
  0x51   : > { %v4071_v21 = vld [vmem:[#allocation7 + $0x6c] sm:$0xf0]  ;;  %v4070_v22 = vor.u32 %v4409_v19, %v4069_v18  ;;  %v4057_v24 = vld [vmem:[#allocation7 + $0x48] sm:$0xf]  ;;  %v4406_v25 = vld [vmem:[#allocation7 + $0x50] sm:$0xf0] }
  0x52   : > { %v4074_v23 = vor.u32 %v4408_v20, %v4071_v21  ;;  %v4405_v26 = vld [vmem:[#allocation7 + $0x4c] sm:$0xf]  ;;  %v4059_v27 = vld [vmem:[#allocation7 + $0x54] sm:$0xf0]  ;;  %v4058_v28 = vor.u32 %v4406_v25, %v4057_v24  ;;  %v4045_v30 = vld [vmem:[#allocation7 + $0x30] sm:$0xf] }
  0x53   : > { %610 = vmatpush.bf16.msra.mxu0 %v4094_v10  ;;  %4470 = vmatpush.bf16.msra.mxu3 %v4094_v10  ;;  %v4062_v29 = vor.u32 %v4405_v26, %v4059_v27  ;;  %v4403_v31 = vld [vmem:[#allocation7 + $0x38] sm:$0xf0]  ;;  %v4402_v32 = vld [vmem:[#allocation7 + $0x34] sm:$0xf]  ;;  %v4047_v33 = vld [vmem:[#allocation7 + $0x3c] sm:$0xf0] }
  0x54   : > { %699 = vmatpush.bf16.msra.mxu1 %v5727_v11  ;;  %v4046_v34 = vor.u32 %v4403_v31, %v4045_v30  ;;  %v4050_v35 = vor.u32 %v4402_v32, %v4047_v33  ;;  %v4033_v36 = vld [vmem:[#allocation7 + $0x18] sm:$0xf]  ;;  %v4400_v37 = vld [vmem:[#allocation7 + $0x20] sm:$0xf0]  ;;  %v4399_v38 = vld [vmem:[#allocation7 + $0x1c] sm:$0xf] }
  0x55   : > { %v4035_v39 = vld [vmem:[#allocation7 + $0x24] sm:$0xf0]  ;;  %v4034_v40 = vor.u32 %v4400_v37, %v4033_v36  ;;  %v4021_v42 = vld [vmem:[#allocation7] sm:$0xf]  ;;  %v4397_v43 = vld [vmem:[#allocation7 + $0x8] sm:$0xf0] }
  0x56   : > { %v4038_v41 = vor.u32 %v4399_v38, %v4035_v39  ;;  %v4396_v44 = vld [vmem:[#allocation7 + $0x4] sm:$0xf]  ;;  %v4023_v45 = vld [vmem:[#allocation7 + $0xc] sm:$0xf0]  ;;  %v4022_v46 = vor.u32 %v4397_v43, %v4021_v42  ;;  %v5742_v50 = vld [vmem:[%s5704_s18 + $0x8] sm:$0xff] }
  0x57   : > { %611 = vmatpush.bf16.msra.mxu0 %v4082_v16  ;;  %4471 = vmatpush.bf16.msra.mxu3 %v4082_v16  ;;  %v4026_v47 = vor.u32 %v4396_v44, %v4023_v45  ;;  %v5731_v48 = vld [vmem:[%s5704_s18] sm:$0xff]  ;;  %v5745_v51 = vld [vmem:[%s5704_s18 + $0x68] sm:$0xff]  ;;  %v5751_v52 = vld [vmem:[%s5704_s18 + $0x10] sm:$0xff] }
  0x58   : > { %700 = vmatpush.bf16.msra.mxu1 %v4086_v17  ;;  %v5734_v49 = vld [vmem:[%s5704_s18 + $0x60] sm:$0xff]  ;;  %v5754_v53 = vld [vmem:[%s5704_s18 + $0x70] sm:$0xff]  ;;  %v5760_v54 = vld [vmem:[%s5704_s18 + $0x18] sm:$0xff] }
  0x59   : > { %v5763_v55 = vld [vmem:[%s5704_s18 + $0x78] sm:$0xff]  ;;  %v5769_v56 = vld [vmem:[%s5704_s18 + $0x20] sm:$0xff]  ;;  %v5775_v57 = vld [vmem:[%s5704_s18 + $0x28] sm:$0xff] }
  0x5a   : > { %v5781_v58 = vld [vmem:[%s5704_s18 + $0x30] sm:$0xff]  ;;  %v5787_v59 = vld [vmem:[%s5704_s18 + $0x38] sm:$0xff]  ;;  %v5792_v60 = vld [vmem:[#allocation9] sm:$0x7] }
  0x5b   : > { %612 = vmatpush.bf16.msra.mxu0 %v4070_v22  ;;  %4472 = vmatpush.bf16.msra.mxu3 %v4070_v22  ;;  %v5795_v61 = vperm.slane %v5792_v60, 0  ;;  %v5798_v62 = vperm.slane %v5792_v60, 1  ;;  %v5801_v63 = vld [vmem:[%s5704_s18 + $0x40] sm:$0xff]  ;;  %v5820_v12 = vld [vmem:[%s5704_s18 + $0x48] sm:$0xff]  ;;  %v4113_v24 = vld [vmem:[#allocation7 + $0xb0] sm:$0xf] }
  0x5c   : > { %701 = vmatpush.bf16.msra.mxu1 %v4074_v23  ;;  %v4419_v25 = vld [vmem:[#allocation7 + $0xb8] sm:$0xf0]  ;;  %v4101_v32 = vld [vmem:[#allocation7 + $0x98] sm:$0xf]  ;;  %v4416_v33 = vld [vmem:[#allocation7 + $0xa0] sm:$0xf0] }
  0x5d   : > { %v4114_v27 = vor.u32 %v4419_v25, %v4113_v24  ;;  %v4089_v37 = vld [vmem:[#allocation7 + $0x80] sm:$0xf]  ;;  %v4413_v38 = vld [vmem:[#allocation7 + $0x88] sm:$0xf0]  ;;  %v4077_v44 = vld [vmem:[#allocation7 + $0x68] sm:$0xf] }
  0x5e   : > { %v4410_v45 = vld [vmem:[#allocation7 + $0x70] sm:$0xf0] }
  0x5f   : > { %613 = vmatpush.bf16.msra.mxu0 %v4058_v28  ;;  %4473 = vmatpush.bf16.msra.mxu3 %v4058_v28  ;;  %v5839_v28 = vld [vmem:[%s5704_s18 + $0x50] sm:$0xff] }
  0x60   : > { %702 = vmatpush.bf16.msra.mxu1 %v4062_v29  ;;  %787 = vmatpush.bf16.msra.mxu2 %v4114_v27 }
  0x63   : > { %614 = vmatpush.bf16.msra.mxu0 %v4046_v34  ;;  %4474 = vmatpush.bf16.msra.mxu3 %v4046_v34 }
  0x64   : > { %703 = vmatpush.bf16.msra.mxu1 %v4050_v35 }
  0x67   : > { %615 = vmatpush.bf16.msra.mxu0 %v4034_v40  ;;  %4475 = vmatpush.bf16.msra.mxu3 %v4034_v40  ;;  %v4090_v40 = vor.u32 %v4413_v38, %v4089_v37 }
  0x68   : > { %704 = vmatpush.bf16.msra.mxu1 %v4038_v41 }
  0x6b   : > { %616 = vmatpush.bf16.msra.mxu0 %v4022_v46  ;;  %4476 = vmatpush.bf16.msra.mxu3 %v4022_v46 }
  0x6c   : > { %705 = vmatpush.bf16.msra.mxu1 %v4026_v47 }
  0x6e   : > { %617 = vmatmul.bf16.vlgmr.msra.gmra.mxu0 %v5731_v48  ;;  %677 = vmatmul.bf16.vlgmr.msra.gmra.mxu3 %v5734_v49 }
  0x6f   : > { %4477 = vmatpush.bf16.msrb.mxu3 %v5724_v7  ;;  %706 = vmatmul.bf16.vlgmr.msra.gmra.mxu1 %v5731_v48 }
  0x73   : > { %4478 = vmatpush.bf16.msrb.mxu3 %v5727_v11 }
  0x77   : > { %4479 = vmatpush.bf16.msrb.mxu3 %v4086_v17 }
  0x7b   : > { %4480 = vmatpush.bf16.msrb.mxu3 %v4074_v23 }
  0x7e   : > { %622 = vmatmul.bf16.gmra.mxu0 %v5742_v50  ;;  %682 = vmatmul.bf16.gmra.mxu3 %v5745_v51 }
  0x7f   : > { %4481 = vmatpush.bf16.msrb.mxu3 %v4062_v29  ;;  %711 = vmatmul.bf16.gmra.mxu1 %v5742_v50 }
  0x83   : > { %4482 = vmatpush.bf16.msrb.mxu3 %v4050_v35  ;;  %v4102_v35 = vor.u32 %v4416_v33, %v4101_v32  ;;  %v4398_v32 = vld [vmem:[#allocation7 + $0x10] sm:$0xf0] }
  0x85   : > { %788 = vmatpush.bf16.msra.mxu2 %v4102_v35 }
  0x87   : > { %4483 = vmatpush.bf16.msrb.mxu3 %v4038_v41 }
  0x89   : > { %789 = vmatpush.bf16.msra.mxu2 %v4090_v40 }
  0x8b   : > { %4484 = vmatpush.bf16.msrb.mxu3 %v4026_v47  ;;  %v4078_v47 = vor.u32 %v4410_v45, %v4077_v44 }
  0x8d   : > { %790 = vmatpush.bf16.msra.mxu2 %v4078_v47 }
  0x8e   : > { %627 = vmatmul.bf16.gmra.mxu0 %v5751_v52  ;;  %687 = vmatmul.bf16.gmra.mxu3 %v5754_v53 }
  0x8f   : > { %716 = vmatmul.bf16.gmra.mxu1 %v5751_v52  ;;  %4485 = vmatpush.bf16.msra.mxu3 %v4114_v27 }
  0x93   : > { %4486 = vmatpush.bf16.msra.mxu3 %v4102_v35 }
  0x97   : > { %4487 = vmatpush.bf16.msra.mxu3 %v4090_v40 }
  0x9b   : > { %4488 = vmatpush.bf16.msra.mxu3 %v4078_v47 }
  0x9e   : > { %632 = vmatmul.bf16.gmra.mxu0 %v5760_v54  ;;  %692 = vmatmul.bf16.gmra.mxu3 %v5763_v55 }
  0x9f   : > { %721 = vmatmul.bf16.gmra.mxu1 %v5760_v54 }
  0xae   : > { %637 = vmatmul.bf16.gmra.mxu0 %v5769_v56  ;;  %766 = vmatmul.bf16.vlgmr.msrb.gmra.mxu3 %v5734_v49 }
  0xaf   : > { %726 = vmatmul.bf16.gmra.mxu1 %v5769_v56 }
  0xbe   : > { %642 = vmatmul.bf16.gmra.mxu0 %v5775_v57  ;;  %771 = vmatmul.bf16.gmra.mxu3 %v5745_v51 }
  0xbf   : > { %731 = vmatmul.bf16.gmra.mxu1 %v5775_v57 }
  0xce   : > { %647 = vmatmul.bf16.gmra.mxu0 %v5781_v58  ;;  %776 = vmatmul.bf16.gmra.mxu3 %v5754_v53 }
  0xcf   : > { %736 = vmatmul.bf16.gmra.mxu1 %v5781_v58 }
  0xde   : > { %652 = vmatmul.bf16.gmra.mxu0 %v5787_v59  ;;  %781 = vmatmul.bf16.gmra.mxu3 %v5763_v55 }
  0xdf   : > { %741 = vmatmul.bf16.gmra.mxu1 %v5787_v59 }
  0xeb   : > { %v618_v0 = vpop.f32.mrf.mxu0 }
  0xec   : > { %v619_v1 = vadd.f32 %v618_v0, %v5795_v61  ;;  %v707_v2 = vpop.f32.mrf.mxu1 }
  0xed   : > { %v5805_v3 = vadd.f32 %v707_v2, %v5798_v62  ;;  %v4407_v2 = vld [vmem:[#allocation7 + $0x58] sm:$0xf0] }
  0xee   : > { %657 = vmatmul.bf16.gmra.mxu0 %v5801_v63 }
  0xef   : > { %v876_v4 = vpack.c.bf16 %v5805_v3, %v619_v1  ;;  %746 = vmatmul.bf16.gmra.mxu1 %v5801_v63  ;;  %v4065_v1 = vld [vmem:[#allocation7 + $0x50] sm:$0xf] }
  0xf1   : > { %940 = vst [vmem:[#allocation2] sm:$0xff] %v876_v4  ;;  %v5810_v5 = vpop.f32.mrf.mxu3 }
  0xf2   : > { %v679_v44 = vadd.f32 %v5810_v5, %v5795_v61 }
  0xf3   : > { %v620_v6 = vpop.f32.mrf.mxu0 }
  0xf4   : > { %v621_v7 = vadd.f32 %v620_v6, %v5795_v61  ;;  %v709_v8 = vpop.f32.mrf.mxu1  ;;  %v4066_v6 = vor.u32 %v4407_v2, %v4065_v1 }
  0xf5   : > { %v5814_v9 = vadd.f32 %v709_v8, %v5798_v62 }
  0xf6   : > { %791 = vmatpush.bf16.msra.mxu2 %v4066_v6  ;;  %4489 = vmatpush.bf16.msra.mxu3 %v4066_v6 }
  0xf7   : > { %v878_v10 = vpack.c.bf16 %v5814_v9, %v621_v7  ;;  %v5858_v7 = vld [vmem:[%s5704_s18 + $0x58] sm:$0xff] }
  0xf9   : > { %942 = vst [vmem:[#allocation2 + $0xc] sm:$0xff] %v878_v10  ;;  %v5817_v11 = vpop.f32.mrf.mxu3 }
  0xfb   : > { %v623_v13 = vpop.f32.mrf.mxu0 }
  0xfc   : > { %v624_v14 = vadd.f32 %v623_v13, %v5795_v61  ;;  %v712_v15 = vpop.f32.mrf.mxu1 }
  0xfd   : > { %v5824_v16 = vadd.f32 %v712_v15, %v5798_v62  ;;  %v4404_v15 = vld [vmem:[#allocation7 + $0x40] sm:$0xf0] }
  0xfe   : > { %662 = vmatmul.bf16.gmra.mxu0 %v5820_v12 }
  0xff   : > { %v880_v17 = vpack.c.bf16 %v5824_v16, %v624_v14  ;;  %751 = vmatmul.bf16.gmra.mxu1 %v5820_v12  ;;  %v4053_v14 = vld [vmem:[#allocation7 + $0x38] sm:$0xf] }
 0x101   : > { %944 = vst [vmem:[#allocation2 + $0x18] sm:$0xff] %v880_v17  ;;  %v5829_v18 = vpop.f32.mrf.mxu3 }
 0x103   : > { %v625_v19 = vpop.f32.mrf.mxu0 }
 0x104   : > { %v626_v20 = vadd.f32 %v625_v19, %v5795_v61  ;;  %v714_v21 = vpop.f32.mrf.mxu1  ;;  %v4054_v19 = vor.u32 %v4404_v15, %v4053_v14 }
 0x105   : > { %v5833_v22 = vadd.f32 %v714_v21, %v5798_v62  ;;  %v4041_v21 = vld [vmem:[#allocation7 + $0x20] sm:$0xf] }
 0x106   : > { %792 = vmatpush.bf16.msra.mxu2 %v4054_v19  ;;  %4490 = vmatpush.bf16.msra.mxu3 %v4054_v19 }
 0x107   : > { %v882_v23 = vpack.c.bf16 %v5833_v22, %v626_v20 }
 0x109   : > { %946 = vst [vmem:[#allocation2 + $0x24] sm:$0xff] %v882_v23  ;;  %v5836_v26 = vpop.f32.mrf.mxu3  ;;  %v4401_v23 = vld [vmem:[#allocation7 + $0x28] sm:$0xf0] }
 0x10a   : > { %v4042_v25 = vor.u32 %v4401_v23, %v4041_v21 }
 0x10b   : > { %v628_v29 = vpop.f32.mrf.mxu0 }
 0x10c   : > { %v629_v30 = vadd.f32 %v628_v29, %v5795_v61  ;;  %v717_v31 = vpop.f32.mrf.mxu1  ;;  %793 = vmatpush.bf16.msra.mxu2 %v4042_v25  ;;  %4491 = vmatpush.bf16.msra.mxu3 %v4042_v25 }
 0x10d   : > { %v5843_v34 = vadd.f32 %v717_v31, %v5798_v62  ;;  %v4029_v31 = vld [vmem:[#allocation7 + $0x8] sm:$0xf] }
 0x10e   : > { %667 = vmatmul.bf16.gmra.mxu0 %v5839_v28  ;;  %v4030_v35 = vor.u32 %v4398_v32, %v4029_v31 }
 0x10f   : > { %v884_v36 = vpack.c.bf16 %v5843_v34, %v629_v30  ;;  %756 = vmatmul.bf16.gmra.mxu1 %v5839_v28 }
 0x110   : > { %794 = vmatpush.bf16.msra.mxu2 %v4030_v35  ;;  %4492 = vmatpush.bf16.msra.mxu3 %v4030_v35 }
 0x111   : > { %948 = vst [vmem:[#allocation2 + $0x30] sm:$0xff] %v884_v36  ;;  %v5848_v39 = vpop.f32.mrf.mxu3 }
 0x113   : > { %v630_v41 = vpop.f32.mrf.mxu0  ;;  %795 = vmatmul.bf16.vlgmr.msra.gmra.mxu2 %v5731_v48  ;;  %855 = vmatmul.bf16.vlgmr.msra.gmra.mxu3 %v5734_v49 }
 0x114   : > { %v631_v42 = vadd.f32 %v630_v41, %v5795_v61  ;;  %v719_v43 = vpop.f32.mrf.mxu1 }
 0x115   : > { %v5852_v46 = vadd.f32 %v719_v43, %v5798_v62 }
 0x117   : > { %v886_v0 = vpack.c.bf16 %v5852_v46, %v631_v42 }
 0x119   : > { %950 = vst [vmem:[#allocation2 + $0x3c] sm:$0xff] %v886_v0  ;;  %v5855_v4 = vpop.f32.mrf.mxu3 }
 0x11b   : > { %v633_v8 = vpop.f32.mrf.mxu0 }
 0x11c   : > { %v634_v10 = vadd.f32 %v633_v8, %v5795_v61  ;;  %v722_v13 = vpop.f32.mrf.mxu1  ;;  %v681_v8 = vadd.f32 %v5817_v11, %v5795_v61 }
 0x11d   : > { %v5862_v17 = vadd.f32 %v722_v13, %v5798_v62 }
 0x11e   : > { %672 = vmatmul.bf16.gmra.mxu0 %v5858_v7 }
 0x11f   : > { %v888_v20 = vpack.c.bf16 %v5862_v17, %v634_v10  ;;  %761 = vmatmul.bf16.gmra.mxu1 %v5858_v7 }
 0x121   : > { %952 = vst [vmem:[#allocation2 + $0x48] sm:$0xff] %v888_v20  ;;  %v5867_v24 = vpop.f32.mrf.mxu3 }
 0x123   : > { %v635_v27 = vpop.f32.mrf.mxu0  ;;  %800 = vmatmul.bf16.gmra.mxu2 %v5742_v50  ;;  %860 = vmatmul.bf16.gmra.mxu3 %v5745_v51  ;;  %v684_v50 = vadd.f32 %v5829_v18, %v5795_v61 }
 0x124   : > { %v636_v29 = vadd.f32 %v635_v27, %v5795_v61  ;;  %v724_v30 = vpop.f32.mrf.mxu1 }
 0x125   : > { %v5871_v33 = vadd.f32 %v724_v30, %v5798_v62 }
 0x127   : > { %v890_v36 = vpack.c.bf16 %v5871_v33, %v636_v29 }
 0x129   : > { %954 = vst [vmem:[#allocation2 + $0x54] sm:$0xff] %v890_v36  ;;  %v5874_v37 = vpop.f32.mrf.mxu3  ;;  %v686_v36 = vadd.f32 %v5836_v26, %v5795_v61 }
 0x12b   : > { %v638_v38 = vpop.f32.mrf.mxu0 }
 0x12c   : > { %v639_v40 = vadd.f32 %v638_v38, %v5795_v61  ;;  %v727_v41 = vpop.f32.mrf.mxu1 }
 0x12d   : > { %v5880_v42 = vadd.f32 %v727_v41, %v5798_v62 }
 0x12f   : > { %v892_v43 = vpack.c.bf16 %v5880_v42, %v639_v40 }
 0x131   : > { %956 = vst [vmem:[#allocation2 + $0x60] sm:$0xff] %v892_v43  ;;  %v767_v45 = vpop.f32.mrf.mxu3 }
 0x132   : > { %v5886_v47 = vadd.f32 %v767_v45, %v5798_v62 }
 0x133   : > { %v640_v48 = vpop.f32.mrf.mxu0  ;;  %805 = vmatmul.bf16.gmra.mxu2 %v5751_v52  ;;  %865 = vmatmul.bf16.gmra.mxu3 %v5754_v53  ;;  %v689_v52 = vadd.f32 %v5848_v39, %v5795_v61 }
 0x134   : > { %v924_v0 = vpack.c.bf16 %v5886_v47, %v679_v44  ;;  %v641_v49 = vadd.f32 %v640_v48, %v5795_v61  ;;  %v729_v1 = vpop.f32.mrf.mxu1  ;;  %v4657_v2 = vpack.i.bf16 %v5886_v47, %v5880_v42 }
 0x135   : > { %v5893_v6 = vadd.f32 %v729_v1, %v5798_v62 }
 0x136   : > { %988 = vst [vmem:[#allocation2 + $0x120] sm:$0xff] %v924_v0 }
 0x137   : > { %v894_v5 = vpack.c.bf16 %v5893_v6, %v641_v49 }
 0x139   : > { %958 = vst [vmem:[#allocation2 + $0x6c] sm:$0xff] %v894_v5  ;;  %v769_v10 = vpop.f32.mrf.mxu3 }
 0x13a   : > { %v5899_v13 = vadd.f32 %v769_v10, %v5798_v62 }
 0x13b   : > { %v643_v14 = vpop.f32.mrf.mxu0 }
 0x13c   : > { %v926_v15 = vpack.c.bf16 %v5899_v13, %v681_v8  ;;  %v644_v19 = vadd.f32 %v643_v14, %v5795_v61  ;;  %v732_v20 = vpop.f32.mrf.mxu1  ;;  %v4659_v21 = vpack.i.bf16 %v5899_v13, %v5893_v6 }
 0x13d   : > { %v5908_v11 = vadd.f32 %v732_v20, %v5798_v62 }
 0x13e   : > { %990 = vst [vmem:[#allocation2 + $0x12c] sm:$0xff] %v926_v15 }
 0x13f   : > { %v896_v23 = vpack.c.bf16 %v5908_v11, %v644_v19  ;;  %v691_v19 = vadd.f32 %v5855_v4, %v5795_v61 }
 0x141   : > { %960 = vst [vmem:[#allocation2 + $0x78] sm:$0xff] %v896_v23  ;;  %v772_v25 = vpop.f32.mrf.mxu3 }
 0x142   : > { %v5914_v51 = vadd.f32 %v772_v25, %v5798_v62 }
 0x143   : > { %v645_v27 = vpop.f32.mrf.mxu0  ;;  %810 = vmatmul.bf16.gmra.mxu2 %v5760_v54  ;;  %870 = vmatmul.bf16.gmra.mxu3 %v5763_v55  ;;  %v694_v54 = vadd.f32 %v5867_v24, %v5795_v61 }
 0x144   : > { %v928_v29 = vpack.c.bf16 %v5914_v51, %v684_v50  ;;  %v646_v30 = vadd.f32 %v645_v27, %v5795_v61  ;;  %v734_v31 = vpop.f32.mrf.mxu1  ;;  %v4661_v32 = vpack.i.bf16 %v5914_v51, %v5908_v11 }
 0x145   : > { %v5921_v35 = vadd.f32 %v734_v31, %v5798_v62 }
 0x146   : > { %992 = vst [vmem:[#allocation2 + $0x138] sm:$0xff] %v928_v29 }
 0x147   : > { %v898_v18 = vpack.c.bf16 %v5921_v35, %v646_v30 }
 0x149   : > { %962 = vst [vmem:[#allocation2 + $0x84] sm:$0xff] %v898_v18  ;;  %v774_v38 = vpop.f32.mrf.mxu3 }
 0x14a   : > { %v5927_v40 = vadd.f32 %v774_v38, %v5798_v62 }
 0x14b   : > { %v648_v41 = vpop.f32.mrf.mxu0 }
 0x14c   : > { %v930_v43 = vpack.c.bf16 %v5927_v40, %v686_v36  ;;  %v649_v44 = vadd.f32 %v648_v41, %v5795_v61  ;;  %v737_v45 = vpop.f32.mrf.mxu1  ;;  %v4663_v48 = vpack.i.bf16 %v5927_v40, %v5921_v35 }
 0x14d   : > { %v5936_v26 = vadd.f32 %v737_v45, %v5798_v62 }
 0x14e   : > { %994 = vst [vmem:[#allocation2 + $0x144] sm:$0xff] %v930_v43 }
 0x14f   : > { %v900_v0 = vpack.c.bf16 %v5936_v26, %v649_v44 }
 0x151   : > { %964 = vst [vmem:[#allocation2 + $0x90] sm:$0xff] %v900_v0  ;;  %v777_v49 = vpop.f32.mrf.mxu3  ;;  %v696_v0 = vadd.f32 %v5874_v37, %v5795_v61 }
 0x152   : > { %v5942_v53 = vadd.f32 %v777_v49, %v5798_v62 }
 0x153   : > { %v650_v1 = vpop.f32.mrf.mxu0  ;;  %815 = vmatmul.bf16.gmra.mxu2 %v5769_v56 }
 0x154   : > { %v932_v5 = vpack.c.bf16 %v5942_v53, %v689_v52  ;;  %v651_v8 = vadd.f32 %v650_v1, %v5795_v61  ;;  %v739_v10 = vpop.f32.mrf.mxu1  ;;  %v4665_v14 = vpack.i.bf16 %v5942_v53, %v5936_v26 }
 0x155   : > { %v5949_v15 = vadd.f32 %v739_v10, %v5798_v62 }
 0x156   : > { %996 = vst [vmem:[#allocation2 + $0x150] sm:$0xff] %v932_v5 }
 0x157   : > { %v902_v39 = vpack.c.bf16 %v5949_v15, %v651_v8 }
 0x159   : > { %966 = vst [vmem:[#allocation2 + $0x9c] sm:$0xff] %v902_v39  ;;  %v779_v20 = vpop.f32.mrf.mxu3 }
 0x15a   : > { %v5955_v23 = vadd.f32 %v779_v20, %v5798_v62 }
 0x15b   : > { %v653_v50 = vpop.f32.mrf.mxu0 }
 0x15c   : > { %v934_v25 = vpack.c.bf16 %v5955_v23, %v691_v19  ;;  %v654_v27 = vadd.f32 %v653_v50, %v5795_v61  ;;  %v742_v29 = vpop.f32.mrf.mxu1  ;;  %v4667_v30 = vpack.i.bf16 %v5955_v23, %v5949_v15 }
 0x15d   : > { %v5964_v4 = vadd.f32 %v742_v29, %v5798_v62 }
 0x15e   : > { %998 = vst [vmem:[#allocation2 + $0x15c] sm:$0xff] %v934_v25 }
 0x15f   : > { %v904_v31 = vpack.c.bf16 %v5964_v4, %v654_v27 }
 0x161   : > { %968 = vst [vmem:[#allocation2 + $0xa8] sm:$0xff] %v904_v31  ;;  %v782_v18 = vpop.f32.mrf.mxu3 }
 0x162   : > { %v5970_v55 = vadd.f32 %v782_v18, %v5798_v62 }
 0x163   : > { %v655_v36 = vpop.f32.mrf.mxu0  ;;  %820 = vmatmul.bf16.gmra.mxu2 %v5775_v57 }
 0x164   : > { %v936_v38 = vpack.c.bf16 %v5970_v55, %v694_v54  ;;  %v656_v41 = vadd.f32 %v655_v36, %v5795_v61  ;;  %v744_v43 = vpop.f32.mrf.mxu1  ;;  %v4669_v44 = vpack.i.bf16 %v5970_v55, %v5964_v4 }
 0x165   : > { %v5977_v45 = vadd.f32 %v744_v43, %v5798_v62 }
 0x166   : > { %1000 = vst [vmem:[#allocation2 + $0x168] sm:$0xff] %v936_v38 }
 0x167   : > { %v906_v24 = vpack.c.bf16 %v5977_v45, %v656_v41 }
 0x169   : > { %970 = vst [vmem:[#allocation2 + $0xb4] sm:$0xff] %v906_v24  ;;  %v784_v52 = vpop.f32.mrf.mxu3 }
 0x16a   : > { %v5983_v49 = vadd.f32 %v784_v52, %v5798_v62 }
 0x16b   : > { %v658_v1 = vpop.f32.mrf.mxu0 }
 0x16c   : > { %v938_v5 = vpack.c.bf16 %v5983_v49, %v696_v0  ;;  %v659_v8 = vadd.f32 %v658_v1, %v5795_v61  ;;  %v747_v10 = vpop.f32.mrf.mxu1  ;;  %v4671_v39 = vpack.i.bf16 %v5983_v49, %v5977_v45 }
 0x16d   : > { %v748_v19 = vadd.f32 %v747_v10, %v5798_v62 }
 0x16e   : > { %1002 = vst [vmem:[#allocation2 + $0x174] sm:$0xff] %v938_v5 }
 0x16f   : > { %v908_v37 = vpack.c.bf16 %v748_v19, %v659_v8  ;;  %v4641_v20 = vpack.i.bf16 %v748_v19, %v5805_v3 }
 0x171   : > { %972 = vst [vmem:[#allocation2 + $0xc0] sm:$0xff] %v908_v37  ;;  %4642 = vxpose.xlu0.b32.start [1/16] %v4641_v20, 128 }
 0x173   : > { %v660_v50 = vpop.f32.mrf.mxu0  ;;  %825 = vmatmul.bf16.gmra.mxu2 %v5781_v58 }
 0x174   : > { %v661_v56 = vadd.f32 %v660_v50, %v5795_v61  ;;  %v749_v25 = vpop.f32.mrf.mxu1 }
 0x175   : > { %v750_v27 = vadd.f32 %v749_v25, %v5798_v62 }
 0x177   : > { %v910_v29 = vpack.c.bf16 %v750_v27, %v661_v56  ;;  %v4643_v31 = vpack.i.bf16 %v750_v27, %v5814_v9 }
 0x179   : > { %974 = vst [vmem:[#allocation2 + $0xcc] sm:$0xff] %v910_v29  ;;  %4644 = vxpose.xlu0.b32.cont [2/16] %v4643_v31, 128 }
 0x17b   : > { %v663_v54 = vpop.f32.mrf.mxu0 }
 0x17c   : > { %v664_v18 = vadd.f32 %v663_v54, %v5795_v61  ;;  %v752_v36 = vpop.f32.mrf.mxu1 }
 0x17d   : > { %v753_v3 = vadd.f32 %v752_v36, %v5798_v62 }
 0x17f   : > { %v912_v38 = vpack.c.bf16 %v753_v3, %v664_v18  ;;  %v4645_v41 = vpack.i.bf16 %v753_v3, %v5824_v16 }
 0x181   : > { %976 = vst [vmem:[#allocation2 + $0xd8] sm:$0xff] %v912_v38  ;;  %4646 = vxpose.xlu0.b32.cont [3/16] %v4645_v41, 128  ;;  %v6018_v41 = vperm.slane %v5792_v60, 2 }
 0x183   : > { %v665_v43 = vpop.f32.mrf.mxu0  ;;  %830 = vmatmul.bf16.gmra.mxu2 %v5787_v59 }
 0x184   : > { %v666_v24 = vadd.f32 %v665_v43, %v5795_v61  ;;  %v754_v0 = vpop.f32.mrf.mxu1 }
 0x185   : > { %v755_v9 = vadd.f32 %v754_v0, %v5798_v62 }
 0x187   : > { %v914_v52 = vpack.c.bf16 %v755_v9, %v666_v24  ;;  %v4647_v57 = vpack.i.bf16 %v755_v9, %v5833_v22 }
 0x189   : > { %978 = vst [vmem:[#allocation2 + $0xe4] sm:$0xff] %v914_v52  ;;  %4648 = vxpose.xlu0.b32.cont [4/16] %v4647_v57, 128 }
 0x18b   : > { %v668_v1 = vpop.f32.mrf.mxu0 }
 0x18c   : > { %v669_v5 = vadd.f32 %v668_v1, %v5795_v61  ;;  %v757_v8 = vpop.f32.mrf.mxu1 }
 0x18d   : > { %v758_v16 = vadd.f32 %v757_v8, %v5798_v62 }
 0x18f   : > { %v916_v10 = vpack.c.bf16 %v758_v16, %v669_v5  ;;  %v4649_v19 = vpack.i.bf16 %v758_v16, %v5843_v34 }
 0x191   : > { %980 = vst [vmem:[#allocation2 + $0xf0] sm:$0xff] %v916_v10  ;;  %4650 = vxpose.xlu0.b32.cont [5/16] %v4649_v19, 128 }
 0x193   : > { %v670_v37 = vpop.f32.mrf.mxu0  ;;  %835 = vmatmul.bf16.gmra.mxu2 %v5801_v63 }
 0x194   : > { %v671_v20 = vadd.f32 %v670_v37, %v5795_v61  ;;  %v759_v50 = vpop.f32.mrf.mxu1 }
 0x195   : > { %v760_v22 = vadd.f32 %v759_v50, %v5798_v62 }
 0x196   : > { %v796_v43 = vpop.f32.mrf.mxu2 }
 0x197   : > { %v918_v56 = vpack.c.bf16 %v760_v22, %v671_v20  ;;  %v4651_v58 = vpack.i.bf16 %v760_v22, %v5852_v46 }
 0x199   : > { %982 = vst [vmem:[#allocation2 + $0xfc] sm:$0xff] %v918_v56  ;;  %4652 = vxpose.xlu0.b32.cont [6/16] %v4651_v58, 128 }
 0x19b   : > { %v673_v25 = vpop.f32.mrf.mxu0 }
 0x19c   : > { %v674_v27 = vadd.f32 %v673_v25, %v5795_v61  ;;  %v762_v29 = vpop.f32.mrf.mxu1 }
 0x19d   : > { %v763_v34 = vadd.f32 %v762_v29, %v5798_v62 }
 0x19f   : > { %v920_v31 = vpack.c.bf16 %v763_v34, %v674_v27  ;;  %v4653_v54 = vpack.i.bf16 %v763_v34, %v5862_v17  ;;  %v797_v17 = vadd.f32 %v796_v43, %v6018_v41 }
 0x1a1   : > { %984 = vst [vmem:[#allocation2 + $0x108] sm:$0xff] %v920_v31  ;;  %4654 = vxpose.xlu0.b32.cont [7/16] %v4653_v54, 128  ;;  %v877_v24 = vpack.c.bf16 %v797_v17, %v797_v17 }
 0x1a3   : > { %v675_v18 = vpop.f32.mrf.mxu0  ;;  %941 = vst [vmem:[#allocation2 + $0x8] sm:$0xf] %v877_v24  ;;  %840 = vmatmul.bf16.gmra.mxu2 %v5820_v12 }
 0x1a4   : > { %v676_v36 = vadd.f32 %v675_v18, %v5795_v61  ;;  %v764_v3 = vpop.f32.mrf.mxu1  ;;  %v798_v61 = vpop.f32.mrf.mxu2 }
 0x1a5   : > { %v765_v46 = vadd.f32 %v764_v3, %v5798_v62  ;;  %v799_v62 = vadd.f32 %v798_v61, %v6018_v41 }
 0x1a7   : > { %v922_v38 = vpack.c.bf16 %v765_v46, %v676_v36  ;;  %v4655_v59 = vpack.i.bf16 %v765_v46, %v5871_v33  ;;  %v879_v33 = vpack.c.bf16 %v799_v62, %v799_v62  ;;  %v856_v46 = vpop.f32.mrf.mxu3 }
 0x1a9   : > { %986 = vst [vmem:[#allocation2 + $0x114] sm:$0xff] %v922_v38  ;;  %4656 = vxpose.xlu0.b32.cont [8/16] %v4655_v59, 128  ;;  %v857_v38 = vadd.f32 %v856_v46, %v6018_v41 }
 0x1aa   : > { %943 = vst [vmem:[#allocation2 + $0x14] sm:$0xf] %v879_v33 }
 0x1ab   : > { %v925_v17 = vpack.c.bf16 %v857_v38, %v857_v38 }
 0x1ac   : > { %v801_v60 = vpop.f32.mrf.mxu2 }
 0x1ad   : > { %v802_v63 = vadd.f32 %v801_v60, %v6018_v41  ;;  %989 = vst [vmem:[#allocation2 + $0x128] sm:$0xf] %v925_v17 }
 0x1af   : > { %v881_v0 = vpack.c.bf16 %v802_v63, %v802_v63  ;;  %v858_v63 = vpop.f32.mrf.mxu3 }
 0x1b1   : > { %4658 = vxpose.xlu0.b32.cont [9/16] %v4657_v2, 128  ;;  %945 = vst [vmem:[#allocation2 + $0x20] sm:$0xf] %v881_v0  ;;  %v859_v0 = vadd.f32 %v858_v63, %v6018_v41 }
 0x1b3   : > { %845 = vmatmul.bf16.gmra.mxu2 %v5839_v28 }
 0x1b4   : > { %v803_v42 = vpop.f32.mrf.mxu2 }
 0x1b5   : > { %v804_v47 = vadd.f32 %v803_v42, %v6018_v41 }
 0x1b7   : > { %v883_v2 = vpack.c.bf16 %v804_v47, %v804_v47 }
 0x1b9   : > { %4660 = vxpose.xlu0.b32.cont [10/16] %v4659_v21, 128  ;;  %947 = vst [vmem:[#allocation2 + $0x2c] sm:$0xf] %v883_v2  ;;  %v927_v2 = vpack.c.bf16 %v859_v0, %v859_v0 }
 0x1bb   : > { %991 = vst [vmem:[#allocation2 + $0x134] sm:$0xf] %v927_v2 }
 0x1bc   : > { %v806_v12 = vpop.f32.mrf.mxu2 }
 0x1bd   : > { %v807_v6 = vadd.f32 %v806_v12, %v6018_v41 }
 0x1bf   : > { %v885_v13 = vpack.c.bf16 %v807_v6, %v807_v6 }
 0x1c1   : > { %4662 = vxpose.xlu0.b32.cont [11/16] %v4661_v32, 128  ;;  %949 = vst [vmem:[#allocation2 + $0x38] sm:$0xf] %v885_v13 }
 0x1c3   : > { %850 = vmatmul.bf16.gmra.mxu2 %v5858_v7 }
 0x1c4   : > { %v808_v21 = vpop.f32.mrf.mxu2 }
 0x1c5   : > { %v809_v11 = vadd.f32 %v808_v21, %v6018_v41 }
 0x1c7   : > { %v887_v51 = vpack.c.bf16 %v809_v11, %v809_v11 }
 0x1c9   : > { %4664 = vxpose.xlu0.b32.cont [12/16] %v4663_v48, 128  ;;  %951 = vst [vmem:[#allocation2 + $0x44] sm:$0xf] %v887_v51  ;;  %v861_v51 = vpop.f32.mrf.mxu3 }
 0x1cc   : > { %v811_v28 = vpop.f32.mrf.mxu2 }
 0x1cd   : > { %v812_v32 = vadd.f32 %v811_v28, %v6018_v41  ;;  %v862_v28 = vadd.f32 %v861_v51, %v6018_v41 }
 0x1cf   : > { %v889_v35 = vpack.c.bf16 %v812_v32, %v812_v32 }
 0x1d1   : > { %4666 = vxpose.xlu0.b32.cont [13/16] %v4665_v14, 128  ;;  %953 = vst [vmem:[#allocation2 + $0x50] sm:$0xf] %v889_v35 }
 0x1d4   : > { %v813_v40 = vpop.f32.mrf.mxu2 }
 0x1d5   : > { %v814_v48 = vadd.f32 %v813_v40, %v6018_v41  ;;  %v929_v40 = vpack.c.bf16 %v862_v28, %v862_v28 }
 0x1d7   : > { %v891_v26 = vpack.c.bf16 %v814_v48, %v814_v48  ;;  %993 = vst [vmem:[#allocation2 + $0x140] sm:$0xf] %v929_v40 }
 0x1d9   : > { %4668 = vxpose.xlu0.b32.cont [14/16] %v4667_v30, 128  ;;  %955 = vst [vmem:[#allocation2 + $0x5c] sm:$0xf] %v891_v26 }
 0x1dc   : > { %v816_v53 = vpop.f32.mrf.mxu2 }
 0x1dd   : > { %v817_v7 = vadd.f32 %v816_v53, %v6018_v41 }
 0x1df   : > { %v893_v14 = vpack.c.bf16 %v817_v7, %v817_v7 }
 0x1e1   : > { %4670 = vxpose.xlu0.b32.cont [15/16] %v4669_v44, 128  ;;  %957 = vst [vmem:[#allocation2 + $0x68] sm:$0xf] %v893_v14 }
 0x1e4   : > { %v818_v15 = vpop.f32.mrf.mxu2 }
 0x1e5   : > { %v819_v23 = vadd.f32 %v818_v15, %v6018_v41  ;;  %v863_v15 = vpop.f32.mrf.mxu3 }
 0x1e7   : > { %v895_v30 = vpack.c.bf16 %v819_v23, %v819_v23  ;;  %v864_v23 = vadd.f32 %v863_v15, %v6018_v41 }
 0x1e9   : > { %4672 = vxpose.xlu0.b32.end [16/16] %v4671_v39, 128  ;;  %959 = vst [vmem:[#allocation2 + $0x74] sm:$0xf] %v895_v30 }
 0x1ec   : > { %v821_v4 = vpop.f32.mrf.mxu2 }
 0x1ed   : > { %v822_v55 = vadd.f32 %v821_v4, %v6018_v41 }
 0x1ef   : > { %v897_v44 = vpack.c.bf16 %v822_v55, %v822_v55  ;;  %v931_v55 = vpack.c.bf16 %v864_v23, %v864_v23 }
 0x1f1   : > { %961 = vst [vmem:[#allocation2 + $0x80] sm:$0xf] %v897_v44 }
 0x1f2   : > { %995 = vst [vmem:[#allocation2 + $0x14c] sm:$0xf] %v931_v55 }
 0x1f4   : > { %v823_v9 = vpop.f32.mrf.mxu2 }
 0x1f5   : > { %v824_v45 = vadd.f32 %v823_v9, %v6018_v41 }
 0x1f7   : > { %v899_v49 = vpack.c.bf16 %v824_v45, %v824_v45 }
 0x1f9   : > { %963 = vst [vmem:[#allocation2 + $0x8c] sm:$0xf] %v899_v49 }
 0x1fc   : > { %v826_v39 = vpop.f32.mrf.mxu2 }
 0x1fd   : > { %v827_v52 = vadd.f32 %v826_v39, %v6018_v41 }
 0x1ff   : > { %v901_v57 = vpack.c.bf16 %v827_v52, %v827_v52  ;;  %v866_v52 = vpop.f32.mrf.mxu3 }
 0x201   : > { %965 = vst [vmem:[#allocation2 + $0x98] sm:$0xf] %v901_v57  ;;  %v867_v57 = vadd.f32 %v866_v52, %v6018_v41 }
 0x204   : > { %v828_v5 = vpop.f32.mrf.mxu2 }
 0x205   : > { %v829_v10 = vadd.f32 %v828_v5, %v6018_v41 }
 0x207   : > { %v903_v37 = vpack.c.bf16 %v829_v10, %v829_v10 }
 0x209   : > { %967 = vst [vmem:[#allocation2 + $0xa4] sm:$0xf] %v903_v37 }
 0x20c   : > { %v831_v50 = vpop.f32.mrf.mxu2 }
 0x20d   : > { %v832_v58 = vadd.f32 %v831_v50, %v6018_v41  ;;  %v868_v50 = vpop.f32.mrf.mxu3 }
 0x20f   : > { %v905_v27 = vpack.c.bf16 %v832_v58, %v832_v58 }
 0x211   : > { %969 = vst [vmem:[#allocation2 + $0xb0] sm:$0xf] %v905_v27 }
 0x214   : > { %v833_v34 = vpop.f32.mrf.mxu2 }
 0x215   : > { %v4673_v1 = vpop.trf.xlu0  ;;  %v834_v18 = vadd.f32 %v833_v34, %v6018_v41 }
 0x216   : > { %v4677_v8 = vunpack.i.h.bf16 %v4673_v1  ;;  %v4674_v16 = vunpack.i.l.bf16 %v4673_v1 }
 0x217   : > { %v907_v3 = vpack.c.bf16 %v834_v18, %v834_v18  ;;  %v871_v18 = vpop.f32.mrf.mxu3 }
 0x218   : > { %v1068_v19 = vpack.c.bf16 %v4677_v8, %v4674_v16  ;;  %v933_v8 = vpack.c.bf16 %v867_v57, %v867_v57 }
 0x219   : > { %971 = vst [vmem:[#allocation2 + $0xbc] sm:$0xf] %v907_v3 }
 0x21a   : > { %1084 = vst [vmem:[#allocation3] sm:$0xff] %v1068_v19 }
 0x21b   : > { %997 = vst [vmem:[#allocation2 + $0x158] sm:$0xf] %v933_v8 }
 0x21c   : > { %v836_v43 = vpop.f32.mrf.mxu2 }
 0x21d   : > { %v4678_v20 = vpop.trf.xlu0  ;;  %v837_v62 = vadd.f32 %v836_v43, %v6018_v41 }
 0x21e   : > { %v4682_v22 = vunpack.i.h.bf16 %v4678_v20  ;;  %v4679_v56 = vunpack.i.l.bf16 %v4678_v20 }
 0x21f   : > { %v909_v60 = vpack.c.bf16 %v837_v62, %v837_v62  ;;  %v873_v62 = vpop.f32.mrf.mxu3 }
 0x220   : > { %v1069_v25 = vpack.c.bf16 %v4682_v22, %v4679_v56  ;;  %v869_v22 = vadd.f32 %v868_v50, %v6018_v41 }
 0x221   : > { %973 = vst [vmem:[#allocation2 + $0xc8] sm:$0xf] %v909_v60 }
 0x222   : > { %1085 = vst [vmem:[#allocation3 + $0x8] sm:$0xff] %v1069_v25  ;;  %v935_v25 = vpack.c.bf16 %v869_v22, %v869_v22 }
 0x224   : > { %v838_v47 = vpop.f32.mrf.mxu2  ;;  %999 = vst [vmem:[#allocation2 + $0x164] sm:$0xf] %v935_v25 }
 0x225   : > { %v4683_v29 = vpop.trf.xlu0  ;;  %v839_v13 = vadd.f32 %v838_v47, %v6018_v41 }
 0x226   : > { %v4687_v31 = vunpack.i.h.bf16 %v4683_v29  ;;  %v4684_v54 = vunpack.i.l.bf16 %v4683_v29 }
 0x227   : > { %v911_v11 = vpack.c.bf16 %v839_v13, %v839_v13 }
 0x228   : > { %v1070_v36 = vpack.c.bf16 %v4687_v31, %v4684_v54 }
 0x229   : > { %975 = vst [vmem:[#allocation2 + $0xd4] sm:$0xf] %v911_v11 }
 0x22a   : > { %1086 = vst [vmem:[#allocation3 + $0x10] sm:$0xff] %v1070_v36  ;;  %v872_v36 = vadd.f32 %v871_v18, %v6018_v41 }
 0x22c   : > { %v841_v35 = vpop.f32.mrf.mxu2  ;;  %v937_v38 = vpack.c.bf16 %v872_v36, %v872_v36 }
 0x22d   : > { %v4688_v59 = vpop.trf.xlu0  ;;  %v842_v53 = vadd.f32 %v841_v35, %v6018_v41 }
 0x22e   : > { %v4692_v24 = vunpack.i.h.bf16 %v4688_v59  ;;  %v4689_v61 = vunpack.i.l.bf16 %v4688_v59  ;;  %1001 = vst [vmem:[#allocation2 + $0x170] sm:$0xf] %v937_v38 }
 0x22f   : > { %v913_v14 = vpack.c.bf16 %v842_v53, %v842_v53 }
 0x230   : > { %v1071_v33 = vpack.c.bf16 %v4692_v24, %v4689_v61 }
 0x231   : > { %977 = vst [vmem:[#allocation2 + $0xe0] sm:$0xf] %v913_v14 }
 0x232   : > { %1087 = vst [vmem:[#allocation3 + $0x18] sm:$0xff] %v1071_v33  ;;  %v874_v33 = vadd.f32 %v873_v62, %v6018_v41 }
 0x234   : > { %v843_v4 = vpop.f32.mrf.mxu2  ;;  %v939_v0 = vpack.c.bf16 %v874_v33, %v874_v33 }
 0x235   : > { %v4693_v42 = vpop.trf.xlu0  ;;  %v844_v45 = vadd.f32 %v843_v4, %v6018_v41 }
 0x236   : > { %v4697_v12 = vunpack.i.h.bf16 %v4693_v42  ;;  %v4694_v6 = vunpack.i.l.bf16 %v4693_v42  ;;  %1003 = vst [vmem:[#allocation2 + $0x17c] sm:$0xf] %v939_v0 }
 0x237   : > { %v915_v39 = vpack.c.bf16 %v844_v45, %v844_v45 }
 0x238   : > { %v1072_v21 = vpack.c.bf16 %v4697_v12, %v4694_v6 }
 0x239   : > { %979 = vst [vmem:[#allocation2 + $0xec] sm:$0xf] %v915_v39 }
 0x23a   : > { %1088 = vst [vmem:[#allocation3 + $0x20] sm:$0xff] %v1072_v21 }
 0x23c   : > { %v846_v5 = vpop.f32.mrf.mxu2 }
 0x23d   : > { %v4698_v32 = vpop.trf.xlu0  ;;  %v847_v19 = vadd.f32 %v846_v5, %v6018_v41 }
 0x23e   : > { %v4702_v48 = vunpack.i.h.bf16 %v4698_v32  ;;  %v4699_v26 = vunpack.i.l.bf16 %v4698_v32 }
 0x23f   : > { %v917_v20 = vpack.c.bf16 %v847_v19, %v847_v19 }
 0x240   : > { %v1073_v7 = vpack.c.bf16 %v4702_v48, %v4699_v26 }
 0x241   : > { %981 = vst [vmem:[#allocation2 + $0xf8] sm:$0xf] %v917_v20 }
 0x242   : > { %1089 = vst [vmem:[#allocation3 + $0x28] sm:$0xff] %v1073_v7 }
 0x244   : > { %v848_v58 = vpop.f32.mrf.mxu2 }
 0x245   : > { %v4703_v30 = vpop.trf.xlu0  ;;  %v849_v34 = vadd.f32 %v848_v58, %v6018_v41 }
 0x246   : > { %v4707_v44 = vunpack.i.h.bf16 %v4703_v30  ;;  %v4704_v9 = vunpack.i.l.bf16 %v4703_v30 }
 0x247   : > { %v919_v54 = vpack.c.bf16 %v849_v34, %v849_v34 }
 0x248   : > { %v1074_v49 = vpack.c.bf16 %v4707_v44, %v4704_v9 }
 0x249   : > { %983 = vst [vmem:[#allocation2 + $0x104] sm:$0xf] %v919_v54 }
 0x24a   : > { %1090 = vst [vmem:[#allocation3 + $0x30] sm:$0xff] %v1074_v49 }
 0x24c   : > { %v851_v46 = vpop.f32.mrf.mxu2 }
 0x24d   : > { %v4708_v1 = vpop.trf.xlu0  ;;  %v852_v17 = vadd.f32 %v851_v46, %v6018_v41 }
 0x24e   : > { %v4712_v16 = vunpack.i.h.bf16 %v4708_v1  ;;  %v4709_v10 = vunpack.i.l.bf16 %v4708_v1 }
 0x24f   : > { %v921_v61 = vpack.c.bf16 %v852_v17, %v852_v17 }
 0x250   : > { %v1075_v37 = vpack.c.bf16 %v4712_v16, %v4709_v10 }
 0x251   : > { %985 = vst [vmem:[#allocation2 + $0x110] sm:$0xf] %v921_v61 }
 0x252   : > { %1091 = vst [vmem:[#allocation3 + $0x38] sm:$0xff] %v1075_v37 }
 0x254   : > { %v853_v63 = vpop.f32.mrf.mxu2 }
 0x255   : > { %v4713_v56 = vpop.trf.xlu0  ;;  %v854_v2 = vadd.f32 %v853_v63, %v6018_v41 }
 0x256   : > { %v4717_v27 = vunpack.i.h.bf16 %v4713_v56  ;;  %v4714_v29 = vunpack.i.l.bf16 %v4713_v56 }
 0x257   : > { %v923_v6 = vpack.c.bf16 %v854_v2, %v854_v2 }
 0x258   : > { %v1076_v31 = vpack.c.bf16 %v4717_v27, %v4714_v29 }
 0x259   : > { %987 = vst [vmem:[#allocation2 + $0x11c] sm:$0xf] %v923_v6 }
 0x25a   : > { %1092 = vst [vmem:[#allocation3 + $0x40] sm:$0xff] %v1076_v31 }
 0x25d   : > { %v4718_v3 = vpop.trf.xlu0 }
 0x25e   : > { %v4722_v59 = vunpack.i.h.bf16 %v4718_v3  ;;  %v4719_v43 = vunpack.i.l.bf16 %v4718_v3 }
 0x260   : > { %v1077_v24 = vpack.c.bf16 %v4722_v59, %v4719_v43 }
 0x262   : > { %1093 = vst [vmem:[#allocation3 + $0x48] sm:$0xff] %v1077_v24 }
 0x265   : > { %v4723_v60 = vpop.trf.xlu0 }
 0x266   : > { %v4727_v42 = vunpack.i.h.bf16 %v4723_v60  ;;  %v4724_v47 = vunpack.i.l.bf16 %v4723_v60 }
 0x268   : > { %v1078_v12 = vpack.c.bf16 %v4727_v42, %v4724_v47 }
 0x26a   : > { %1094 = vst [vmem:[#allocation3 + $0x50] sm:$0xff] %v1078_v12 }
 0x26d   : > { %v4728_v13 = vpop.trf.xlu0 }
 0x26e   : > { %v4732_v21 = vunpack.i.h.bf16 %v4728_v13  ;;  %v4729_v11 = vunpack.i.l.bf16 %v4728_v13 }
 0x270   : > { %v1079_v51 = vpack.c.bf16 %v4732_v21, %v4729_v11 }
 0x272   : > { %1095 = vst [vmem:[#allocation3 + $0x58] sm:$0xff] %v1079_v51 }
 0x275   : > { %v4733_v28 = vpop.trf.xlu0 }
 0x276   : > { %v4737_v32 = vunpack.i.h.bf16 %v4733_v28  ;;  %v4734_v35 = vunpack.i.l.bf16 %v4733_v28 }
 0x278   : > { %v1080_v40 = vpack.c.bf16 %v4737_v32, %v4734_v35 }
 0x27a   : > { %1096 = vst [vmem:[#allocation3 + $0x60] sm:$0xff] %v1080_v40 }
 0x27d   : > { %v4738_v48 = vpop.trf.xlu0 }
 0x27e   : > { %v4742_v26 = vunpack.i.h.bf16 %v4738_v48  ;;  %v4739_v53 = vunpack.i.l.bf16 %v4738_v48 }
 0x280   : > { %v1081_v7 = vpack.c.bf16 %v4742_v26, %v4739_v53 }
 0x282   : > { %1097 = vst [vmem:[#allocation3 + $0x68] sm:$0xff] %v1081_v7 }
 0x285   : > { %v4743_v41 = vpop.trf.xlu0 }
 0x286   : > { %v4747_v14 = vunpack.i.h.bf16 %v4743_v41  ;;  %v4744_v15 = vunpack.i.l.bf16 %v4743_v41 }
 0x288   : > { %v1082_v23 = vpack.c.bf16 %v4747_v14, %v4744_v15 }
 0x28a   : > { %1098 = vst [vmem:[#allocation3 + $0x70] sm:$0xff] %v1082_v23 }
 0x28d   : > { %v4748_v30 = vpop.trf.xlu0 }
 0x28e   : > { %v4752_v4 = vunpack.i.h.bf16 %v4748_v30  ;;  %v4749_v55 = vunpack.i.l.bf16 %v4748_v30 }
 0x290   : > { %v1083_v44 = vpack.c.bf16 %v4752_v4, %v4749_v55 }
 0x292   : > { %1099 = vst [vmem:[#allocation3 + $0x78] sm:$0xff] %v1083_v44 }
 0x293 PF: > { %v4159_v9 = vld [vmem:[#allocation3 + $0x10] sm:$0xf]  ;;  %v4448_v45 = vld [vmem:[#allocation3 + $0x14] sm:$0xf0]  ;;  %v4151_v49 = vld [vmem:[#allocation3] sm:$0xf] }
 0x294   : > { %v4160_v39 = vor.u32 %v4448_v45, %v4159_v9  ;;  %v4446_v52 = vld [vmem:[#allocation3 + $0x4] sm:$0xf0]  ;;  %s4115_s6 = sshll.u32 %s5492_s24, 7  ;;  %v4447_v57 = vld [vmem:[#allocation3 + $0x14] sm:$0xf]  ;;  %vm1218_vm0 = vcmask 261120  }
 0x295   : > { %s1101_s7 = sshra.s32 %s4115_s6, 3  ;;  %v4161_v1 = vld [vmem:[#allocation3 + $0x18] sm:$0xf0]  ;;  %v4152_v5 = vor.u32 %v4446_v52, %v4151_v49  ;;  %v4445_v16 = vld [vmem:[#allocation3 + $0x4] sm:$0xf]  ;;  %s5517_s16 = smov 96  }
 0x296   : > { %4493 = vmatpush.bf16.msra.mxu1 %v4160_v39  ;;  %s4420_s10 = smul.u32 12, %s1101_s7  ;;  %1249 = vmatpush.bf16.msra.mxu0 %v4160_v39  ;;  %v4164_v8 = vor.u32 %v4447_v57, %v4161_v1  ;;  %v4153_v10 = vld [vmem:[#allocation3 + $0x8] sm:$0xf0]  ;;  %v4451_v18 = vld [vmem:[#allocation3 + $0x34] sm:$0xf]  ;;  %s5518_s1 = smov 64  }
 0x297   : > { %4494 = vmatpush.bf16.msra.mxu2 %v4160_v39  ;;  %4495 = vmatpush.bf16.msra.mxu3 %v4160_v39  ;;  %v4156_v27 = vor.u32 %v4445_v16, %v4153_v10  ;;  %v4257_v36 = vld [vmem:[#allocation3 + $0x38] sm:$0xf0]  ;;  %v4211_v33 = vld [vmem:[#allocation2 + $0xb0] sm:$0xf]  ;;  %v4207_v13 = vld [vmem:[#allocation2 + $0x98] sm:$0xf] }
 0x298   : > { %s6080_s30 = scalar_lea.vmem [#allocation2], %s4420_s10  ;;  %v4260_v46 = vor.u32 %v4451_v18, %v4257_v36  ;;  %v4436_v60 = vld [vmem:[#allocation2 + $0xb8] sm:$0xf0]  ;;  %v4243_v2 = vld [vmem:[#allocation2 + $0x170] sm:$0xf]  ;;  %s5519_s2 = smov 32  }
 0x299   : > { %v4127_v19 = vld [vmem:[%s6080_s30 + $0x30] sm:$0xf]  ;;  %v4423_v37 = vld [vmem:[%s6080_s30 + $0x38] sm:$0xf0]  ;;  %v4131_v20 = vld [vmem:[%s6080_s30 + $0x48] sm:$0xf]  ;;  %v6134_v0 = vor.u32 %v4436_v60, %v4211_v33 }
 0x29a   : > { %4496 = vmatpush.bf16.msra.mxu1 %v4152_v5  ;;  %v6085_v50 = vor.u32 %v4423_v37, %v4127_v19  ;;  %v4424_v22 = vld [vmem:[%s6080_s30 + $0x50] sm:$0xf0]  ;;  %v4119_v56 = vld [vmem:[%s6080_s30] sm:$0xf]  ;;  %v4421_v58 = vld [vmem:[%s6080_s30 + $0x8] sm:$0xf0]  ;;  %1250 = vmatpush.bf16.msra.mxu0 %v4152_v5 }
 0x29b   : > { %v6090_v25 = vor.u32 %v4421_v58, %v4119_v56  ;;  %4497 = vmatpush.bf16.msra.mxu2 %v4152_v5  ;;  %v6092_v29 = vor.u32 %v4424_v22, %v4131_v20  ;;  %4498 = vmatpush.bf16.msra.mxu3 %v4152_v5  ;;  %v4123_v34 = vld [vmem:[%s6080_s30 + $0x18] sm:$0xf]  ;;  %v4422_v31 = vld [vmem:[%s6080_s30 + $0x20] sm:$0xf0]  ;;  %v4143_v3 = vld [vmem:[%s6080_s30 + $0x90] sm:$0xf] }
 0x29c   : > { %1783 = vrot.lane.b32.xlu1 %v6085_v50, %s5517_s16  ;;  %v6106_v54 = vor.u32 %v4422_v31, %v4123_v34  ;;  %v4427_v38 = vld [vmem:[%s6080_s30 + $0x98] sm:$0xf0]  ;;  %v4139_v43 = vld [vmem:[%s6080_s30 + $0x78] sm:$0xf]  ;;  %v4426_v17 = vld [vmem:[%s6080_s30 + $0x80] sm:$0xf0] }
 0x29d   : > { %7690 = vst [vmem:[#allocation23_spill] sm:$0xff] %v6092_v29  ;;  %4167 = vmatmul.msk.bf16.vlgmr.msra.gmra.mxu1 %vm1218_vm0, %v6085_v50  ;;  %1779 = vrot.lane.b32.xlu0 %v6090_v25, %s5517_s16  ;;  %v6116_v59 = vor.u32 %v4427_v38, %v4143_v3  ;;  %v4135_v24 = vld [vmem:[%s6080_s30 + $0x60] sm:$0xf]  ;;  %v6129_v61 = vor.u32 %v4426_v17, %v4139_v43  ;;  %v4425_v62 = vld [vmem:[%s6080_s30 + $0x68] sm:$0xf0]  ;;  %vm3627_vm1 = vcmask 523264  }
 0x29e   : > { %1298 = vmatpush.bf16.msrb.mxu1 %v4164_v8  ;;  %4165 = vmatmul.msk.bf16.vlgmr.msra.gmra.mxu0 %vm1218_vm0, %v6090_v25  ;;  %v6132_v63 = vor.u32 %v4425_v62, %v4135_v24  ;;  %v4147_v42 = vld [vmem:[%s6080_s30 + $0xa8] sm:$0xf]  ;;  %v4428_v47 = vld [vmem:[%s6080_s30 + $0xb0] sm:$0xf0]  ;;  %v4444_v6 = vld [vmem:[#allocation2 + $0x178] sm:$0xf0] }
 0x29f   : > { %1785 = vrot.lane.b32.xlu2 %v6092_v29, %s5517_s16  ;;  %4171 = vmatmul.msk.bf16.vlgmr.msra.gmra.mxu3 %vm1218_vm0, %v6116_v59  ;;  %v6151_v12 = vor.u32 %v4428_v47, %v4147_v42  ;;  %v4435_v21 = vld [vmem:[#allocation2 + $0xa0] sm:$0xf0]  ;;  %v6153_v11 = vor.u32 %v4444_v6, %v4243_v2  ;;  %v4239_v28 = vld [vmem:[#allocation2 + $0x158] sm:$0xf]  ;;  %v4195_v35 = vld [vmem:[#allocation2 + $0x50] sm:$0xf] }
 0x2a0   : > { %4169 = vmatmul.msk.bf16.vlgmr.msra.gmra.mxu2 %vm1218_vm0, %v6132_v63  ;;  %v6161_v51 = vor.u32 %v4435_v21, %v4207_v13  ;;  %v4443_v32 = vld [vmem:[#allocation2 + $0x160] sm:$0xf0]  ;;  %v4432_v40 = vld [vmem:[#allocation2 + $0x58] sm:$0xf0]  ;;  %v4199_v53 = vld [vmem:[#allocation2 + $0x68] sm:$0xf] }
 0x2a1   : > { %1645 = vmatpush.bf16.msrb.mxu2 %v6134_v0  ;;  %1694 = vmatpush.bf16.msrb.mxu3 %v6153_v11  ;;  %v6169_v48 = vor.u32 %v4443_v32, %v4239_v28  ;;  %v6171_v26 = vor.u32 %v4432_v40, %v4195_v35  ;;  %v4433_v7 = vld [vmem:[#allocation2 + $0x70] sm:$0xf0]  ;;  %v4203_v41 = vld [vmem:[#allocation2 + $0x80] sm:$0xf]  ;;  %v4434_v15 = vld [vmem:[#allocation2 + $0x88] sm:$0xf0] }
 0x2a2   : > { %1299 = vmatpush.bf16.msrb.mxu1 %v4156_v27  ;;  %v6182_v14 = vor.u32 %v4433_v7, %v4199_v53  ;;  %v6184_v23 = vor.u32 %v4434_v15, %v4203_v41  ;;  %v4235_v30 = vld [vmem:[#allocation2 + $0x140] sm:$0xf]  ;;  %v4442_v4 = vld [vmem:[#allocation2 + $0x148] sm:$0xf0]  ;;  %v4227_v55 = vld [vmem:[#allocation2 + $0x110] sm:$0xf] }
 0x2a3   : > { %7691 = vst [vmem:[#allocation24_spill] sm:$0xff] %v6171_v26  ;;  %v4440_v44 = vld [vmem:[#allocation2 + $0x118] sm:$0xf0]  ;;  %v6192_v9 = vor.u32 %v4442_v4, %v4235_v30  ;;  %v4191_v45 = vld [vmem:[#allocation2 + $0x38] sm:$0xf]  ;;  %vm3644_vm2 = vcmask 785408  }
 0x2a4   : > { %1787 = vrot.lane.b32.xlu1 %v6132_v63, %s5517_s16  ;;  %7692 = vst [vmem:[#allocation25_spill] sm:$0xff] %v6182_v14  ;;  %v4431_v49 = vld [vmem:[#allocation2 + $0x40] sm:$0xf0]  ;;  %v6196_v39 = vor.u32 %v4440_v44, %v4227_v55  ;;  %v4215_v57 = vld [vmem:[#allocation2 + $0xc8] sm:$0xf]  ;;  %s4374_s21 = sshll.u32 %s5492_s24, 4 }
 0x2a5   : > { %1781 = vrot.lane.b32.xlu0 %v6106_v54, %s5517_s16  ;;  %1646 = vmatpush.bf16.msrb.mxu2 %v6161_v51  ;;  %7693 = vst [vmem:[#allocation26_spill] sm:$0xff] %v6192_v9  ;;  %v6198_v52 = vor.u32 %v4431_v49, %v4191_v45  ;;  %v4437_v1 = vld [vmem:[#allocation2 + $0xd0] sm:$0xf0]  ;;  %v4223_v5 = vld [vmem:[#allocation2 + $0xf8] sm:$0xf]  ;;  %s4375_s29 = sshll.u32 %s5496_s25, 5 }
 0x2a6   : > { %1894 = vmatpush.bf16.msra.mxu1 %v4260_v46  ;;  %1695 = vmatpush.bf16.msrb.mxu3 %v6169_v48  ;;  %7694 = vst [vmem:[#allocation27_spill] sm:$0xff] %v6196_v39  ;;  %v6210_v8 = vor.u32 %v4437_v1, %v4215_v57  ;;  %v4439_v16 = vld [vmem:[#allocation2 + $0x100] sm:$0xf0]  ;;  %v4231_v10 = vld [vmem:[#allocation2 + $0x128] sm:$0xf]  ;;  %s3814_s14 = sadd.s32 %s4375_s29, %s4374_s21  ;;  %s7873_s26 = sld [smem:[#allocation106_spill]] }
 0x2a7   : > { %1789 = vrot.lane.b32.xlu2 %v6129_v61, %s5517_s16  ;;  %7695 = vst [vmem:[#allocation28_spill] sm:$0xff] %v6198_v52  ;;  %v4441_v19 = vld [vmem:[#allocation2 + $0x130] sm:$0xf0]  ;;  %v6213_v37 = vor.u32 %v4439_v16, %v4223_v5  ;;  %v4449_v22 = vld [vmem:[#allocation3 + $0x24] sm:$0xf]  ;;  %s4376_s3 = sshll.u32 %s3814_s14, 3 }
 0x2a8   : > { %7696 = vst [vmem:[#allocation29_spill] sm:$0xff] %v6210_v8  ;;  %v6215_v20 = vor.u32 %v4441_v19, %v4231_v10  ;;  %v4249_v56 = vld [vmem:[#allocation3 + $0x28] sm:$0xf0]  ;;  %v4187_v27 = vld [vmem:[#allocation2 + $0x20] sm:$0xf]  ;;  %s3817_s10 = sshll.u32 %s5721_s8, 4  ;;  %s3818_s10 = int_to_ptr.vmem [resolvable:$true] %s3817_s10 }
 0x2a9   : > { %1647 = vmatpush.bf16.msrb.mxu2 %v6184_v23  ;;  %7697 = vst [vmem:[#allocation30_spill] sm:$0xff] %v6213_v37  ;;  %v4252_v58 = vor.u32 %v4449_v22, %v4249_v56  ;;  %v4430_v34 = vld [vmem:[#allocation2 + $0x28] sm:$0xf0]  ;;  %v4219_v18 = vld [vmem:[#allocation2 + $0xe0] sm:$0xf]  ;;  %s3803_s24 = scalar_lea.sflag [#allocation6], %s304_s5 }
 0x2aa   : > { %1696 = vmatpush.bf16.msrb.mxu3 %v6192_v9  ;;  %v6225_v31 = vor.u32 %v4430_v34, %v4187_v27  ;;  %v4438_v36 = vld [vmem:[#allocation2 + $0xe8] sm:$0xf0]  ;;  %v4255_v46 = vld [vmem:[#allocation3 + $0x30] sm:$0xf]  ;;  %v4452_v38 = vld [vmem:[#allocation3 + $0x34] sm:$0xf0] }
 0x2ab   : > { %1895 = vmatpush.bf16.msra.mxu1 %v4252_v58  ;;  %v6227_v3 = vor.u32 %v4438_v36, %v4219_v18  ;;  %v4256_v43 = vor.u32 %v4452_v38, %v4255_v46  ;;  %v4247_v17 = vld [vmem:[#allocation3 + $0x20] sm:$0xf]  ;;  %v4450_v24 = vld [vmem:[#allocation3 + $0x24] sm:$0xf0]  ;;  %v4429_v60 = vld [vmem:[#allocation2 + $0x10] sm:$0xf0] }
 0x2ac   : > { %1793 = vrot.lane.b32.xlu1 %v6151_v12, %s5517_s16  ;;  %7698 = vst [vmem:[#allocation31_spill] sm:$0xff] %v6225_v31  ;;  %v4248_v62 = vor.u32 %v4450_v24, %v4247_v17  ;;  %v4183_v33 = vld [vmem:[#allocation2 + $0x8] sm:$0xf]  ;;  %s7874_s6 = smov %s7873_s26  ;;  %s3816_s7 = scalar_lea.hbm %s7873_s26, %s4376_s3 }
 0x2ad   : > { %4168 = vmatmul.msk.bf16.gmra.mxu1 %vm1218_vm0, %v6092_v29  ;;  %1791 = vrot.lane.b32.xlu0 %v6116_v59, %s5517_s16  ;;  %7699 = vst [vmem:[#allocation32_spill] sm:$0xff] %v6227_v3  ;;  %v6238_v42 = vor.u32 %v4429_v60, %v4183_v33  ;;  %s3819_s30 = sshll.u32 %s3816_s7, 4  ;;  %s5398_s12 = scalar_lea.hbm %s7874_s6, 512  ;;  %s3820_s30 = int_to_ptr.hbm [resolvable:$true] %s3819_s30 }
 0x2ae   : > { %4166 = vmatmul.msk.bf16.gmra.mxu0 %vm1218_vm0, %v6106_v54  ;;  %1648 = vmatpush.bf16.msrb.mxu2 %v6182_v14  ;;  %s5392_s25 = sshra.s32 %s3820_s30, 4  ;;  %s5393_s25 = int_to_ptr.hbm [resolvable:$true] %s5392_s25 }
 0x2af   : > { %2329 = vrot.lane.b32.xlu2 %v6106_v54, %s5518_s1  ;;  %4172 = vmatmul.msk.bf16.gmra.mxu3 %vm1218_vm0, %v6151_v12  ;;  %7700 = vst [vmem:[#allocation33_spill] sm:$0xff] %v6238_v42  ;;  %p5399_p2 = scmp.lt.s32.totalorder %s5393_s25, %s7874_s6 }
 0x2b0   : > { %4170 = vmatmul.msk.bf16.gmra.mxu2 %vm1218_vm0, %v6129_v61  ;;  %1697 = vmatpush.bf16.msrb.mxu3 %v6215_v20 }
 0x2b1   : > { %1845 = vmatpush.bf16.msrb.mxu0 %v4256_v43 }
 0x2b2   : > { %1649 = vmatpush.bf16.msrb.mxu2 %v6171_v26 }
 0x2b4   : > { %2157 = vrot.lane.b32.xlu1 %v6161_v51, %s5517_s16  ;;  %1698 = vmatpush.bf16.msrb.mxu3 %v6196_v39 }
 0x2b5   : > { %2327 = vrot.lane.b32.xlu0 %v6090_v25, %s5518_s1  ;;  %1846 = vmatpush.bf16.msrb.mxu0 %v4248_v62 }
 0x2b6   : > { %1650 = vmatpush.bf16.msrb.mxu2 %v6198_v52 }
 0x2b7   : > { %2331 = vrot.lane.b32.xlu2 %v6085_v50, %s5518_s1 }
 0x2b8   : > { %1699 = vmatpush.bf16.msrb.mxu3 %v6213_v37 }
 0x2ba   : > { %1651 = vmatpush.bf16.msrb.mxu2 %v6225_v31 }
 0x2bc   : > { %2153 = vrot.lane.b32.xlu1 %v6182_v14, %s5517_s16  ;;  %1700 = vmatpush.bf16.msrb.mxu3 %v6227_v3 }
 0x2bd   : > { %4173 = vmatmul.msk.bf16.vlgmr.msrb.gmra.mxu1 %vm1218_vm0, %v6090_v25  ;;  %2159 = vrot.lane.b32.xlu0 %v6134_v0, %s5517_s16 }
 0x2be   : > { %1652 = vmatpush.bf16.msrb.mxu2 %v6238_v42 }
 0x2bf   : > { %2173 = vrot.lane.b32.xlu2 %v6169_v48, %s5517_s16 }
 0x2c0   : > { %1701 = vmatpush.bf16.msrb.mxu3 %v6210_v8 }
 0x2c4   : > { %2167 = vrot.lane.b32.xlu1 %v6196_v39, %s5517_s16 }
 0x2c5   : > { %2175 = vrot.lane.b32.xlu0 %v6153_v11, %s5517_s16 }
 0x2c7   : > { %2155 = vrot.lane.b32.xlu2 %v6184_v23, %s5517_s16 }
 0x2cc   : > { %2161 = vrot.lane.b32.xlu1 %v6210_v8, %s5517_s16 }
 0x2cd   : > { %4174 = vmatmul.msk.bf16.gmra.mxu1 %vm1218_vm0, %v6106_v54  ;;  %2151 = vrot.lane.b32.xlu0 %v6171_v26, %s5517_s16 }
 0x2cf   : > { %2171 = vrot.lane.b32.xlu2 %v6192_v9, %s5517_s16 }
 0x2d5   : > { %2333 = vrot.lane.b32.xlu0 %v6092_v29, %s5518_s1 }
 0x2d7   : > { %2169 = vrot.lane.b32.xlu2 %v6215_v20, %s5517_s16 }
 0x2dd   : > { %4175 = vmatmul.msk.bf16.gmra.mxu1 %vm1218_vm0, %v6085_v50  ;;  %2149 = vrot.lane.b32.xlu0 %v6198_v52, %s5517_s16 }
 0x2df   : > { %2163 = vrot.lane.b32.xlu2 %v6227_v3, %s5517_s16 }
 0x2e5   : > { %2165 = vrot.lane.b32.xlu0 %v6213_v37, %s5517_s16 }
 0x2ed   : > { %4176 = vmatmul.msk.bf16.gmra.mxu1 %vm1218_vm0, %v6092_v29  ;;  %2147 = vrot.lane.b32.xlu0 %v6225_v31, %s5517_s16 }
 0x2f5   : > { %2145 = vrot.lane.b32.xlu0 %v6238_v42, %s5517_s16 }
 0x2f9   : > { %v1786_v41 = vpop.permute.xlu2 %1785 }
 0x2fd   : > { %4177 = vmatmul.msk.bf16.gmra.mxu1 %vm1218_vm0, %v6132_v63 }
 0x301   : > { %v6291_v16 = vpop.permute.xlu2 %1789 }
 0x309   : > { %v6300_v56 = vpop.permute.xlu2 %2329 }
 0x30d   : > { %4178 = vmatmul.msk.bf16.gmra.mxu1 %vm1218_vm0, %v6129_v61 }
 0x30e   : > { %v1784_v28 = vpop.permute.xlu1 %1783 }
 0x30f   : > { %v1780_v47 = vpop.permute.xlu0 %1779 }
 0x310   : > { %4261 = vmatmul.msk.bf16.vlgmr.msrb.gmra.mxu0 %vm1218_vm0, %v1780_v47 }
 0x311   : > { %v6310_v36 = vpop.permute.xlu2 %2331 }
 0x316   : > { %v1788_v45 = vpop.permute.xlu1 %1787 }
 0x317   : > { %v1782_v6 = vpop.permute.xlu0 %1781 }
 0x319   : > { %v2174_v24 = vpop.permute.xlu2 %2173 }
 0x31a   : > { %v6247_v2 = vpop.f32.mrf.mxu1 }
 0x31b   : > { %v6261_v35 = vpop.f32.mrf.mxu0 }
 0x31d   : > { %4179 = vmatmul.msk.bf16.gmra.mxu1 %vm1218_vm0, %v6116_v59 }
 0x31e   : > { %v6308_v18 = vpop.permute.xlu1 %1793 }
 0x31f   : > { %v6282_v49 = vpop.permute.xlu0 %1791 }
 0x320   : > { %4262 = vmatmul.msk.bf16.gmra.mxu0 %vm1218_vm0, %v1782_v6 }
 0x322   : > { %v6252_v13 = vpop.f32.mrf.mxu1 }
 0x323   : > { %v6267_v7 = vpop.f32.mrf.mxu0  ;;  %v6321_v60 = vpop.f32.mrf.mxu2 }
 0x326   : > { %v2158_v17 = vpop.permute.xlu1 %2157 }
 0x327   : > { %v6293_v10 = vpop.permute.xlu0 %2327 }
 0x32a   : > { %v6254_v21 = vpop.f32.mrf.mxu1 }
 0x32b   : > { %v6275_v4 = vpop.f32.mrf.mxu0 }
 0x32d   : > { %4180 = vmatmul.msk.bf16.gmra.mxu1 %vm1218_vm0, %v6151_v12 }
 0x32f   : > { %v2160_v58 = vpop.permute.xlu0 %2159 }
 0x330   : > { %4263 = vmatmul.msk.bf16.gmra.mxu0 %vm1218_vm0, %v1784_v28  ;;  %2193 = vmatpush.bf16.msra.mxu2 %v2160_v58 }
 0x332   : > { %v6259_v32 = vpop.f32.mrf.mxu1 }
 0x333   : > { %v6284_v57 = vpop.f32.mrf.mxu0 }
 0x334   : > { %2194 = vmatpush.bf16.msra.mxu2 %v2158_v17 }
 0x337   : > { %v2176_v46 = vpop.permute.xlu0 %2175 }
 0x338   : > { %2242 = vmatpush.bf16.msra.mxu3 %v2176_v46  ;;  %v4279_v46 = vld [vmem:[#allocation3 + $0x40] sm:$0xf] }
 0x33a   : > { %v6263_v40 = vpop.f32.mrf.mxu1 }
 0x33b   : > { %v1341_v53 = vmax.f32 %v6261_v35, %v6263_v40 }
 0x33c   : > { %2243 = vmatpush.bf16.msra.mxu3 %v2174_v24 }
 0x33d   : > { %4269 = vmatmul.msk.bf16.vlgmr.msra.gmra.mxu1 %vm1218_vm0, %v1780_v47  ;;  %1342 = vmax.xlane.f32.xlu1 %v1341_v53  ;;  %v2154_v53 = vpop.permute.xlu1 %2153 }
 0x33f   : > { %v2152_v62 = vpop.permute.xlu0 %2151 }
 0x340   : > { %4264 = vmatmul.msk.bf16.gmra.mxu0 %vm1218_vm0, %v1786_v41 }
 0x342   : > { %v6271_v15 = vpop.f32.mrf.mxu1 }
 0x343   : > { %v1344_v30 = vmax.f32 %v6267_v7, %v6271_v15 }
 0x345   : > { %1345 = vmax.xlane.f32.xlu2 %v1344_v30 }
 0x34a   : > { %v6277_v55 = vpop.f32.mrf.mxu1 }
 0x34b   : > { %v1347_v44 = vmax.f32 %v6275_v4, %v6277_v55 }
 0x34d   : > { %4270 = vmatmul.msk.bf16.gmra.mxu1 %vm1218_vm0, %v1782_v6  ;;  %1348 = vmax.xlane.f32.xlu0 %v1347_v44  ;;  %v2156_v6 = vpop.permute.xlu2 %2155  ;;  %v6331_v44 = vpop.f32.mrf.mxu2 }
 0x34e   : > { %2195 = vmatpush.bf16.msra.mxu2 %v2156_v6 }
 0x350   : > { %4265 = vmatmul.msk.bf16.gmra.mxu0 %vm1218_vm0, %v1788_v45 }
 0x352   : > { %v6287_v1 = vpop.f32.mrf.mxu1  ;;  %2196 = vmatpush.bf16.msra.mxu2 %v2154_v53 }
 0x353   : > { %v1350_v5 = vmax.f32 %v6284_v57, %v6287_v1 }
 0x355   : > { %1351 = vmax.xlane.f32.xlu2 %v1350_v5  ;;  %v4287_v5 = vld [vmem:[#allocation3 + $0x50] sm:$0xf]  ;;  %v6340_v53 = vpop.f32.mrf.mxu2 }
 0x356   : > { %2197 = vmatpush.bf16.msra.mxu2 %v2152_v62 }
 0x35a   : > { %v6295_v19 = vpop.f32.mrf.mxu1 }
 0x35b   : > { %v1353_v22 = vmax.f32 %v6247_v2, %v6295_v19 }
 0x35d   : > { %4271 = vmatmul.msk.bf16.gmra.mxu1 %vm1218_vm0, %v1784_v28  ;;  %1354 = vmax.xlane.f32.xlu0 %v1353_v22  ;;  %v6325_v28 = vpop.permute.xlu0 %2333  ;;  %v4456_v22 = vld [vmem:[#allocation3 + $0x54] sm:$0xf0] }
 0x35e   : > { %v4288_v58 = vor.u32 %v4456_v22, %v4287_v5  ;;  %v2168_v5 = vpop.permute.xlu1 %2167 }
 0x360   : > { %4266 = vmatmul.msk.bf16.gmra.mxu0 %vm1218_vm0, %v6291_v16 }
 0x361   : > { %2393 = vmatpush.bf16.msra.mxu0 %v4288_v58 }
 0x362   : > { %v6304_v27 = vpop.f32.mrf.mxu1 }
 0x363   : > { %v1356_v34 = vmax.f32 %v6252_v13, %v6304_v27 }
 0x365   : > { %1357 = vmax.xlane.f32.xlu0 %v1356_v34  ;;  %v2172_v34 = vpop.permute.xlu2 %2171  ;;  %v2150_v17 = vpop.permute.xlu0 %2149 }
 0x366   : > { %2244 = vmatpush.bf16.msra.mxu3 %v2172_v34  ;;  %2198 = vmatpush.bf16.msra.mxu2 %v2150_v17  ;;  %v6348_v34 = vpop.f32.mrf.mxu2  ;;  %v6354_v17 = vpop.f32.mrf.mxu3 }
 0x36a   : > { %v6312_v38 = vpop.f32.mrf.mxu1 }
 0x36b   : > { %v1359_v43 = vmax.f32 %v6254_v21, %v6312_v38 }
 0x36d   : > { %4272 = vmatmul.msk.bf16.gmra.mxu1 %vm1218_vm0, %v1786_v41  ;;  %1360 = vmax.xlane.f32.xlu0 %v1359_v43  ;;  %v4454_v43 = vld [vmem:[#allocation3 + $0x44] sm:$0xf0] }
 0x36e   : > { %v4280_v24 = vor.u32 %v4454_v43, %v4279_v46  ;;  %v6362_v3 = vpop.f32.mrf.mxu3 }
 0x370   : > { %4267 = vmatmul.msk.bf16.gmra.mxu0 %vm1218_vm0, %v6282_v49 }
 0x371   : > { %2394 = vmatpush.bf16.msra.mxu0 %v4280_v24 }
 0x372   : > { %v6319_v33 = vpop.f32.mrf.mxu1 }
 0x373   : > { %v1362_v47 = vmax.f32 %v6259_v32, %v6319_v33 }
 0x375   : > { %1363 = vmax.xlane.f32.xlu1 %v1362_v47 }
 0x37a   : > { %v6327_v41 = vpop.f32.mrf.mxu1 }
 0x37b   : > { %v1365_v30 = vmax.f32 %v6321_v60, %v6327_v41 }
 0x37d   : > { %4273 = vmatmul.msk.bf16.gmra.mxu1 %vm1218_vm0, %v1788_v45  ;;  %1366 = vmax.xlane.f32.xlu2 %v1365_v30  ;;  %v2170_v45 = vpop.permute.xlu2 %2169  ;;  %v2166_v30 = vpop.permute.xlu0 %2165 }
 0x37e   : > { %2245 = vmatpush.bf16.msra.mxu3 %v2170_v45  ;;  %v2162_v45 = vpop.permute.xlu1 %2161 }
 0x380   : > { %4268 = vmatmul.msk.bf16.gmra.mxu0 %vm1218_vm0, %v6308_v18 }
 0x382   : > { %v6336_v47 = vpop.f32.mrf.mxu1  ;;  %2246 = vmatpush.bf16.msra.mxu3 %v2168_v5 }
 0x383   : > { %v1368_v6 = vmax.f32 %v6331_v44, %v6336_v47 }
 0x385   : > { %1369 = vmax.xlane.f32.xlu0 %v1368_v6  ;;  %v2148_v58 = vpop.permute.xlu0 %2147  ;;  %v2164_v46 = vpop.permute.xlu2 %2163  ;;  %v4455_v6 = vld [vmem:[#allocation3 + $0x54] sm:$0xf] }
 0x386   : > { %2247 = vmatpush.bf16.msra.mxu3 %v2166_v30  ;;  %2199 = vmatpush.bf16.msra.mxu2 %v2148_v58  ;;  %v4281_v58 = vld [vmem:[#allocation3 + $0x48] sm:$0xf0] }
 0x38a   : > { %v6342_v62 = vpop.f32.mrf.mxu1  ;;  %2248 = vmatpush.bf16.msra.mxu3 %v2164_v46 }
 0x38b   : > { %v1371_v22 = vmax.f32 %v6340_v53, %v6342_v62 }
 0x38d   : > { %4274 = vmatmul.msk.bf16.gmra.mxu1 %vm1218_vm0, %v6291_v16  ;;  %1372 = vmax.xlane.f32.xlu2 %v1371_v22  ;;  %v4289_v16 = vld [vmem:[#allocation3 + $0x58] sm:$0xf0]  ;;  %v2146_v5 = vpop.permute.xlu0 %2145  ;;  %v4453_v22 = vld [vmem:[#allocation3 + $0x44] sm:$0xf] }
 0x38e   : > { %v4292_v30 = vor.u32 %v4455_v6, %v4289_v16  ;;  %2249 = vmatpush.bf16.msra.mxu3 %v2162_v45  ;;  %2200 = vmatpush.bf16.msra.mxu2 %v2146_v5  ;;  %v4284_v42 = vor.u32 %v4453_v22, %v4281_v58  ;;  %v6372_v16 = vpop.f32.mrf.mxu3 }
 0x390   : > { %4293 = vmatmul.msk.bf16.vlgmr.msra.gmra.mxu0 %vm1218_vm0, %v6293_v10  ;;  %2442 = vmatpush.bf16.msrb.mxu1 %v4292_v30  ;;  %v6378_v30 = vpop.f32.mrf.mxu0 }
 0x392   : > { %v6352_v43 = vpop.f32.mrf.mxu1 }
 0x393   : > { %v1374_v24 = vmax.f32 %v6348_v34, %v6352_v43 }
 0x394   : > { %2443 = vmatpush.bf16.msrb.mxu1 %v4284_v42 }
 0x395   : > { %1375 = vmax.xlane.f32.xlu1 %v1374_v24 }
 0x396   : > { %v6382_v5 = vpop.f32.mrf.mxu3 }
 0x39a   : > { %v6358_v8 = vpop.f32.mrf.mxu1 }
 0x39b   : > { %v1377_v46 = vmax.f32 %v6354_v17, %v6358_v8 }
 0x39d   : > { %4275 = vmatmul.msk.bf16.gmra.mxu1 %vm1218_vm0, %v6282_v49  ;;  %1378 = vmax.xlane.f32.xlu2 %v1377_v46 }
 0x3a0   : > { %4294 = vmatmul.msk.bf16.gmra.mxu0 %vm1218_vm0, %v6300_v56 }
 0x3a2   : > { %v6368_v24 = vpop.f32.mrf.mxu1 }
 0x3a3   : > { %v1380_v6 = vmax.f32 %v6362_v3, %v6368_v24 }
 0x3a5   : > { %1381 = vmax.xlane.f32.xlu2 %v1380_v6 }
 0x3aa   : > { %v6374_v45 = vpop.f32.mrf.mxu1 }
 0x3ab   : > { %v1383_v42 = vmax.f32 %v6372_v16, %v6374_v45 }
 0x3ad   : > { %4276 = vmatmul.msk.bf16.gmra.mxu1 %vm1218_vm0, %v6308_v18  ;;  %1384 = vmax.xlane.f32.xlu0 %v1383_v42  ;;  %v6392_v18 = vpop.f32.mrf.mxu0 }
 0x3b0   : > { %v1343_v49 = vpop.xlane.xlu1 %1342  ;;  %4295 = vmatmul.msk.bf16.gmra.mxu0 %vm1218_vm0, %v6310_v36 }
 0x3b1   : > { %v1389_v22 = vsub.f32 %v6261_v35, %v1343_v49  ;;  %v1390_v58 = vsub.f32 %v6263_v40, %v1343_v49 }
 0x3b2   : > { %v6388_v46 = vpop.f32.mrf.mxu1 }
 0x3b3   : > { %v1421_v6 = vmul.f32 1.442695, %v1389_v22  ;;  %v1423_v31 = vmul.f32 1.442695, %v1390_v58  ;;  %v1386_v37 = vmax.f32 %v6382_v5, %v6388_v46 }
 0x3b5   : > { %4874 = vpow2.f32 %v1421_v6  ;;  %1387 = vmax.xlane.f32.xlu1 %v1386_v37 }
 0x3b6   : > { %4876 = vpow2.f32 %v1423_v31  ;;  %v6404_v31 = vpop.f32.mrf.mxu0 }
 0x3b8   : > { %v1346_v42 = vpop.xlane.xlu2 %1345 }
 0x3b9   : > { %v1391_v52 = vsub.f32 %v6267_v7, %v1346_v42  ;;  %v1392_v9 = vsub.f32 %v6271_v15, %v1346_v42 }
 0x3ba   : > { %v6396_v35 = vpop.f32.mrf.mxu1 }
 0x3bb   : > { %v4875_v40 = vpop.eup %4874  ;;  %v1425_v49 = vmul.f32 1.442695, %v1391_v52  ;;  %v1427_v29 = vmul.f32 1.442695, %v1392_v9  ;;  %v1937_v22 = vmax.f32 %v6378_v30, %v6396_v35 }
 0x3bc   : > { %v4877_v58 = vpop.eup %4876 }
 0x3bd   : > { %4878 = vpow2.f32 %v1425_v49  ;;  %4301 = vmatmul.msk.bf16.vlgmr.msrb.gmra.mxu1 %vm1218_vm0, %v6293_v10  ;;  %1938 = vmax.xlane.f32.xlu2 %v1937_v22  ;;  %v6402_v37 = vadd.f32 %v4877_v58, %v4875_v40 }
 0x3be   : > { %4880 = vpow2.f32 %v1427_v29 }
 0x3bf   : > { %7701 = vst [vmem:[#allocation34_spill] sm:$0xff] %v6402_v37 }
 0x3c0   : > { %v1349_v7 = vpop.xlane.xlu0 %1348  ;;  %4296 = vmatmul.msk.bf16.gmra.mxu0 %vm1218_vm0, %v6325_v28 }
 0x3c1   : > { %v1393_v9 = vsub.f32 %v6275_v4, %v1349_v7  ;;  %v1394_v52 = vsub.f32 %v6277_v55, %v1349_v7 }
 0x3c2   : > { %v6410_v15 = vpop.f32.mrf.mxu1 }
 0x3c3   : > { %v4879_v6 = vpop.eup %4878  ;;  %v1429_v42 = vmul.f32 1.442695, %v1393_v9  ;;  %v1431_v49 = vmul.f32 1.442695, %v1394_v52  ;;  %v1940_v10 = vmax.f32 %v6392_v18, %v6410_v15  ;;  %v6418_v9 = vpop.f32.mrf.mxu0 }
 0x3c4   : > { %v4881_v22 = vpop.eup %4880  ;;  %v1533_v29 = vpack.c.bf16 %v4879_v6, %v4875_v40 }
 0x3c5   : > { %4882 = vpow2.f32 %v1429_v42  ;;  %1941 = vmax.xlane.f32.xlu1 %v1940_v10  ;;  %v1534_v37 = vpack.c.bf16 %v4881_v22, %v4877_v58  ;;  %v6414_v39 = vadd.f32 %v4881_v22, %v4879_v6 }
 0x3c6   : > { %4884 = vpow2.f32 %v1431_v49  ;;  %1653 = vmatmul.bf16.vlgmr.msrb.gmra.mxu2 %v1533_v29 }
 0x3c7   : > { %7702 = vst [vmem:[#allocation35_spill] sm:$0xff] %v6414_v39  ;;  %1702 = vmatmul.bf16.vlgmr.msrb.gmra.mxu3 %v1534_v37 }
 0x3c8   : > { %v1352_v4 = vpop.xlane.xlu2 %1351 }
 0x3c9   : > { %v1395_v55 = vsub.f32 %v6284_v57, %v1352_v4  ;;  %v1396_v7 = vsub.f32 %v6287_v1, %v1352_v4 }
 0x3ca   : > { %v6420_v52 = vpop.f32.mrf.mxu1 }
 0x3cb   : > { %v4883_v14 = vpop.eup %4882  ;;  %v1433_v26 = vmul.f32 1.442695, %v1395_v55  ;;  %v1435_v40 = vmul.f32 1.442695, %v1396_v7  ;;  %v1943_v58 = vmax.f32 %v6404_v31, %v6420_v52  ;;  %v6434_v55 = vpop.f32.mrf.mxu0 }
 0x3cc   : > { %v4885_v6 = vpop.eup %4884 }
 0x3cd   : > { %4886 = vpow2.f32 %v1433_v26  ;;  %4302 = vmatmul.msk.bf16.gmra.mxu1 %vm1218_vm0, %v6300_v56  ;;  %1944 = vmax.xlane.f32.xlu0 %v1943_v58  ;;  %v6426_v37 = vadd.f32 %v4885_v6, %v4883_v14 }
 0x3ce   : > { %4888 = vpow2.f32 %v1435_v40 }
 0x3cf   : > { %7703 = vst [vmem:[#allocation36_spill] sm:$0xff] %v6426_v37 }
 0x3d0   : > { %v1355_v57 = vpop.xlane.xlu0 %1354 }
 0x3d1   : > { %v1397_v1 = vsub.f32 %v6247_v2, %v1355_v57  ;;  %v1398_v42 = vsub.f32 %v6295_v19, %v1355_v57 }
 0x3d2   : > { %v6430_v49 = vpop.f32.mrf.mxu1 }
 0x3d3   : > { %v4887_v10 = vpop.eup %4886  ;;  %v1437_v22 = vmul.f32 1.442695, %v1397_v1  ;;  %v1439_v29 = vmul.f32 1.442695, %v1398_v42  ;;  %v1946_v26 = vmax.f32 %v6418_v9, %v6430_v49 }
 0x3d4   : > { %v4889_v4 = vpop.eup %4888  ;;  %v1535_v56 = vpack.c.bf16 %v4887_v10, %v4883_v14 }
 0x3d5   : > { %4890 = vpow2.f32 %v1437_v22  ;;  %1947 = vmax.xlane.f32.xlu2 %v1946_v26  ;;  %v1536_v7 = vpack.c.bf16 %v4889_v4, %v4885_v6  ;;  %v6436_v40 = vadd.f32 %v4889_v4, %v4887_v10  ;;  %v6446_v6 = vpop.f32.mrf.mxu0 }
 0x3d6   : > { %4892 = vpow2.f32 %v1439_v29  ;;  %1658 = vmatmul.bf16.gmra.mxu2 %v1535_v56 }
 0x3d7   : > { %7704 = vst [vmem:[#allocation37_spill] sm:$0xff] %v6436_v40  ;;  %1707 = vmatmul.bf16.gmra.mxu3 %v1536_v7 }
 0x3d8   : > { %v1358_v2 = vpop.xlane.xlu0 %1357 }
 0x3d9   : > { %v1399_v19 = vsub.f32 %v6252_v13, %v1358_v2  ;;  %v1400_v58 = vsub.f32 %v6304_v27, %v1358_v2 }
 0x3da   : > { %v6440_v57 = vpop.f32.mrf.mxu1 }
 0x3db   : > { %v4891_v1 = vpop.eup %4890  ;;  %v1441_v42 = vmul.f32 1.442695, %v1399_v19  ;;  %v1443_v37 = vmul.f32 1.442695, %v1400_v58 }
 0x3dc   : > { %v4893_v39 = vpop.eup %4892 }
 0x3dd   : > { %4894 = vpow2.f32 %v1441_v42  ;;  %4303 = vmatmul.msk.bf16.gmra.mxu1 %vm1218_vm0, %v6310_v36  ;;  %v6444_v14 = vadd.f32 %v4893_v39, %v4891_v1 }
 0x3de   : > { %4896 = vpow2.f32 %v1443_v37  ;;  %2335 = vrot.lane.b32.xlu1 %v6132_v63, %s5518_s1 }
 0x3df   : > { %7705 = vst [vmem:[#allocation38_spill] sm:$0xff] %v6444_v14 }
 0x3e0   : > { %v1361_v13 = vpop.xlane.xlu0 %1360 }
 0x3e1   : > { %v1401_v27 = vsub.f32 %v6254_v21, %v1361_v13  ;;  %v1402_v10 = vsub.f32 %v6312_v38, %v1361_v13  ;;  %v6458_v21 = vpop.f32.mrf.mxu0 }
 0x3e2   : > { %v6452_v22 = vpop.f32.mrf.mxu1 }
 0x3e3   : > { %v4895_v29 = vpop.eup %4894  ;;  %v1445_v26 = vmul.f32 1.442695, %v1401_v27  ;;  %v1447_v4 = vmul.f32 1.442695, %v1402_v10  ;;  %v1952_v36 = vmax.f32 %v6446_v6, %v6452_v22 }
 0x3e4   : > { %v4897_v56 = vpop.eup %4896  ;;  %v1537_v7 = vpack.c.bf16 %v4895_v29, %v4891_v1 }
 0x3e5   : > { %4898 = vpow2.f32 %v1445_v26  ;;  %1953 = vmax.xlane.f32.xlu0 %v1952_v36  ;;  %v1538_v37 = vpack.c.bf16 %v4897_v56, %v4893_v39  ;;  %v6456_v2 = vadd.f32 %v4897_v56, %v4895_v29 }
 0x3e6   : > { %4900 = vpow2.f32 %v1447_v4  ;;  %1663 = vmatmul.bf16.gmra.mxu2 %v1537_v7 }
 0x3e7   : > { %7706 = vst [vmem:[#allocation39_spill] sm:$0xff] %v6456_v2  ;;  %1712 = vmatmul.bf16.gmra.mxu3 %v1538_v37 }
 0x3e8   : > { %v1364_v38 = vpop.xlane.xlu1 %1363 }
 0x3e9   : > { %v1403_v19 = vsub.f32 %v6259_v32, %v1364_v38  ;;  %v1404_v58 = vsub.f32 %v6319_v33, %v1364_v38  ;;  %v6472_v4 = vpop.f32.mrf.mxu0 }
 0x3ea   : > { %v6462_v42 = vpop.f32.mrf.mxu1 }
 0x3eb   : > { %v4899_v13 = vpop.eup %4898  ;;  %v1449_v27 = vmul.f32 1.442695, %v1403_v19  ;;  %v1451_v1 = vmul.f32 1.442695, %v1404_v58  ;;  %v1955_v39 = vmax.f32 %v6458_v21, %v6462_v42 }
 0x3ec   : > { %v4901_v10 = vpop.eup %4900 }
 0x3ed   : > { %4902 = vpow2.f32 %v1449_v27  ;;  %4304 = vmatmul.msk.bf16.gmra.mxu1 %vm1218_vm0, %v6325_v28  ;;  %1956 = vmax.xlane.f32.xlu2 %v1955_v39  ;;  %v6468_v29 = vadd.f32 %v4901_v10, %v4899_v13 }
 0x3ee   : > { %4904 = vpow2.f32 %v1451_v1 }
 0x3ef   : > { %7707 = vst [vmem:[#allocation40_spill] sm:$0xff] %v6468_v29 }
 0x3f0   : > { %v1367_v32 = vpop.xlane.xlu2 %1366 }
 0x3f1   : > { %v1405_v33 = vsub.f32 %v6321_v60, %v1367_v32  ;;  %v1406_v26 = vsub.f32 %v6327_v41, %v1367_v32 }
 0x3f2   : > { %v6474_v36 = vpop.f32.mrf.mxu1 }
 0x3f3   : > { %v4903_v56 = vpop.eup %4902  ;;  %v1453_v7 = vmul.f32 1.442695, %v1405_v33  ;;  %v1455_v37 = vmul.f32 1.442695, %v1406_v26  ;;  %v1958_v38 = vmax.f32 %v6472_v4, %v6474_v36 }
 0x3f4   : > { %v4905_v28 = vpop.eup %4904  ;;  %v1539_v19 = vpack.c.bf16 %v4903_v56, %v4899_v13 }
 0x3f5   : > { %4906 = vpow2.f32 %v1453_v7  ;;  %1959 = vmax.xlane.f32.xlu2 %v1958_v38  ;;  %v1540_v58 = vpack.c.bf16 %v4905_v28, %v4901_v10  ;;  %v6478_v27 = vadd.f32 %v4905_v28, %v4903_v56 }
 0x3f6   : > { %4908 = vpow2.f32 %v1455_v37  ;;  %1668 = vmatmul.bf16.gmra.mxu2 %v1539_v19 }
 0x3f7   : > { %7708 = vst [vmem:[#allocation41_spill] sm:$0xff] %v6478_v27  ;;  %1717 = vmatmul.bf16.gmra.mxu3 %v1540_v58 }
 0x3f8   : > { %v1370_v60 = vpop.xlane.xlu0 %1369 }
 0x3f9   : > { %v1407_v41 = vsub.f32 %v6331_v44, %v1370_v60  ;;  %v1408_v1 = vsub.f32 %v6336_v47, %v1370_v60  ;;  %2337 = vrot.lane.b32.xlu0 %v6129_v61, %s5518_s1  ;;  %v1949_v60 = vmax.f32 %v6434_v55, %v6440_v57 }
 0x3fb   : > { %v4907_v39 = vpop.eup %4906  ;;  %v1457_v32 = vmul.f32 1.442695, %v1407_v41  ;;  %v1459_v33 = vmul.f32 1.442695, %v1408_v1 }
 0x3fc   : > { %v4909_v13 = vpop.eup %4908 }
 0x3fd   : > { %4910 = vpow2.f32 %v1457_v32  ;;  %v6484_v26 = vadd.f32 %v4909_v13, %v4907_v39  ;;  %v6494_v32 = vpop.f32.mrf.mxu0 }
 0x3fe   : > { %4912 = vpow2.f32 %v1459_v33 }
 0x3ff   : > { %7709 = vst [vmem:[#allocation42_spill] sm:$0xff] %v6484_v26 }
 0x400   : > { %v1373_v10 = vpop.xlane.xlu2 %1372 }
 0x401   : > { %v1409_v56 = vsub.f32 %v6340_v53, %v1373_v10  ;;  %v1410_v7 = vsub.f32 %v6342_v62, %v1373_v10 }
 0x403   : > { %v4911_v37 = vpop.eup %4910  ;;  %v1461_v44 = vmul.f32 1.442695, %v1409_v56  ;;  %v1463_v38 = vmul.f32 1.442695, %v1410_v7 }
 0x404   : > { %v4913_v47 = vpop.eup %4912  ;;  %v1541_v28 = vpack.c.bf16 %v4911_v37, %v4907_v39  ;;  %v6496_v39 = vpop.f32.mrf.mxu1 }
 0x405   : > { %4914 = vpow2.f32 %v1461_v44  ;;  %v1542_v19 = vpack.c.bf16 %v4913_v47, %v4909_v13  ;;  %v6488_v58 = vadd.f32 %v4913_v47, %v4911_v37  ;;  %v1961_v56 = vmax.f32 %v6494_v32, %v6496_v39 }
 0x406   : > { %4916 = vpow2.f32 %v1463_v38  ;;  %1673 = vmatmul.bf16.gmra.mxu2 %v1541_v28 }
 0x407   : > { %7710 = vst [vmem:[#allocation43_spill] sm:$0xff] %v6488_v58  ;;  %1722 = vmatmul.bf16.gmra.mxu3 %v1542_v19 }
 0x408   : > { %v1376_v41 = vpop.xlane.xlu1 %1375  ;;  %1950 = vmax.xlane.f32.xlu1 %v1949_v60 }
 0x409   : > { %v1411_v53 = vsub.f32 %v6348_v34, %v1376_v41  ;;  %v1412_v62 = vsub.f32 %v6352_v43, %v1376_v41 }
 0x40b   : > { %v4915_v1 = vpop.eup %4914  ;;  %v1465_v33 = vmul.f32 1.442695, %v1411_v53  ;;  %v1467_v13 = vmul.f32 1.442695, %v1412_v62 }
 0x40c   : > { %v4917_v10 = vpop.eup %4916 }
 0x40d   : > { %4918 = vpow2.f32 %v1465_v33  ;;  %2339 = vrot.lane.b32.xlu2 %v6116_v59, %s5518_s1  ;;  %v6502_v7 = vadd.f32 %v4917_v10, %v4915_v1 }
 0x40e   : > { %4920 = vpow2.f32 %v1467_v13  ;;  %v6510_v13 = vpop.f32.mrf.mxu0 }
 0x40f   : > { %7711 = vst [vmem:[#allocation44_spill] sm:$0xff] %v6502_v7 }
 0x410   : > { %1962 = vmax.xlane.f32.xlu1 %v1961_v56  ;;  %v1379_v34 = vpop.xlane.xlu2 %1378 }
 0x411   : > { %v1413_v43 = vsub.f32 %v6354_v17, %v1379_v34  ;;  %v1414_v37 = vsub.f32 %v6358_v8, %v1379_v34  ;;  %v6512_v8 = vpop.f32.mrf.mxu1 }
 0x413   : > { %v4919_v44 = vpop.eup %4918  ;;  %v1469_v38 = vmul.f32 1.442695, %v1413_v43  ;;  %v1471_v47 = vmul.f32 1.442695, %v1414_v37 }
 0x414   : > { %v4921_v28 = vpop.eup %4920  ;;  %v1543_v19 = vpack.c.bf16 %v4919_v44, %v4915_v1 }
 0x415   : > { %4922 = vpow2.f32 %v1469_v38  ;;  %v1544_v60 = vpack.c.bf16 %v4921_v28, %v4917_v10  ;;  %v6506_v41 = vadd.f32 %v4921_v28, %v4919_v44 }
 0x416   : > { %4924 = vpow2.f32 %v1471_v47  ;;  %1678 = vmatmul.bf16.gmra.mxu2 %v1543_v19 }
 0x417   : > { %7712 = vst [vmem:[#allocation45_spill] sm:$0xff] %v6506_v41  ;;  %1727 = vmatmul.bf16.gmra.mxu3 %v1544_v60  ;;  %v6520_v60 = vpop.f32.mrf.mxu0 }
 0x418   : > { %v1382_v53 = vpop.xlane.xlu2 %1381 }
 0x419   : > { %v1415_v62 = vsub.f32 %v6362_v3, %v1382_v53  ;;  %v1416_v33 = vsub.f32 %v6368_v24, %v1382_v53  ;;  %v1964_v3 = vmax.f32 %v6510_v13, %v6512_v8  ;;  %v6522_v53 = vpop.f32.mrf.mxu1 }
 0x41b   : > { %v4923_v17 = vpop.eup %4922  ;;  %v1473_v56 = vmul.f32 1.442695, %v1415_v62  ;;  %v1475_v34 = vmul.f32 1.442695, %v1416_v33 }
 0x41c   : > { %v4925_v1 = vpop.eup %4924 }
 0x41d   : > { %4926 = vpow2.f32 %v1473_v56  ;;  %v6514_v10 = vadd.f32 %v4925_v1, %v4923_v17 }
 0x41e   : > { %4928 = vpow2.f32 %v1475_v34 }
 0x41f   : > { %7713 = vst [vmem:[#allocation46_spill] sm:$0xff] %v6514_v10 }
 0x420   : > { %v1385_v43 = vpop.xlane.xlu0 %1384 }
 0x421   : > { %v1417_v37 = vsub.f32 %v6372_v16, %v1385_v43  ;;  %v1418_v44 = vsub.f32 %v6374_v45, %v1385_v43 }
 0x423   : > { %v4927_v24 = vpop.eup %4926  ;;  %v1477_v38 = vmul.f32 1.442695, %v1417_v37  ;;  %v1479_v47 = vmul.f32 1.442695, %v1418_v44  ;;  %1965 = vmax.xlane.f32.xlu0 %v1964_v3  ;;  %v6534_v3 = vpop.f32.mrf.mxu1 }
 0x424   : > { %v4929_v28 = vpop.eup %4928  ;;  %v1545_v19 = vpack.c.bf16 %v4927_v24, %v4923_v17 }
 0x425   : > { %4930 = vpow2.f32 %v1477_v38  ;;  %v1546_v62 = vpack.c.bf16 %v4929_v28, %v4925_v1  ;;  %v6524_v33 = vadd.f32 %v4929_v28, %v4927_v24  ;;  %v6532_v1 = vpop.f32.mrf.mxu0  ;;  %v1967_v38 = vmax.f32 %v6520_v60, %v6522_v53 }
 0x426   : > { %4932 = vpow2.f32 %v1479_v47  ;;  %1683 = vmatmul.bf16.gmra.mxu2 %v1545_v19 }
 0x427   : > { %7714 = vst [vmem:[#allocation47_spill] sm:$0xff] %v6524_v33  ;;  %1732 = vmatmul.bf16.gmra.mxu3 %v1546_v62 }
 0x428   : > { %v1388_v16 = vpop.xlane.xlu1 %1387 }
 0x429   : > { %v1419_v45 = vsub.f32 %v6382_v5, %v1388_v16  ;;  %v1420_v56 = vsub.f32 %v6388_v46, %v1388_v16  ;;  %2341 = vrot.lane.b32.xlu1 %v6151_v12, %s5518_s1 }
 0x42b   : > { %v4931_v17 = vpop.eup %4930  ;;  %v1481_v34 = vmul.f32 1.442695, %v1419_v45  ;;  %v1483_v43 = vmul.f32 1.442695, %v1420_v56 }
 0x42c   : > { %v4933_v37 = vpop.eup %4932 }
 0x42d   : > { %4934 = vpow2.f32 %v1481_v34  ;;  %v6530_v44 = vadd.f32 %v4933_v37, %v4931_v17  ;;  %v6546_v34 = vpop.f32.mrf.mxu1 }
 0x42e   : > { %4936 = vpow2.f32 %v1483_v43 }
 0x42f   : > { %7715 = vst [vmem:[#allocation48_spill] sm:$0xff] %v6530_v44 }
 0x430   : > { %v1939_v24 = vpop.xlane.xlu2 %1938 }
 0x431   : > { %v1985_v5 = vsub.f32 %v6378_v30, %v1939_v24  ;;  %v1986_v46 = vsub.f32 %v6396_v35, %v1939_v24  ;;  %v6544_v35 = vpop.f32.mrf.mxu0 }
 0x433   : > { %v4935_v47 = vpop.eup %4934  ;;  %v2017_v28 = vmul.f32 1.442695, %v1985_v5  ;;  %v2019_v19 = vmul.f32 1.442695, %v1986_v46 }
 0x434   : > { %v4937_v62 = vpop.eup %4936  ;;  %v1547_v16 = vpack.c.bf16 %v4935_v47, %v4931_v17 }
 0x435   : > { %4938 = vpow2.f32 %v2017_v28  ;;  %v1548_v45 = vpack.c.bf16 %v4937_v62, %v4933_v37  ;;  %v6540_v56 = vadd.f32 %v4937_v62, %v4935_v47  ;;  %v1973_v37 = vmax.f32 %v6544_v35, %v6546_v34 }
 0x436   : > { %4940 = vpow2.f32 %v2019_v19  ;;  %1968 = vmax.xlane.f32.xlu2 %v1967_v38  ;;  %1688 = vmatmul.bf16.gmra.mxu2 %v1547_v16 }
 0x437   : > { %7716 = vst [vmem:[#allocation49_spill] sm:$0xff] %v6540_v56  ;;  %1737 = vmatmul.bf16.gmra.mxu3 %v1548_v45  ;;  %2875 = vrot.lane.b32.xlu0 %v6090_v25, %s5519_s2 }
 0x438   : > { %v1942_v30 = vpop.xlane.xlu1 %1941 }
 0x439   : > { %v1987_v43 = vsub.f32 %v6392_v18, %v1942_v30  ;;  %v1988_v17 = vsub.f32 %v6410_v15, %v1942_v30 }
 0x43b   : > { %v4939_v24 = vpop.eup %4938  ;;  %v2021_v5 = vmul.f32 1.442695, %v1987_v43  ;;  %v2023_v46 = vmul.f32 1.442695, %v1988_v17 }
 0x43c   : > { %v4941_v38 = vpop.eup %4940 }
 0x43d   : > { %4942 = vpow2.f32 %v2021_v5  ;;  %v6552_v47 = vadd.f32 %v4941_v38, %v4939_v24 }
 0x43e   : > { %4944 = vpow2.f32 %v2023_v46  ;;  %1974 = vmax.xlane.f32.xlu2 %v1973_v37 }
 0x440   : > { %v1945_v25 = vpop.xlane.xlu0 %1944 }
 0x441   : > { %v1989_v28 = vsub.f32 %v6404_v31, %v1945_v25  ;;  %v1990_v19 = vsub.f32 %v6420_v52, %v1945_v25 }
 0x443   : > { %v4943_v18 = vpop.eup %4942  ;;  %v2025_v62 = vmul.f32 1.442695, %v1989_v28  ;;  %v2027_v15 = vmul.f32 1.442695, %v1990_v19 }
 0x444   : > { %v4945_v16 = vpop.eup %4944  ;;  %v2129_v45 = vpack.c.bf16 %v4943_v18, %v4939_v24 }
 0x445   : > { %4946 = vpow2.f32 %v2025_v62  ;;  %v2130_v30 = vpack.c.bf16 %v4945_v16, %v4941_v38  ;;  %v6556_v43 = vadd.f32 %v4945_v16, %v4943_v18 }
 0x446   : > { %4948 = vpow2.f32 %v2027_v15  ;;  %2201 = vmatmul.bf16.vlgmr.msra.gmra.mxu2 %v2129_v45 }
 0x447   : > { %2250 = vmatmul.bf16.vlgmr.msra.gmra.mxu3 %v2130_v30 }
 0x448   : > { %v1948_v17 = vpop.xlane.xlu2 %1947 }
 0x449   : > { %v1991_v37 = vsub.f32 %v6418_v9, %v1948_v17  ;;  %v1992_v5 = vsub.f32 %v6430_v49, %v1948_v17  ;;  %v1654_v31 = vpop.f32.mrf.mxu2  ;;  %v1970_v9 = vmax.f32 %v6532_v1, %v6534_v3 }
 0x44a   : > { %v1703_v46 = vpop.f32.mrf.mxu3 }
 0x44b   : > { %v4947_v52 = vpop.eup %4946  ;;  %v2029_v25 = vmul.f32 1.442695, %v1991_v37  ;;  %v2031_v28 = vmul.f32 1.442695, %v1992_v5  ;;  %v6560_v19 = vadd.f32 %v1703_v46, %v1654_v31 }
 0x44c   : > { %v4949_v24 = vpop.eup %4948 }
 0x44d   : > { %7717 = vst [vmem:[#allocation50_spill] sm:$0xff] %v6560_v19  ;;  %4950 = vpow2.f32 %v2029_v25  ;;  %v6562_v38 = vadd.f32 %v4949_v24, %v4947_v52 }
 0x44e   : > { %4952 = vpow2.f32 %v2031_v28 }
 0x450   : > { %v2336_v18 = vpop.permute.xlu1 %2335 }
 0x451   : > { %v6564_v62 = vpop.f32.mrf.mxu2  ;;  %4297 = vmatmul.msk.bf16.gmra.mxu0 %vm1218_vm0, %v2336_v18  ;;  %4305 = vmatmul.msk.bf16.gmra.mxu1 %vm1218_vm0, %v2336_v18 }
 0x452   : > { %7718 = vst [vmem:[#allocation51_spill] sm:$0xff] %v6564_v62  ;;  %v6570_v49 = vpop.f32.mrf.mxu3 }
 0x453   : > { %7719 = vst [vmem:[#allocation52_spill] sm:$0xff] %v6570_v49  ;;  %v4951_v15 = vpop.eup %4950  ;;  %1971 = vmax.xlane.f32.xlu1 %v1970_v9 }
 0x454   : > { %v4953_v16 = vpop.eup %4952  ;;  %v2131_v45 = vpack.c.bf16 %v4951_v15, %v4947_v52  ;;  %v6580_v52 = vpop.f32.mrf.mxu0 }
 0x455   : > { %v2132_v30 = vpack.c.bf16 %v4953_v16, %v4949_v24  ;;  %v6572_v17 = vadd.f32 %v4953_v16, %v4951_v15  ;;  %v6582_v24 = vpop.f32.mrf.mxu1 }
 0x456   : > { %2877 = vrot.lane.b32.xlu2 %v6106_v54, %s5519_s2  ;;  %2206 = vmatmul.bf16.gmra.mxu2 %v2131_v45  ;;  %v1976_v54 = vmax.f32 %v6580_v52, %v6582_v24 }
 0x457   : > { %2255 = vmatmul.bf16.gmra.mxu3 %v2132_v30 }
 0x458   : > { %v1954_v37 = vpop.xlane.xlu0 %1953 }
 0x459   : > { %v1995_v5 = vsub.f32 %v6446_v6, %v1954_v37  ;;  %v1996_v31 = vsub.f32 %v6452_v22, %v1954_v37  ;;  %v1659_v46 = vpop.f32.mrf.mxu2 }
 0x45a   : > { %v1708_v25 = vpop.f32.mrf.mxu3 }
 0x45b   : > { %v2037_v28 = vmul.f32 1.442695, %v1995_v5  ;;  %v2039_v18 = vmul.f32 1.442695, %v1996_v31  ;;  %v6578_v9 = vadd.f32 %v1708_v25, %v1659_v46 }
 0x45d   : > { %7720 = vst [vmem:[#allocation53_spill] sm:$0xff] %v6578_v9  ;;  %4954 = vpow2.f32 %v2037_v28 }
 0x45e   : > { %4956 = vpow2.f32 %v2039_v18  ;;  %2723 = vrot.lane.b32.xlu2 %v6153_v11, %s5518_s1 }
 0x460   : > { %v1957_v6 = vpop.xlane.xlu2 %1956 }
 0x461   : > { %v1997_v22 = vsub.f32 %v6458_v21, %v1957_v6  ;;  %v1998_v15 = vsub.f32 %v6462_v42, %v1957_v6  ;;  %1977 = vmax.xlane.f32.xlu0 %v1976_v54  ;;  %v6590_v16 = vpop.f32.mrf.mxu2 }
 0x462   : > { %7721 = vst [vmem:[#allocation54_spill] sm:$0xff] %v6590_v16  ;;  %v6592_v45 = vpop.f32.mrf.mxu3 }
 0x463   : > { %7722 = vst [vmem:[#allocation55_spill] sm:$0xff] %v6592_v45  ;;  %v6594_v30 = vpop.eup %4954  ;;  %v2041_v37 = vmul.f32 1.442695, %v1997_v22  ;;  %v2043_v5 = vmul.f32 1.442695, %v1998_v15 }
 0x464   : > { %v6596_v31 = vpop.eup %4956 }
 0x465   : > { %4958 = vpow2.f32 %v2041_v37  ;;  %v6600_v46 = vadd.f32 %v6596_v31, %v6594_v30 }
 0x466   : > { %4960 = vpow2.f32 %v2043_v5 }
 0x468   : > { %v1960_v21 = vpop.xlane.xlu2 %1959 }
 0x469   : > { %v1999_v42 = vsub.f32 %v6472_v4, %v1960_v21  ;;  %v2000_v25 = vsub.f32 %v6474_v36, %v1960_v21  ;;  %v1664_v28 = vpop.f32.mrf.mxu2 }
 0x46a   : > { %v1713_v18 = vpop.f32.mrf.mxu3 }
 0x46b   : > { %v6604_v54 = vpop.eup %4958  ;;  %v2045_v6 = vmul.f32 1.442695, %v1999_v42  ;;  %v2047_v22 = vmul.f32 1.442695, %v2000_v25  ;;  %v6606_v15 = vadd.f32 %v1713_v18, %v1664_v28  ;;  %v2338_v44 = vpop.permute.xlu0 %2337 }
 0x46c   : > { %v6608_v37 = vpop.eup %4960  ;;  %4298 = vmatmul.msk.bf16.gmra.mxu0 %vm1218_vm0, %v2338_v44  ;;  %4306 = vmatmul.msk.bf16.gmra.mxu1 %vm1218_vm0, %v2338_v44  ;;  %v6632_v25 = vpop.f32.mrf.mxu0 }
 0x46d   : > { %7723 = vst [vmem:[#allocation56_spill] sm:$0xff] %v6606_v15  ;;  %4962 = vpow2.f32 %v2045_v6  ;;  %2707 = vrot.lane.b32.xlu1 %v6134_v0, %s5518_s1  ;;  %v6616_v4 = vadd.f32 %v6608_v37, %v6604_v54  ;;  %v6634_v6 = vpop.f32.mrf.mxu1 }
 0x46e   : > { %4964 = vpow2.f32 %v2047_v22 }
 0x46f   : > { %7724 = vst [vmem:[#allocation57_spill] sm:$0xff] %v6616_v4 }
 0x470   : > { %v2340_v18 = vpop.permute.xlu2 %2339 }
 0x471   : > { %v6618_v36 = vpop.f32.mrf.mxu2 }
 0x472   : > { %7725 = vst [vmem:[#allocation58_spill] sm:$0xff] %v6618_v36  ;;  %v6620_v5 = vpop.f32.mrf.mxu3 }
 0x473   : > { %7726 = vst [vmem:[#allocation59_spill] sm:$0xff] %v6620_v5  ;;  %v6622_v21 = vpop.eup %4962  ;;  %v4321_v5 = vld [vmem:[#allocation3 + $0x78] sm:$0xf0] }
 0x474   : > { %v6624_v42 = vpop.eup %4964 }
 0x475   : > { %2879 = vrot.lane.b32.xlu0 %v6085_v50, %s5519_s2  ;;  %v6630_v44 = vadd.f32 %v6624_v42, %v6622_v21 }
 0x479   : > { %v1669_v28 = vpop.f32.mrf.mxu2 }
 0x47a   : > { %v1718_v22 = vpop.f32.mrf.mxu3 }
 0x47b   : > { %v6636_v56 = vadd.f32 %v1718_v22, %v1669_v28  ;;  %v1951_v10 = vpop.xlane.xlu1 %1950 }
 0x47c   : > { %v1993_v33 = vsub.f32 %v6434_v55, %v1951_v10  ;;  %v1994_v7 = vsub.f32 %v6440_v57, %v1951_v10  ;;  %4299 = vmatmul.msk.bf16.gmra.mxu0 %vm1218_vm0, %v2340_v18  ;;  %4307 = vmatmul.msk.bf16.gmra.mxu1 %vm1218_vm0, %v2340_v18  ;;  %v6650_v55 = vpop.f32.mrf.mxu1  ;;  %v4459_v18 = vld [vmem:[#allocation3 + $0x74] sm:$0xf] }
 0x47d   : > { %7727 = vst [vmem:[#allocation60_spill] sm:$0xff] %v6636_v56  ;;  %2705 = vrot.lane.b32.xlu0 %v6161_v51, %s5518_s1  ;;  %v6648_v56 = vpop.f32.mrf.mxu0  ;;  %v4324_v26 = vor.u32 %v4459_v18, %v4321_v5 }
 0x47e   : > { %v2033_v50 = vmul.f32 1.442695, %v1993_v33  ;;  %v2035_v41 = vmul.f32 1.442695, %v1994_v7  ;;  %v1982_v7 = vmax.f32 %v6648_v56, %v6650_v55  ;;  %v4460_v33 = vld [vmem:[#allocation3 + $0x74] sm:$0xf0] }
 0x47f   : > { %2990 = vmatpush.bf16.msra.mxu1 %v4324_v26 }
 0x480   : > { %4966 = vpow2.f32 %v2033_v50 }
 0x481   : > { %4968 = vpow2.f32 %v2035_v41  ;;  %v6644_v15 = vpop.f32.mrf.mxu2  ;;  %v4319_v41 = vld [vmem:[#allocation3 + $0x70] sm:$0xf] }
 0x482   : > { %7728 = vst [vmem:[#allocation61_spill] sm:$0xff] %v6644_v15  ;;  %v6646_v28 = vpop.f32.mrf.mxu3  ;;  %v4320_v58 = vor.u32 %v4460_v33, %v4319_v41  ;;  %v4458_v41 = vld [vmem:[#allocation3 + $0x64] sm:$0xf0] }
 0x483   : > { %7729 = vst [vmem:[#allocation62_spill] sm:$0xff] %v6646_v28  ;;  %v1963_v22 = vpop.xlane.xlu1 %1962 }
 0x484   : > { %v2001_v57 = vsub.f32 %v6494_v32, %v1963_v22  ;;  %v2002_v10 = vsub.f32 %v6496_v39, %v1963_v22  ;;  %2941 = vmatpush.bf16.msrb.mxu0 %v4320_v58 }
 0x485   : > { %2721 = vrot.lane.b32.xlu0 %v6169_v48, %s5518_s1 }
 0x486   : > { %v4967_v50 = vpop.eup %4966  ;;  %v2049_v28 = vmul.f32 1.442695, %v2001_v57  ;;  %v2051_v15 = vmul.f32 1.442695, %v2002_v10  ;;  %v4311_v10 = vld [vmem:[#allocation3 + $0x60] sm:$0xf] }
 0x487   : > { %v4969_v36 = vpop.eup %4968  ;;  %1983 = vmax.xlane.f32.xlu2 %v1982_v7  ;;  %v2133_v32 = vpack.c.bf16 %v6594_v30, %v4967_v50  ;;  %v4457_v7 = vld [vmem:[#allocation3 + $0x64] sm:$0xf]  ;;  %v4312_v33 = vor.u32 %v4458_v41, %v4311_v10  ;;  %v4313_v30 = vld [vmem:[#allocation3 + $0x68] sm:$0xf0] }
 0x488   : > { %4970 = vpow2.f32 %v2049_v28  ;;  %v2134_v39 = vpack.c.bf16 %v6596_v31, %v4969_v36  ;;  %v6660_v22 = vadd.f32 %v4969_v36, %v4967_v50  ;;  %v4316_v31 = vor.u32 %v4457_v7, %v4313_v30 }
 0x489   : > { %4972 = vpow2.f32 %v2051_v15  ;;  %v1674_v29 = vpop.f32.mrf.mxu2  ;;  %2211 = vmatmul.bf16.gmra.mxu2 %v2133_v32  ;;  %2942 = vmatpush.bf16.msrb.mxu0 %v4312_v33  ;;  %v2135_v50 = vpack.c.bf16 %v6622_v21, %v6604_v54  ;;  %v2136_v32 = vpack.c.bf16 %v6624_v42, %v6608_v37 }
 0x48a   : > { %v1723_v27 = vpop.f32.mrf.mxu3  ;;  %2260 = vmatmul.bf16.gmra.mxu3 %v2134_v39  ;;  %2991 = vmatpush.bf16.msra.mxu1 %v4316_v31 }
 0x48b   : > { %v6662_v57 = vadd.f32 %v1723_v27, %v1674_v29  ;;  %v1979_v29 = vmax.f32 %v6632_v25, %v6634_v6 }
 0x48d   : > { %7730 = vst [vmem:[#allocation63_spill] sm:$0xff] %v6662_v57  ;;  %2703 = vrot.lane.b32.xlu0 %v6184_v23, %s5518_s1 }
 0x48e   : > { %v4971_v58 = vpop.eup %4970 }
 0x48f   : > { %v4973_v36 = vpop.eup %4972 }
 0x490   : > { %v6666_v15 = vadd.f32 %v4973_v36, %v4971_v58 }
 0x491   : > { %v6668_v26 = vpop.f32.mrf.mxu2 }
 0x492   : > { %7731 = vst [vmem:[#allocation64_spill] sm:$0xff] %v6666_v15  ;;  %v6670_v5 = vpop.f32.mrf.mxu3 }
 0x493   : > { %7732 = vst [vmem:[#allocation65_spill] sm:$0xff] %v6668_v26  ;;  %v7755_v26 = vld [vmem:[#allocation32_spill] sm:$0xff] }
 0x494   : > { %7733 = vst [vmem:[#allocation66_spill] sm:$0xff] %v6670_v5 }
 0x495   : > { %2717 = vrot.lane.b32.xlu0 %v6215_v20, %s5518_s1 }
 0x496   : > { %v1966_v27 = vpop.xlane.xlu0 %1965 }
 0x497   : > { %v2003_v28 = vsub.f32 %v6510_v13, %v1966_v27  ;;  %v2004_v18 = vsub.f32 %v6512_v8, %v1966_v27  ;;  %1980 = vmax.xlane.f32.xlu1 %v1979_v29  ;;  %v7735_v13 = vld [vmem:[#allocation24_spill] sm:$0xff]  ;;  %v7736_v8 = vld [vmem:[#allocation25_spill] sm:$0xff]  ;;  %v7740_v29 = vld [vmem:[#allocation27_spill] sm:$0xff] }
 0x499   : > { %v2053_v39 = vmul.f32 1.442695, %v2003_v28  ;;  %v2055_v10 = vmul.f32 1.442695, %v2004_v18  ;;  %v1679_v41 = vpop.f32.mrf.mxu2  ;;  %2216 = vmatmul.bf16.gmra.mxu2 %v2135_v50 }
 0x49a   : > { %v1728_v7 = vpop.f32.mrf.mxu3  ;;  %2265 = vmatmul.bf16.gmra.mxu3 %v2136_v32 }
 0x49b   : > { %4974 = vpow2.f32 %v2053_v39  ;;  %v6682_v33 = vadd.f32 %v1728_v7, %v1679_v41  ;;  %v2342_v30 = vpop.permute.xlu1 %2341 }
 0x49c   : > { %4976 = vpow2.f32 %v2055_v10  ;;  %4300 = vmatmul.msk.bf16.gmra.mxu0 %vm1218_vm0, %v2342_v30  ;;  %4308 = vmatmul.msk.bf16.gmra.mxu1 %vm1218_vm0, %v2342_v30 }
 0x49d   : > { %7734 = vst [vmem:[#allocation67_spill] sm:$0xff] %v6682_v33  ;;  %2699 = vrot.lane.b32.xlu0 %v7735_v13, %s5518_s1 }
 0x49f   : > { %2701 = vrot.lane.b32.xlu2 %v7736_v8, %s5518_s1 }
 0x4a1   : > { %v4975_v54 = vpop.eup %4974  ;;  %v6690_v37 = vpop.f32.mrf.mxu2 }
 0x4a2   : > { %7737 = vst [vmem:[#allocation24_spill] sm:$0xff] %v6690_v37  ;;  %v4977_v21 = vpop.eup %4976  ;;  %v6692_v42 = vpop.f32.mrf.mxu3  ;;  %v2137_v27 = vpack.c.bf16 %v4975_v54, %v4971_v58  ;;  %v7742_v58 = vld [vmem:[#allocation23_spill] sm:$0xff] }
 0x4a3   : > { %7738 = vst [vmem:[#allocation25_spill] sm:$0xff] %v6692_v42  ;;  %v6694_v31 = vadd.f32 %v4977_v21, %v4975_v54  ;;  %v2138_v28 = vpack.c.bf16 %v4977_v21, %v4973_v36  ;;  %v7743_v36 = vld [vmem:[#allocation26_spill] sm:$0xff] }
 0x4a5   : > { %7739 = vst [vmem:[#allocation68_spill] sm:$0xff] %v6694_v31  ;;  %2715 = vrot.lane.b32.xlu0 %v7740_v29, %s5518_s1 }
 0x4a9   : > { %v1684_v18 = vpop.f32.mrf.mxu2  ;;  %2221 = vmatmul.bf16.gmra.mxu2 %v2137_v27  ;;  %v1969_v50 = vpop.xlane.xlu2 %1968 }
 0x4aa   : > { %v1733_v32 = vpop.f32.mrf.mxu3  ;;  %2270 = vmatmul.bf16.gmra.mxu3 %v2138_v28  ;;  %v2005_v39 = vsub.f32 %v6520_v60, %v1969_v50  ;;  %v2006_v10 = vsub.f32 %v6522_v53, %v1969_v50  ;;  %v2876_v41 = vpop.permute.xlu0 %2875 }
 0x4ab   : > { %v6700_v7 = vadd.f32 %v1733_v32, %v1684_v18 }
 0x4ac   : > { %v2057_v30 = vmul.f32 1.442695, %v2005_v39  ;;  %v2059_v33 = vmul.f32 1.442695, %v2006_v10  ;;  %4325 = vmatmul.msk.bf16.vlgmr.msrb.gmra.mxu0 %vm1218_vm0, %v2876_v41  ;;  %4333 = vmatmul.msk.bf16.vlgmr.msra.gmra.mxu1 %vm1218_vm0, %v2876_v41  ;;  %v7746_v39 = vld [vmem:[#allocation28_spill] sm:$0xff] }
 0x4ad   : > { %7741 = vst [vmem:[#allocation27_spill] sm:$0xff] %v6700_v7  ;;  %2881 = vrot.lane.b32.xlu0 %v7742_v58, %s5519_s2  ;;  %v6720_v7 = vpop.f32.mrf.mxu0 }
 0x4ae   : > { %4978 = vpow2.f32 %v2057_v30  ;;  %v6718_v30 = vpop.f32.mrf.mxu1 }
 0x4af   : > { %4980 = vpow2.f32 %v2059_v33 }
 0x4b0   : > { %2719 = vrot.lane.b32.xlu1 %v7743_v36, %s5518_s1 }
 0x4b1   : > { %v6708_v60 = vpop.f32.mrf.mxu2  ;;  %v1975_v53 = vpop.xlane.xlu2 %1974 }
 0x4b2   : > { %7744 = vst [vmem:[#allocation23_spill] sm:$0xff] %v6708_v60  ;;  %v6710_v54 = vpop.f32.mrf.mxu3  ;;  %v2009_v21 = vsub.f32 %v6544_v35, %v1975_v53  ;;  %v2010_v27 = vsub.f32 %v6546_v34, %v1975_v53 }
 0x4b3   : > { %7745 = vst [vmem:[#allocation26_spill] sm:$0xff] %v6710_v54 }
 0x4b4   : > { %v4979_v28 = vpop.eup %4978  ;;  %v2065_v18 = vmul.f32 1.442695, %v2009_v21  ;;  %v2067_v50 = vmul.f32 1.442695, %v2010_v27  ;;  %v7749_v21 = vld [vmem:[#allocation30_spill] sm:$0xff] }
 0x4b5   : > { %v4981_v32 = vpop.eup %4980  ;;  %2697 = vrot.lane.b32.xlu0 %v7746_v39, %s5518_s1 }
 0x4b6   : > { %4982 = vpow2.f32 %v2065_v18  ;;  %v6716_v33 = vadd.f32 %v4981_v32, %v4979_v28  ;;  %v6734_v60 = vpop.f32.mrf.mxu1 }
 0x4b7   : > { %4984 = vpow2.f32 %v2067_v50 }
 0x4b8   : > { %7747 = vst [vmem:[#allocation28_spill] sm:$0xff] %v6716_v33  ;;  %v2485_v33 = vmax.f32 %v6720_v7, %v6718_v30 }
 0x4b9   : > { %v1689_v10 = vpop.f32.mrf.mxu2  ;;  %v2878_v41 = vpop.permute.xlu2 %2877 }
 0x4ba   : > { %v1738_v58 = vpop.f32.mrf.mxu3 }
 0x4bb   : > { %v6722_v35 = vadd.f32 %v1738_v58, %v1689_v10  ;;  %v6736_v10 = vpop.f32.mrf.mxu0  ;;  %v7753_v58 = vld [vmem:[#allocation31_spill] sm:$0xff] }
 0x4bc   : > { %v4983_v34 = vpop.eup %4982  ;;  %4326 = vmatmul.msk.bf16.gmra.mxu0 %vm1218_vm0, %v2878_v41  ;;  %4334 = vmatmul.msk.bf16.gmra.mxu1 %vm1218_vm0, %v2878_v41 }
 0x4bd   : > { %7748 = vst [vmem:[#allocation69_spill] sm:$0xff] %v6722_v35  ;;  %v4985_v53 = vpop.eup %4984  ;;  %2713 = vrot.lane.b32.xlu0 %v7749_v21, %s5518_s1  ;;  %v2488_v35 = vmax.f32 %v6736_v10, %v6734_v60 }
 0x4be   : > { %v6728_v27 = vadd.f32 %v4985_v53, %v4983_v34 }
 0x4c0   : > { %7750 = vst [vmem:[#allocation30_spill] sm:$0xff] %v6728_v27  ;;  %v6748_v27 = vpop.f32.mrf.mxu1 }
 0x4c1   : > { %v6730_v18 = vpop.f32.mrf.mxu2  ;;  %v2724_v50 = vpop.permute.xlu2 %2723 }
 0x4c2   : > { %7751 = vst [vmem:[#allocation70_spill] sm:$0xff] %v6730_v18  ;;  %v6732_v54 = vpop.f32.mrf.mxu3  ;;  %2790 = vmatpush.bf16.msrb.mxu3 %v2724_v50 }
 0x4c3   : > { %7752 = vst [vmem:[#allocation71_spill] sm:$0xff] %v6732_v54  ;;  %v6750_v9 = vpop.f32.mrf.mxu0 }
 0x4c5   : > { %2695 = vrot.lane.b32.xlu0 %v7753_v58, %s5518_s1 }
 0x4c6   : > { %v1972_v41 = vpop.xlane.xlu1 %1971 }
 0x4c7   : > { %v2007_v42 = vsub.f32 %v6532_v1, %v1972_v41  ;;  %v2008_v37 = vsub.f32 %v6534_v3, %v1972_v41 }
 0x4c8   : > { %2489 = vmax.xlane.f32.xlu2 %v2488_v35  ;;  %v6760_v14 = vpop.f32.mrf.mxu1 }
 0x4c9   : > { %v2061_v18 = vmul.f32 1.442695, %v2007_v42  ;;  %v2063_v57 = vmul.f32 1.442695, %v2008_v37  ;;  %v2202_v54 = vpop.f32.mrf.mxu2 }
 0x4ca   : > { %v2251_v50 = vpop.f32.mrf.mxu3 }
 0x4cb   : > { %4986 = vpow2.f32 %v2061_v18  ;;  %v6744_v5 = vadd.f32 %v2251_v50, %v2202_v54  ;;  %v6764_v2 = vpop.f32.mrf.mxu0 }
 0x4cc   : > { %4988 = vpow2.f32 %v2063_v57 }
 0x4cd   : > { %7754 = vst [vmem:[#allocation31_spill] sm:$0xff] %v6744_v5  ;;  %2711 = vrot.lane.b32.xlu0 %v7755_v26, %s5518_s1 }
 0x4d1   : > { %v4987_v45 = vpop.eup %4986  ;;  %v6752_v1 = vpop.f32.mrf.mxu2 }
 0x4d2   : > { %7756 = vst [vmem:[#allocation32_spill] sm:$0xff] %v6752_v1  ;;  %v4989_v3 = vpop.eup %4988  ;;  %v6754_v35 = vpop.f32.mrf.mxu3  ;;  %v2139_v37 = vpack.c.bf16 %v4987_v45, %v4979_v28 }
 0x4d3   : > { %7757 = vst [vmem:[#allocation72_spill] sm:$0xff] %v6754_v35  ;;  %v2140_v42 = vpack.c.bf16 %v4989_v3, %v4981_v32  ;;  %v6756_v41 = vadd.f32 %v4989_v3, %v4987_v45 }
 0x4d4   : > { %v1978_v54 = vpop.xlane.xlu0 %1977  ;;  %2226 = vmatmul.bf16.gmra.mxu2 %v2139_v37  ;;  %v7760_v37 = vld [vmem:[#allocation29_spill] sm:$0xff] }
 0x4d5   : > { %7758 = vst [vmem:[#allocation73_spill] sm:$0xff] %v6756_v41  ;;  %v2011_v57 = vsub.f32 %v6580_v52, %v1978_v54  ;;  %v2012_v18 = vsub.f32 %v6582_v24, %v1978_v54  ;;  %2275 = vmatmul.bf16.gmra.mxu3 %v2140_v42  ;;  %v6772_v54 = vpop.f32.mrf.mxu1 }
 0x4d7   : > { %v2069_v50 = vmul.f32 1.442695, %v2011_v57  ;;  %v2071_v16 = vmul.f32 1.442695, %v2012_v18  ;;  %v6774_v18 = vpop.f32.mrf.mxu0 }
 0x4d9   : > { %4990 = vpow2.f32 %v2069_v50  ;;  %v2207_v28 = vpop.f32.mrf.mxu2 }
 0x4da   : > { %4992 = vpow2.f32 %v2071_v16  ;;  %2486 = vmax.xlane.f32.xlu1 %v2485_v33  ;;  %v2256_v45 = vpop.f32.mrf.mxu3 }
 0x4db   : > { %v6766_v32 = vadd.f32 %v2256_v45, %v2207_v28 }
 0x4dd   : > { %7759 = vst [vmem:[#allocation74_spill] sm:$0xff] %v6766_v32  ;;  %v6778_v33 = vpop.f32.mrf.mxu1 }
 0x4df   : > { %v4991_v52 = vpop.eup %4990  ;;  %v2708_v3 = vpop.permute.xlu1 %2707 }
 0x4e0   : > { %v4993_v24 = vpop.eup %4992  ;;  %2741 = vmatpush.bf16.msrb.mxu2 %v2708_v3  ;;  %2709 = vrot.lane.b32.xlu2 %v7760_v37, %s5518_s1  ;;  %v2141_v57 = vpack.c.bf16 %v4991_v52, %v4983_v34  ;;  %v6780_v28 = vpop.f32.mrf.mxu0  ;;  %v7762_v3 = vld [vmem:[#allocation33_spill] sm:$0xff] }
 0x4e1   : > { %v6770_v42 = vadd.f32 %v4993_v24, %v4991_v52  ;;  %v2142_v50 = vpack.c.bf16 %v4993_v24, %v4985_v53  ;;  %v2491_v53 = vmax.f32 %v6750_v9, %v6748_v27  ;;  %v2500_v41 = vmax.f32 %v6780_v28, %v6778_v33 }
 0x4e3   : > { %7761 = vst [vmem:[#allocation29_spill] sm:$0xff] %v6770_v42 }
 0x4e4   : > { %2231 = vmatmul.bf16.gmra.mxu2 %v2141_v57 }
 0x4e5   : > { %2280 = vmatmul.bf16.gmra.mxu3 %v2142_v50  ;;  %v6788_v52 = vpop.f32.mrf.mxu1 }
 0x4e7   : > { %v2880_v16 = vpop.permute.xlu0 %2879 }
 0x4e8   : > { %4327 = vmatmul.msk.bf16.gmra.mxu0 %vm1218_vm0, %v2880_v16  ;;  %4335 = vmatmul.msk.bf16.gmra.mxu1 %vm1218_vm0, %v2880_v16  ;;  %v6784_v34 = vpop.f32.mrf.mxu0 }
 0x4e9   : > { %v2503_v31 = vmax.f32 %v6784_v34, %v6788_v52 }
 0x4ed   : > { %v6798_v49 = vpop.f32.mrf.mxu1 }
 0x4ef   : > { %v2706_v45 = vpop.permute.xlu0 %2705 }
 0x4f0   : > { %2742 = vmatpush.bf16.msrb.mxu2 %v2706_v45  ;;  %v6796_v19 = vpop.f32.mrf.mxu0 }
 0x4f3   : > { %2693 = vrot.lane.b32.xlu1 %v7762_v3, %s5518_s1 }
 0x4f5   : > { %v6810_v62 = vpop.f32.mrf.mxu1 }
 0x4f7   : > { %2492 = vmax.xlane.f32.xlu0 %v2491_v53  ;;  %v2722_v24 = vpop.permute.xlu0 %2721 }
 0x4f8   : > { %2791 = vmatpush.bf16.msrb.mxu3 %v2722_v24 }
 0x4fa   : > { %v1984_v57 = vpop.xlane.xlu2 %1983 }
 0x4fb   : > { %2883 = vrot.lane.b32.xlu1 %v6132_v63, %s5519_s2  ;;  %v2015_v50 = vsub.f32 %v6648_v56, %v1984_v57  ;;  %v2016_v16 = vsub.f32 %v6650_v55, %v1984_v57  ;;  %v6800_v63 = vpop.f32.mrf.mxu2  ;;  %v6802_v55 = vpop.f32.mrf.mxu3 }
 0x4fc   : > { %7763 = vst [vmem:[#allocation33_spill] sm:$0xff] %v6800_v63 }
 0x4fd   : > { %v2077_v45 = vmul.f32 1.442695, %v2015_v50  ;;  %v2079_v42 = vmul.f32 1.442695, %v2016_v16  ;;  %7764 = vst [vmem:[#allocation75_spill] sm:$0xff] %v6802_v55  ;;  %v6804_v50 = vpop.f32.mrf.mxu0  ;;  %v2494_v16 = vmax.f32 %v6764_v2, %v6760_v14 }
 0x4ff   : > { %4994 = vpow2.f32 %v2077_v45  ;;  %2501 = vmax.xlane.f32.xlu0 %v2500_v41  ;;  %v2704_v53 = vpop.permute.xlu0 %2703 }
 0x500   : > { %4996 = vpow2.f32 %v2079_v42  ;;  %2743 = vmatpush.bf16.msrb.mxu2 %v2704_v53 }
 0x502   : > { %v2702_v24 = vpop.permute.xlu2 %2701 }
 0x504   : > { %2744 = vmatpush.bf16.msrb.mxu2 %v2702_v24 }
 0x505   : > { %v4995_v56 = vpop.eup %4994 }
 0x506   : > { %v4997_v57 = vpop.eup %4996 }
 0x507   : > { %v2718_v45 = vpop.permute.xlu0 %2717  ;;  %v6808_v41 = vadd.f32 %v4997_v57, %v4995_v56 }
 0x509   : > { %7765 = vst [vmem:[#allocation76_spill] sm:$0xff] %v6808_v41  ;;  %2495 = vmax.xlane.f32.xlu2 %v2494_v16  ;;  %v6818_v41 = vpop.f32.mrf.mxu0  ;;  %v6820_v16 = vpop.f32.mrf.mxu1 }
 0x50a   : > { %v1981_v42 = vpop.xlane.xlu1 %1980 }
 0x50b   : > { %v2013_v53 = vsub.f32 %v6632_v25, %v1981_v42  ;;  %v2014_v24 = vsub.f32 %v6634_v6, %v1981_v42 }
 0x50c   : > { %v2212_v32 = vpop.f32.mrf.mxu2 }
 0x50d   : > { %v2073_v63 = vmul.f32 1.442695, %v2013_v53  ;;  %v2075_v55 = vmul.f32 1.442695, %v2014_v24  ;;  %v2261_v15 = vpop.f32.mrf.mxu3 }
 0x50e   : > { %v6814_v40 = vadd.f32 %v2261_v15, %v2212_v32 }
 0x50f   : > { %4998 = vpow2.f32 %v2073_v63  ;;  %v2700_v5 = vpop.permute.xlu0 %2699 }
 0x510   : > { %7766 = vst [vmem:[#allocation77_spill] sm:$0xff] %v6814_v40  ;;  %5000 = vpow2.f32 %v2075_v55  ;;  %2745 = vmatpush.bf16.msrb.mxu2 %v2700_v5  ;;  %v2506_v55 = vmax.f32 %v6796_v19, %v6798_v49 }
 0x511   : > { %2504 = vmax.xlane.f32.xlu2 %v2503_v31  ;;  %v6832_v31 = vpop.f32.mrf.mxu0 }
 0x513   : > { %2885 = vrot.lane.b32.xlu0 %v6129_v61, %s5519_s2  ;;  %v6834_v61 = vpop.f32.mrf.mxu1 }
 0x514   : > { %v6824_v25 = vpop.f32.mrf.mxu2 }
 0x515   : > { %7767 = vst [vmem:[#allocation78_spill] sm:$0xff] %v6824_v25  ;;  %v4999_v6 = vpop.eup %4998  ;;  %v6826_v15 = vpop.f32.mrf.mxu3 }
 0x516   : > { %7768 = vst [vmem:[#allocation79_spill] sm:$0xff] %v6826_v15  ;;  %v5001_v32 = vpop.eup %5000  ;;  %v2143_v63 = vpack.c.bf16 %v4995_v56, %v4999_v6 }
 0x517   : > { %v2144_v42 = vpack.c.bf16 %v4997_v57, %v5001_v32  ;;  %v2716_v5 = vpop.permute.xlu0 %2715  ;;  %v6830_v53 = vadd.f32 %v5001_v32, %v4999_v6  ;;  %v2512_v57 = vmax.f32 %v6818_v41, %v6820_v16 }
 0x518   : > { %2236 = vmatmul.bf16.gmra.mxu2 %v2143_v63 }
 0x519   : > { %7769 = vst [vmem:[#allocation80_spill] sm:$0xff] %v6830_v53  ;;  %2285 = vmatmul.bf16.gmra.mxu3 %v2144_v42  ;;  %2507 = vmax.xlane.f32.xlu2 %v2506_v55  ;;  %v6844_v32 = vpop.f32.mrf.mxu0 }
 0x51b   : > { %2887 = vrot.lane.b32.xlu0 %v6116_v59, %s5519_s2  ;;  %v2497_v59 = vmax.f32 %v6774_v18, %v6772_v54 }
 0x51c   : > { %v2217_v24 = vpop.f32.mrf.mxu2 }
 0x51d   : > { %v2266_v15 = vpop.f32.mrf.mxu3 }
 0x51e   : > { %v6838_v56 = vadd.f32 %v2266_v15, %v2217_v24  ;;  %v6850_v15 = vpop.f32.mrf.mxu1 }
 0x51f   : > { %v2882_v25 = vpop.permute.xlu0 %2881 }
 0x520   : > { %7770 = vst [vmem:[#allocation81_spill] sm:$0xff] %v6838_v56  ;;  %4328 = vmatmul.msk.bf16.gmra.mxu0 %vm1218_vm0, %v2882_v25  ;;  %4336 = vmatmul.msk.bf16.gmra.mxu1 %vm1218_vm0, %v2882_v25  ;;  %v2518_v25 = vmax.f32 %v6844_v32, %v6850_v15 }
 0x521   : > { %2513 = vmax.xlane.f32.xlu2 %v2512_v57 }
 0x522   : > { %v2720_v6 = vpop.permute.xlu1 %2719 }
 0x523   : > { %2792 = vmatpush.bf16.msrb.mxu3 %v2720_v6  ;;  %2889 = vrot.lane.b32.xlu0 %v6151_v12, %s5519_s2  ;;  %v2509_v12 = vmax.f32 %v6804_v50, %v6810_v62  ;;  %v6860_v6 = vpop.f32.mrf.mxu0 }
 0x524   : > { %v6852_v63 = vpop.f32.mrf.mxu2 }
 0x525   : > { %7771 = vst [vmem:[#allocation82_spill] sm:$0xff] %v6852_v63  ;;  %2498 = vmax.xlane.f32.xlu1 %v2497_v59  ;;  %v6854_v42 = vpop.f32.mrf.mxu3 }
 0x526   : > { %7772 = vst [vmem:[#allocation83_spill] sm:$0xff] %v6854_v42  ;;  %v6862_v53 = vpop.f32.mrf.mxu1  ;;  %v2515_v42 = vmax.f32 %v6832_v31, %v6834_v61 }
 0x527   : > { %2793 = vmatpush.bf16.msrb.mxu3 %v2718_v45  ;;  %v2698_v55 = vpop.permute.xlu0 %2697 }
 0x528   : > { %2746 = vmatpush.bf16.msrb.mxu2 %v2698_v55 }
 0x529   : > { %2519 = vmax.xlane.f32.xlu2 %v2518_v25 }
 0x52b   : > { %2794 = vmatpush.bf16.msrb.mxu3 %v2716_v5  ;;  %v6868_v5 = vpop.f32.mrf.mxu0 }
 0x52c   : > { %v2222_v24 = vpop.f32.mrf.mxu2 }
 0x52d   : > { %2510 = vmax.xlane.f32.xlu1 %v2509_v12  ;;  %v2271_v57 = vpop.f32.mrf.mxu3 }
 0x52e   : > { %v6864_v59 = vadd.f32 %v2271_v57, %v2222_v24  ;;  %v6870_v55 = vpop.f32.mrf.mxu1 }
 0x52f   : > { %v2714_v45 = vpop.permute.xlu0 %2713  ;;  %v2524_v63 = vmax.f32 %v6868_v5, %v6870_v55 }
 0x530   : > { %7773 = vst [vmem:[#allocation84_spill] sm:$0xff] %v6864_v59  ;;  %2795 = vmatpush.bf16.msrb.mxu3 %v2714_v45 }
 0x535   : > { %2516 = vmax.xlane.f32.xlu1 %v2515_v42 }
 0x537   : > { %v2696_v25 = vpop.permute.xlu0 %2695 }
 0x538   : > { %2747 = vmatpush.bf16.msrb.mxu2 %v2696_v25 }
 0x53b   : > { %v2490_v12 = vpop.xlane.xlu2 %2489 }
 0x53c   : > { %v2535_v56 = vsub.f32 %v6736_v10, %v2490_v12  ;;  %v2536_v24 = vsub.f32 %v6734_v60, %v2490_v12  ;;  %v2521_v10 = vmax.f32 %v6860_v6, %v6862_v53  ;;  %v6886_v12 = vpop.f32.mrf.mxu3 }
 0x53d   : > { %2525 = vmax.xlane.f32.xlu1 %v2524_v63  ;;  %7775 = vst [vmem:[#allocation86_spill] sm:$0xff] %v6886_v12 }
 0x53e   : > { %v2569_v57 = vmul.f32 1.442695, %v2535_v56  ;;  %v2571_v45 = vmul.f32 1.442695, %v2536_v24 }
 0x53f   : > { %v2712_v59 = vpop.permute.xlu0 %2711 }
 0x540   : > { %5002 = vpow2.f32 %v2569_v57  ;;  %2796 = vmatpush.bf16.msrb.mxu3 %v2712_v59  ;;  %v6884_v59 = vpop.f32.mrf.mxu2 }
 0x541   : > { %5004 = vpow2.f32 %v2571_v45  ;;  %3255 = vrot.lane.b32.xlu2 %v6134_v0, %s5519_s2  ;;  %7774 = vst [vmem:[#allocation85_spill] sm:$0xff] %v6884_v59 }
 0x543   : > { %v2710_v42 = vpop.permute.xlu2 %2709 }
 0x544   : > { %2797 = vmatpush.bf16.msrb.mxu3 %v2710_v42 }
 0x546   : > { %v5003_v25 = vpop.eup %5002 }
 0x547   : > { %v5005_v40 = vpop.eup %5004 }
 0x548   : > { %v6878_v35 = vadd.f32 %v5005_v40, %v5003_v25 }
 0x54d   : > { %v2487_v60 = vpop.xlane.xlu1 %2486  ;;  %2522 = vmax.xlane.f32.xlu0 %v2521_v10 }
 0x54e   : > { %v2533_v56 = vsub.f32 %v6720_v7, %v2487_v60  ;;  %v2534_v63 = vsub.f32 %v6718_v30, %v2487_v60 }
 0x550   : > { %v2565_v0 = vmul.f32 1.442695, %v2533_v56  ;;  %v2567_v24 = vmul.f32 1.442695, %v2534_v63  ;;  %v6900_v56 = vpop.f32.mrf.mxu0 }
 0x552   : > { %5006 = vpow2.f32 %v2565_v0 }
 0x553   : > { %5008 = vpow2.f32 %v2567_v24 }
 0x556   : > { %3271 = vrot.lane.b32.xlu1 %v6153_v11, %s5519_s2  ;;  %v6902_v11 = vpop.f32.mrf.mxu1 }
 0x557   : > { %v2227_v57 = vpop.f32.mrf.mxu2 }
 0x558   : > { %v5007_v45 = vpop.eup %5006  ;;  %v2276_v42 = vpop.f32.mrf.mxu3 }
 0x559   : > { %v5009_v1 = vpop.eup %5008  ;;  %v6890_v10 = vadd.f32 %v2276_v42, %v2227_v57  ;;  %v2677_v0 = vpack.c.bf16 %v5003_v25, %v5007_v45 }
 0x55a   : > { %v2678_v7 = vpack.c.bf16 %v5005_v40, %v5009_v1  ;;  %v6892_v4 = vadd.f32 %v5009_v1, %v5007_v45  ;;  %v2527_v40 = vmax.f32 %v6900_v56, %v6902_v11 }
 0x55b   : > { %7776 = vst [vmem:[#allocation87_spill] sm:$0xff] %v6890_v10 }
 0x55c   : > { %2798 = vmatmul.bf16.vlgmr.msrb.gmra.mxu3 %v2678_v7 }
 0x55f   : > { %v6894_v30 = vpop.f32.mrf.mxu2 }
 0x560   : > { %7777 = vst [vmem:[#allocation88_spill] sm:$0xff] %v6894_v30  ;;  %v6896_v60 = vpop.f32.mrf.mxu3 }
 0x561   : > { %7778 = vst [vmem:[#allocation89_spill] sm:$0xff] %v6896_v60  ;;  %3253 = vrot.lane.b32.xlu0 %v6161_v51, %s5519_s2 }
 0x565   : > { %v2694_v63 = vpop.permute.xlu1 %2693 }
 0x566   : > { %2748 = vmatpush.bf16.msrb.mxu2 %v2694_v63 }
 0x567   : > { %v2232_v24 = vpop.f32.mrf.mxu2 }
 0x568   : > { %v2281_v57 = vpop.f32.mrf.mxu3 }
 0x569   : > { %v6906_v1 = vadd.f32 %v2281_v57, %v2232_v24  ;;  %2749 = vmatmul.bf16.vlgmr.msrb.gmra.mxu2 %v2677_v0  ;;  %3269 = vrot.lane.b32.xlu0 %v6169_v48, %s5519_s2 }
 0x56a   : > { %v2493_v42 = vpop.xlane.xlu0 %2492  ;;  %2528 = vmax.xlane.f32.xlu2 %v2527_v40 }
 0x56b   : > { %7779 = vst [vmem:[#allocation90_spill] sm:$0xff] %v6906_v1  ;;  %v2537_v51 = vsub.f32 %v6750_v9, %v2493_v42  ;;  %v2538_v7 = vsub.f32 %v6748_v27, %v2493_v42  ;;  %v6924_v42 = vpop.f32.mrf.mxu1 }
 0x56d   : > { %v2573_v10 = vmul.f32 1.442695, %v2537_v51  ;;  %v2575_v63 = vmul.f32 1.442695, %v2538_v7  ;;  %v2884_v25 = vpop.permute.xlu1 %2883 }
 0x56e   : > { %4329 = vmatmul.msk.bf16.gmra.mxu0 %vm1218_vm0, %v2884_v25  ;;  %4337 = vmatmul.msk.bf16.gmra.mxu1 %vm1218_vm0, %v2884_v25 }
 0x56f   : > { %5010 = vpow2.f32 %v2573_v10  ;;  %v6922_v10 = vpop.f32.mrf.mxu0 }
 0x570   : > { %5012 = vpow2.f32 %v2575_v63  ;;  %v2530_v63 = vmax.f32 %v6922_v10, %v6924_v42 }
 0x571   : > { %3251 = vrot.lane.b32.xlu0 %v6184_v23, %s5519_s2 }
 0x572   : > { %v2502_v45 = vpop.xlane.xlu0 %2501 }
 0x573   : > { %v2543_v48 = vsub.f32 %v6780_v28, %v2502_v45  ;;  %v2544_v0 = vsub.f32 %v6778_v33, %v2502_v45 }
 0x575   : > { %v5011_v9 = vpop.eup %5010  ;;  %v2585_v24 = vmul.f32 1.442695, %v2543_v48  ;;  %v2587_v27 = vmul.f32 1.442695, %v2544_v0 }
 0x576   : > { %v5013_v57 = vpop.eup %5012 }
 0x577   : > { %5014 = vpow2.f32 %v2585_v24  ;;  %v6918_v40 = vadd.f32 %v5013_v57, %v5011_v9 }
 0x578   : > { %5016 = vpow2.f32 %v2587_v27 }
 0x579   : > { %3265 = vrot.lane.b32.xlu0 %v6215_v20, %s5519_s2 }
 0x57c   : > { %v2496_v23 = vpop.xlane.xlu2 %2495 }
 0x57d   : > { %v6926_v51 = vpop.eup %5014  ;;  %v2539_v33 = vsub.f32 %v6764_v2, %v2496_v23  ;;  %v2540_v28 = vsub.f32 %v6760_v14, %v2496_v23 }
 0x57e   : > { %v6930_v7 = vpop.eup %5016 }
 0x57f   : > { %v2577_v25 = vmul.f32 1.442695, %v2539_v33  ;;  %v2579_v45 = vmul.f32 1.442695, %v2540_v28  ;;  %v6936_v20 = vadd.f32 %v6930_v7, %v6926_v51 }
 0x580   : > { %2531 = vmax.xlane.f32.xlu1 %v2530_v63 }
 0x581   : > { %5018 = vpow2.f32 %v2577_v25  ;;  %3247 = vrot.lane.b32.xlu0 %v7735_v13, %s5519_s2 }
 0x582   : > { %5020 = vpow2.f32 %v2579_v45  ;;  %3267 = vrot.lane.b32.xlu2 %v7743_v36, %s5519_s2 }
 0x584   : > { %v2505_v14 = vpop.xlane.xlu2 %2504 }
 0x585   : > { %v2545_v2 = vsub.f32 %v6784_v34, %v2505_v14  ;;  %v2546_v48 = vsub.f32 %v6788_v52, %v2505_v14  ;;  %v2886_v0 = vpop.permute.xlu0 %2885 }
 0x586   : > { %4330 = vmatmul.msk.bf16.gmra.mxu0 %vm1218_vm0, %v2886_v0  ;;  %4338 = vmatmul.msk.bf16.gmra.mxu1 %vm1218_vm0, %v2886_v0 }
 0x587   : > { %v5019_v24 = vpop.eup %5018  ;;  %v2589_v27 = vmul.f32 1.442695, %v2545_v2  ;;  %v2591_v23 = vmul.f32 1.442695, %v2546_v48  ;;  %v6964_v2 = vpop.f32.mrf.mxu3 }
 0x588   : > { %v5021_v33 = vpop.eup %5020  ;;  %v2679_v28 = vpack.c.bf16 %v5019_v24, %v5011_v9  ;;  %7781 = vst [vmem:[#allocation92_spill] sm:$0xff] %v6964_v2 }
 0x589   : > { %5022 = vpow2.f32 %v2589_v27  ;;  %3263 = vrot.lane.b32.xlu0 %v7740_v29, %s5519_s2  ;;  %v2680_v13 = vpack.c.bf16 %v5021_v33, %v5013_v57  ;;  %v6948_v36 = vadd.f32 %v5021_v33, %v5019_v24  ;;  %v6962_v57 = vpop.f32.mrf.mxu2 }
 0x58a   : > { %5024 = vpow2.f32 %v2591_v23  ;;  %2754 = vmatmul.bf16.gmra.mxu2 %v2679_v28  ;;  %7780 = vst [vmem:[#allocation91_spill] sm:$0xff] %v6962_v57 }
 0x58b   : > { %2803 = vmatmul.bf16.gmra.mxu3 %v2680_v13 }
 0x58c   : > { %v2508_v34 = vpop.xlane.xlu2 %2507 }
 0x58d   : > { %v2547_v52 = vsub.f32 %v6796_v19, %v2508_v34  ;;  %v2548_v63 = vsub.f32 %v6798_v49, %v2508_v34  ;;  %v2888_v19 = vpop.permute.xlu0 %2887  ;;  %v6986_v34 = vpop.f32.mrf.mxu1 }
 0x58f   : > { %v6952_v25 = vpop.eup %5022  ;;  %v2593_v45 = vmul.f32 1.442695, %v2547_v52  ;;  %v2595_v14 = vmul.f32 1.442695, %v2548_v63 }
 0x590   : > { %v6954_v9 = vpop.eup %5024 }
 0x591   : > { %5026 = vpow2.f32 %v2593_v45  ;;  %3245 = vrot.lane.b32.xlu0 %v7746_v39, %s5519_s2  ;;  %v6960_v29 = vadd.f32 %v6954_v9, %v6952_v25 }
 0x592   : > { %5028 = vpow2.f32 %v2595_v14 }
 0x594   : > { %v2514_v49 = vpop.xlane.xlu2 %2513 }
 0x595   : > { %v2551_v48 = vsub.f32 %v6818_v41, %v2514_v49  ;;  %v2552_v0 = vsub.f32 %v6820_v16, %v2514_v49  ;;  %v6980_v41 = vpop.f32.mrf.mxu0 }
 0x596   : > { %4331 = vmatmul.msk.bf16.gmra.mxu0 %vm1218_vm0, %v2888_v19  ;;  %4339 = vmatmul.msk.bf16.gmra.mxu1 %vm1218_vm0, %v2888_v19 }
 0x597   : > { %v6970_v39 = vpop.eup %5026  ;;  %v2601_v24 = vmul.f32 1.442695, %v2551_v48  ;;  %v2603_v27 = vmul.f32 1.442695, %v2552_v0 }
 0x598   : > { %v6972_v23 = vpop.eup %5028  ;;  %v2499_v33 = vpop.xlane.xlu1 %2498 }
 0x599   : > { %5030 = vpow2.f32 %v2601_v24  ;;  %v2541_v28 = vsub.f32 %v6774_v18, %v2499_v33  ;;  %v2542_v13 = vsub.f32 %v6772_v54, %v2499_v33  ;;  %3249 = vrot.lane.b32.xlu1 %v7736_v8, %s5519_s2  ;;  %3261 = vrot.lane.b32.xlu0 %v7749_v21, %s5519_s2  ;;  %v6984_v16 = vadd.f32 %v6972_v23, %v6970_v39 }
 0x59a   : > { %5032 = vpow2.f32 %v2603_v27 }
 0x59b   : > { %v2581_v52 = vmul.f32 1.442695, %v2541_v28  ;;  %v2583_v63 = vmul.f32 1.442695, %v2542_v13  ;;  %v2237_v18 = vpop.f32.mrf.mxu2 }
 0x59c   : > { %v2286_v45 = vpop.f32.mrf.mxu3  ;;  %v2520_v54 = vpop.xlane.xlu2 %2519 }
 0x59d   : > { %5034 = vpow2.f32 %v2581_v52  ;;  %v6988_v14 = vadd.f32 %v2286_v45, %v2237_v18  ;;  %v2555_v8 = vsub.f32 %v6844_v32, %v2520_v54  ;;  %v2556_v21 = vsub.f32 %v6850_v15, %v2520_v54  ;;  %v2890_v52 = vpop.permute.xlu0 %2889  ;;  %v7005_v54 = vpop.f32.mrf.mxu0 }
 0x59e   : > { %5036 = vpow2.f32 %v2583_v63 }
 0x59f   : > { %7782 = vst [vmem:[#allocation93_spill] sm:$0xff] %v6988_v14  ;;  %v6992_v19 = vpop.eup %5030  ;;  %v2609_v49 = vmul.f32 1.442695, %v2555_v8  ;;  %v2611_v48 = vmul.f32 1.442695, %v2556_v21 }
 0x5a0   : > { %v6994_v0 = vpop.eup %5032  ;;  %v2511_v24 = vpop.xlane.xlu1 %2510 }
 0x5a1   : > { %5038 = vpow2.f32 %v2609_v49  ;;  %v2549_v27 = vsub.f32 %v6804_v50, %v2511_v24  ;;  %v2550_v33 = vsub.f32 %v6810_v62, %v2511_v24  ;;  %3243 = vrot.lane.b32.xlu0 %v7753_v58, %s5519_s2  ;;  %v7002_v32 = vadd.f32 %v6994_v0, %v6992_v19  ;;  %v7010_v50 = vpop.f32.mrf.mxu1 }
 0x5a2   : > { %5040 = vpow2.f32 %v2611_v48  ;;  %v3033_v48 = vmax.f32 %v6980_v41, %v6986_v34 }
 0x5a3   : > { %v5035_v15 = vpop.eup %5034  ;;  %v2597_v28 = vmul.f32 1.442695, %v2549_v27  ;;  %v2599_v13 = vmul.f32 1.442695, %v2550_v33 }
 0x5a4   : > { %v5037_v63 = vpop.eup %5036  ;;  %v2681_v18 = vpack.c.bf16 %v6926_v51, %v5035_v15  ;;  %v3256_v45 = vpop.permute.xlu2 %3255 }
 0x5a5   : > { %5042 = vpow2.f32 %v2597_v28  ;;  %v2682_v62 = vpack.c.bf16 %v6930_v7, %v5037_v63  ;;  %3289 = vmatpush.bf16.msra.mxu2 %v3256_v45  ;;  %v7008_v58 = vadd.f32 %v5037_v63, %v5035_v15 }
 0x5a6   : > { %5044 = vpow2.f32 %v2599_v13  ;;  %2759 = vmatmul.bf16.gmra.mxu2 %v2681_v18  ;;  %4332 = vmatmul.msk.bf16.gmra.mxu0 %vm1218_vm0, %v2890_v52 }
 0x5a7   : > { %v7013_v8 = vpop.eup %5038  ;;  %2808 = vmatmul.bf16.gmra.mxu3 %v2682_v62  ;;  %4340 = vmatmul.msk.bf16.gmra.mxu1 %vm1218_vm0, %v2890_v52 }
 0x5a8   : > { %v7016_v51 = vpop.eup %5040  ;;  %v2517_v21 = vpop.xlane.xlu1 %2516 }
 0x5a9   : > { %v2553_v49 = vsub.f32 %v6832_v31, %v2517_v21  ;;  %v2554_v7 = vsub.f32 %v6834_v61, %v2517_v21  ;;  %3259 = vrot.lane.b32.xlu0 %v7755_v26, %s5519_s2  ;;  %v7026_v24 = vadd.f32 %v7016_v51, %v7013_v8  ;;  %v7030_v31 = vpop.f32.mrf.mxu0  ;;  %v7032_v61 = vpop.f32.mrf.mxu1 }
 0x5ab   : > { %7783 = vst [vmem:[#allocation94_spill] sm:$0xff] %v7026_v24  ;;  %v5043_v27 = vpop.eup %5042  ;;  %v2605_v33 = vmul.f32 1.442695, %v2553_v49  ;;  %v2607_v15 = vmul.f32 1.442695, %v2554_v7  ;;  %3034 = vmax.xlane.f32.xlu2 %v3033_v48  ;;  %v2683_v49 = vpack.c.bf16 %v6970_v39, %v6952_v25  ;;  %v2684_v7 = vpack.c.bf16 %v6972_v23, %v6954_v9 }
 0x5ac   : > { %v5045_v28 = vpop.eup %5044  ;;  %v3036_v23 = vmax.f32 %v7005_v54, %v7010_v50 }
 0x5ad   : > { %5046 = vpow2.f32 %v2605_v33  ;;  %v7028_v13 = vadd.f32 %v5045_v28, %v5043_v27 }
 0x5ae   : > { %5048 = vpow2.f32 %v2607_v15 }
 0x5b0   : > { %v2526_v26 = vpop.xlane.xlu1 %2525 }
 0x5b1   : > { %v2559_v52 = vsub.f32 %v6868_v5, %v2526_v26  ;;  %v2560_v63 = vsub.f32 %v6870_v55, %v2526_v26  ;;  %3241 = vrot.lane.b32.xlu0 %v7762_v3, %s5519_s2  ;;  %v7044_v5 = vpop.f32.mrf.mxu0  ;;  %v7046_v55 = vpop.f32.mrf.mxu1 }
 0x5b3   : > { %v5047_v18 = vpop.eup %5046  ;;  %v2617_v45 = vmul.f32 1.442695, %v2559_v52  ;;  %v2619_v62 = vmul.f32 1.442695, %v2560_v63 }
 0x5b4   : > { %v5049_v21 = vpop.eup %5048 }
 0x5b5   : > { %5050 = vpow2.f32 %v2617_v45  ;;  %v7042_v48 = vadd.f32 %v5049_v21, %v5047_v18 }
 0x5b6   : > { %5052 = vpow2.f32 %v2619_v62  ;;  %2764 = vmatmul.bf16.gmra.mxu2 %v2683_v49  ;;  %v2685_v62 = vpack.c.bf16 %v6992_v19, %v5043_v27  ;;  %v3042_v49 = vmax.f32 %v7044_v5, %v7046_v55 }
 0x5b7   : > { %7784 = vst [vmem:[#allocation95_spill] sm:$0xff] %v7042_v48  ;;  %2813 = vmatmul.bf16.gmra.mxu3 %v2684_v7 }
 0x5b9   : > { %v7057_v26 = vpop.f32.mrf.mxu0  ;;  %v7059_v52 = vpop.f32.mrf.mxu1 }
 0x5ba   : > { %v3045_v19 = vmax.f32 %v7057_v26, %v7059_v52 }
 0x5bb   : > { %v5051_v3 = vpop.eup %5050 }
 0x5bc   : > { %v7048_v33 = vpop.eup %5052 }
 0x5bd   : > { %v7051_v15 = vadd.f32 %v7048_v33, %v5051_v3 }
 0x5bf   : > { %7785 = vst [vmem:[#allocation96_spill] sm:$0xff] %v7051_v15 }
 0x5c0   : > { %v2523_v25 = vpop.xlane.xlu0 %2522 }
 0x5c1   : > { %v2557_v39 = vsub.f32 %v6860_v6, %v2523_v25  ;;  %v2558_v9 = vsub.f32 %v6862_v53, %v2523_v25  ;;  %v2686_v6 = vpack.c.bf16 %v6994_v0, %v5045_v28 }
 0x5c3   : > { %v2613_v63 = vmul.f32 1.442695, %v2557_v39  ;;  %v2615_v45 = vmul.f32 1.442695, %v2558_v9  ;;  %3037 = vmax.xlane.f32.xlu1 %v3036_v23  ;;  %3257 = vrot.lane.b32.xlu2 %v7760_v37, %s5519_s2  ;;  %v7067_v39 = vpop.f32.mrf.mxu0  ;;  %v7069_v9 = vpop.f32.mrf.mxu1  ;;  %v2687_v23 = vpack.c.bf16 %v7013_v8, %v5047_v18 }
 0x5c5   : > { %5054 = vpow2.f32 %v2613_v63  ;;  %v2688_v63 = vpack.c.bf16 %v7016_v51, %v5049_v21 }
 0x5c6   : > { %5056 = vpow2.f32 %v2615_v45  ;;  %2769 = vmatmul.bf16.gmra.mxu2 %v2685_v62  ;;  %v3039_v45 = vmax.f32 %v7030_v31, %v7032_v61  ;;  %v3048_v62 = vmax.f32 %v7067_v39, %v7069_v9 }
 0x5c7   : > { %2818 = vmatmul.bf16.gmra.mxu3 %v2686_v6 }
 0x5c8   : > { %v3272_v53 = vpop.permute.xlu1 %3271 }
 0x5c9   : > { %3338 = vmatpush.bf16.msra.mxu3 %v3272_v53 }
 0x5cb   : > { %v5055_v7 = vpop.eup %5054  ;;  %3043 = vmax.xlane.f32.xlu1 %v3042_v49  ;;  %v7075_v27 = vpop.f32.mrf.mxu0 }
 0x5cc   : > { %v5057_v25 = vpop.eup %5056  ;;  %v7077_v28 = vpop.f32.mrf.mxu1 }
 0x5cd   : > { %v7071_v37 = vadd.f32 %v5057_v25, %v5055_v7 }
 0x5cf   : > { %7786 = vst [vmem:[#allocation97_spill] sm:$0xff] %v7071_v37 }
 0x5d3   : > { %3046 = vmax.xlane.f32.xlu1 %v3045_v19  ;;  %v3254_v0 = vpop.permute.xlu0 %3253  ;;  %v7085_v49 = vpop.f32.mrf.mxu0 }
 0x5d4   : > { %3290 = vmatpush.bf16.msra.mxu2 %v3254_v0  ;;  %v7087_v19 = vpop.f32.mrf.mxu1 }
 0x5d5   : > { %v3054_v0 = vmax.f32 %v7085_v49, %v7087_v19 }
 0x5d6   : > { %2774 = vmatmul.bf16.gmra.mxu2 %v2687_v23  ;;  %v7093_v23 = vpop.f32.mrf.mxu3 }
 0x5d7   : > { %2823 = vmatmul.bf16.gmra.mxu3 %v2688_v63  ;;  %7787 = vst [vmem:[#allocation98_spill] sm:$0xff] %v7093_v23 }
 0x5db   : > { %3049 = vmax.xlane.f32.xlu1 %v3048_v62  ;;  %3040 = vmax.xlane.f32.xlu0 %v3039_v45  ;;  %v3270_v6 = vpop.permute.xlu0 %3269  ;;  %v7095_v45 = vpop.f32.mrf.mxu2  ;;  %v2689_v62 = vpack.c.bf16 %v5051_v3, %v5055_v7 }
 0x5dc   : > { %3339 = vmatpush.bf16.msra.mxu3 %v3270_v6  ;;  %7788 = vst [vmem:[#allocation99_spill] sm:$0xff] %v7095_v45  ;;  %v2690_v6 = vpack.c.bf16 %v7048_v33, %v5057_v25 }
 0x5dd   : > { %v2529_v53 = vpop.xlane.xlu2 %2528 }
 0x5de   : > { %v2561_v8 = vsub.f32 %v6900_v56, %v2529_v53  ;;  %v2562_v51 = vsub.f32 %v6902_v11, %v2529_v53 }
 0x5e0   : > { %v2621_v18 = vmul.f32 1.442695, %v2561_v8  ;;  %v2623_v21 = vmul.f32 1.442695, %v2562_v51  ;;  %v2799_v8 = vpop.f32.mrf.mxu3  ;;  %v3051_v51 = vmax.f32 %v7075_v27, %v7077_v28 }
 0x5e2   : > { %5058 = vpow2.f32 %v2621_v18 }
 0x5e3   : > { %5060 = vpow2.f32 %v2623_v21  ;;  %3055 = vmax.xlane.f32.xlu1 %v3054_v0  ;;  %v3252_v63 = vpop.permute.xlu0 %3251 }
 0x5e4   : > { %3291 = vmatpush.bf16.msra.mxu2 %v3252_v63 }
 0x5e5   : > { %v3268_v56 = vpop.permute.xlu2 %3267 }
 0x5e6   : > { %2779 = vmatmul.bf16.gmra.mxu2 %v2689_v62  ;;  %3340 = vmatpush.bf16.msra.mxu3 %v3268_v56 }
 0x5e7   : > { %2828 = vmatmul.bf16.gmra.mxu3 %v2690_v6 }
 0x5e8   : > { %v5059_v11 = vpop.eup %5058 }
 0x5e9   : > { %v5061_v53 = vpop.eup %5060 }
 0x5ea   : > { %v7100_v18 = vadd.f32 %v5061_v53, %v5059_v11 }
 0x5eb   : > { %v7102_v21 = vpop.f32.mrf.mxu0  ;;  %v7104_v0 = vpop.f32.mrf.mxu1 }
 0x5ec   : > { %7789 = vst [vmem:[#allocation100_spill] sm:$0xff] %v7100_v18  ;;  %v2750_v3 = vpop.f32.mrf.mxu2  ;;  %3052 = vmax.xlane.f32.xlu2 %v3051_v51  ;;  %v3057_v33 = vmax.f32 %v7102_v21, %v7104_v0  ;;  %v3266_v7 = vpop.permute.xlu0 %3265 }
 0x5ed   : > { %v7108_v25 = vadd.f32 %v2799_v8, %v2750_v3  ;;  %3341 = vmatpush.bf16.msra.mxu3 %v3266_v7 }
 0x5ee   : > { %3058 = vmax.xlane.f32.xlu1 %v3057_v33 }
 0x5f3   : > { %v2532_v63 = vpop.xlane.xlu1 %2531  ;;  %v7110_v62 = vpop.f32.mrf.mxu0 }
 0x5f4   : > { %v2563_v6 = vsub.f32 %v6922_v10, %v2532_v63  ;;  %v2564_v56 = vsub.f32 %v6924_v42, %v2532_v63  ;;  %v7114_v14 = vpop.f32.mrf.mxu1  ;;  %v3248_v23 = vpop.permute.xlu0 %3247 }
 0x5f5   : > { %v3060_v51 = vmax.f32 %v7110_v62, %v7114_v14 }
 0x5f6   : > { %v2625_v45 = vmul.f32 1.442695, %v2563_v6  ;;  %v2627_v1 = vmul.f32 1.442695, %v2564_v56  ;;  %v7126_v56 = vpop.f32.mrf.mxu2 }
 0x5f7   : > { %3061 = vmax.xlane.f32.xlu1 %v3060_v51 }
 0x5f8   : > { %5062 = vpow2.f32 %v2625_v45  ;;  %v7128_v45 = vpop.f32.mrf.mxu3 }
 0x5f9   : > { %5064 = vpow2.f32 %v2627_v1 }
 0x5fc   : > { %v3264_v8 = vpop.permute.xlu0 %3263 }
 0x5fd   : > { %3342 = vmatpush.bf16.msra.mxu3 %v3264_v8 }
 0x5fe   : > { %v5063_v3 = vpop.eup %5062 }
 0x5ff   : > { %v5065_v33 = vpop.eup %5064  ;;  %v2691_v7 = vpack.c.bf16 %v5063_v3, %v5059_v11 }
 0x600   : > { %v2692_v2 = vpack.c.bf16 %v5065_v33, %v5061_v53  ;;  %v7118_v10 = vadd.f32 %v5065_v33, %v5063_v3 }
 0x601   : > { %2784 = vmatmul.bf16.gmra.mxu2 %v2691_v7 }
 0x602   : > { %7790 = vst [vmem:[#allocation101_spill] sm:$0xff] %v7118_v10  ;;  %2833 = vmatmul.bf16.gmra.mxu3 %v2692_v2 }
 0x603   : > { %v7120_v42 = vpop.f32.mrf.mxu0  ;;  %v7122_v63 = vpop.f32.mrf.mxu1 }
 0x604   : > { %v3063_v6 = vmax.f32 %v7120_v42, %v7122_v63  ;;  %v3246_v1 = vpop.permute.xlu0 %3245 }
 0x606   : > { %3064 = vmax.xlane.f32.xlu0 %v3063_v6 }
 0x60b   : > { %v3250_v51 = vpop.permute.xlu1 %3249  ;;  %v7130_v11 = vpop.f32.mrf.mxu0 }
 0x60c   : > { %v7132_v53 = vpop.f32.mrf.mxu1  ;;  %3292 = vmatpush.bf16.msra.mxu2 %v3250_v51  ;;  %v3262_v3 = vpop.permute.xlu0 %3261 }
 0x60d   : > { %v2755_v2 = vpop.f32.mrf.mxu2  ;;  %v3066_v8 = vmax.f32 %v7130_v11, %v7132_v53  ;;  %3343 = vmatpush.bf16.msra.mxu3 %v3262_v3 }
 0x60e   : > { %v2804_v33 = vpop.f32.mrf.mxu3 }
 0x60f   : > { %v7136_v7 = vadd.f32 %v2804_v33, %v2755_v2  ;;  %3067 = vmax.xlane.f32.xlu1 %v3066_v8 }
 0x610   : > { %3293 = vmatpush.bf16.msra.mxu2 %v3248_v23 }
 0x613   : > { %v7138_v57 = vpop.f32.mrf.mxu0 }
 0x614   : > { %v7140_v6 = vpop.f32.mrf.mxu1  ;;  %3294 = vmatpush.bf16.msra.mxu2 %v3246_v1  ;;  %v3244_v51 = vpop.permute.xlu0 %3243 }
 0x615   : > { %v3069_v60 = vmax.f32 %v7138_v57, %v7140_v6  ;;  %v7150_v3 = vpop.f32.mrf.mxu2 }
 0x616   : > { %v7152_v1 = vpop.f32.mrf.mxu3 }
 0x617   : > { %3070 = vmax.xlane.f32.xlu0 %v3069_v60 }
 0x618   : > { %3295 = vmatpush.bf16.msra.mxu2 %v3244_v51 }
 0x61b   : > { %v7144_v30 = vpop.f32.mrf.mxu0 }
 0x61c   : > { %v7146_v18 = vpop.f32.mrf.mxu1  ;;  %v3260_v8 = vpop.permute.xlu0 %3259 }
 0x61d   : > { %v3072_v2 = vmax.f32 %v7144_v30, %v7146_v18  ;;  %3344 = vmatpush.bf16.msra.mxu3 %v3260_v8 }
 0x61e   : > { %v3035_v23 = vpop.xlane.xlu2 %3034 }
 0x61f   : > { %3073 = vmax.xlane.f32.xlu1 %v3072_v2  ;;  %v3081_v33 = vsub.f32 %v6980_v41, %v3035_v23  ;;  %v3082_v60 = vsub.f32 %v6986_v34, %v3035_v23 }
 0x621   : > { %v3113_v8 = vmul.f32 1.442695, %v3081_v33  ;;  %v3115_v2 = vmul.f32 1.442695, %v3082_v60 }
 0x623   : > { %v7155_v10 = vpop.f32.mrf.mxu0  ;;  %5066 = vpow2.f32 %v3113_v8 }
 0x624   : > { %v7158_v51 = vpop.f32.mrf.mxu1  ;;  %v3242_v37 = vpop.permute.xlu0 %3241  ;;  %5068 = vpow2.f32 %v3115_v2 }
 0x625   : > { %v3075_v15 = vmax.f32 %v7155_v10, %v7158_v51  ;;  %3296 = vmatpush.bf16.msra.mxu2 %v3242_v37 }
 0x626   : > { %v3258_v12 = vpop.permute.xlu2 %3257 }
 0x627   : > { %2082 = vadd.xlane.f32.xlu1 %v6552_v47  ;;  %3076 = vmax.xlane.f32.xlu0 %v3075_v15 }
 0x628   : > { %3345 = vmatpush.bf16.msra.mxu3 %v3258_v12 }
 0x629   : > { %v2760_v59 = vpop.f32.mrf.mxu2  ;;  %v5067_v47 = vpop.eup %5066 }
 0x62a   : > { %v2809_v41 = vpop.f32.mrf.mxu3  ;;  %v5069_v15 = vpop.eup %5068 }
 0x62b   : > { %v7163_v48 = vadd.f32 %v2809_v41, %v2760_v59  ;;  %v7165_v34 = vpop.f32.mrf.mxu0  ;;  %v3177_v59 = vadd.f32 %v5069_v15, %v5067_v47 }
 0x62c   : > { %v7167_v23 = vpop.f32.mrf.mxu1 }
 0x62d   : > { %7791 = vst [vmem:[#allocation102_spill] sm:$0xff] %v7163_v48  ;;  %v3078_v24 = vmax.f32 %v7165_v34, %v7167_v23 }
 0x62f   : > { %2085 = vadd.xlane.f32.xlu0 %v6556_v43  ;;  %3079 = vmax.xlane.f32.xlu2 %v3078_v24 }
 0x630   : > { %2633 = vadd.xlane.f32.xlu1 %v6878_v35 }
 0x631   : > { %v7173_v12 = vpop.f32.mrf.mxu2 }
 0x632   : > { %v7175_v37 = vpop.f32.mrf.mxu3 }
 0x636   : > { %v3038_v33 = vpop.xlane.xlu1 %3037 }
 0x637   : > { %v3083_v60 = vsub.f32 %v7005_v54, %v3038_v33  ;;  %v3084_v8 = vsub.f32 %v7010_v50, %v3038_v33  ;;  %2630 = vadd.xlane.f32.xlu2 %v6892_v4  ;;  %3178 = vadd.xlane.f32.xlu0 %v3177_v59 }
 0x638   : > { %2088 = vadd.xlane.f32.xlu1 %v6562_v38 }
 0x639   : > { %v3117_v43 = vmul.f32 1.442695, %v3083_v60  ;;  %v3119_v24 = vmul.f32 1.442695, %v3084_v8  ;;  %v2765_v35 = vpop.f32.mrf.mxu2 }
 0x63a   : > { %v2814_v2 = vpop.f32.mrf.mxu3 }
 0x63b   : > { %5070 = vpow2.f32 %v3117_v43  ;;  %v7181_v41 = vadd.f32 %v2814_v2, %v2765_v35 }
 0x63c   : > { %5072 = vpow2.f32 %v3119_v24 }
 0x63e   : > { %v3044_v48 = vpop.xlane.xlu1 %3043 }
 0x63f   : > { %2091 = vadd.xlane.f32.xlu0 %v6572_v17  ;;  %v3087_v50 = vsub.f32 %v7044_v5, %v3044_v48  ;;  %v3088_v33 = vsub.f32 %v7046_v55, %v3044_v48 }
 0x640   : > { %2639 = vadd.xlane.f32.xlu1 %v6948_v36 }
 0x641   : > { %v5071_v54 = vpop.eup %5070  ;;  %v7186_v4 = vpop.f32.mrf.mxu2  ;;  %v3125_v24 = vmul.f32 1.442695, %v3087_v50  ;;  %v3127_v17 = vmul.f32 1.442695, %v3088_v33 }
 0x642   : > { %v5073_v59 = vpop.eup %5072  ;;  %v3225_v38 = vpack.c.bf16 %v5071_v54, %v5067_v47  ;;  %v7189_v60 = vpop.f32.mrf.mxu3 }
 0x643   : > { %v3226_v8 = vpack.c.bf16 %v5073_v59, %v5069_v15  ;;  %v3180_v43 = vadd.f32 %v5073_v59, %v5071_v54  ;;  %5074 = vpow2.f32 %v3125_v24 }
 0x644   : > { %3297 = vmatmul.bf16.vlgmr.msra.gmra.mxu2 %v3225_v38  ;;  %5076 = vpow2.f32 %v3127_v17 }
 0x645   : > { %3181 = vadd.xlane.f32.xlu2 %v3180_v43  ;;  %3346 = vmatmul.bf16.vlgmr.msra.gmra.mxu3 %v3226_v8 }
 0x646   : > { %v3047_v35 = vpop.xlane.xlu1 %3046 }
 0x648   : > { %2094 = vadd.xlane.f32.xlu1 %v6660_v22 }
 0x649   : > { %v2770_v36 = vpop.f32.mrf.mxu2  ;;  %v5075_v47 = vpop.eup %5074 }
 0x64a   : > { %v2819_v5 = vpop.f32.mrf.mxu3  ;;  %v5077_v50 = vpop.eup %5076 }
 0x64b   : > { %v7192_v2 = vadd.f32 %v2819_v5, %v2770_v36 }
 0x64d   : > { %2636 = vadd.xlane.f32.xlu2 %v6918_v40  ;;  %v3186_v40 = vadd.f32 %v5077_v50, %v5075_v47 }
 0x64e   : > { %v3050_v48 = vpop.xlane.xlu1 %3049  ;;  %v3041_v55 = vpop.xlane.xlu0 %3040 }
 0x64f   : > { %v3085_v15 = vsub.f32 %v7030_v31, %v3041_v55  ;;  %v3086_v54 = vsub.f32 %v7032_v61, %v3041_v55  ;;  %v3091_v22 = vsub.f32 %v7067_v39, %v3050_v48  ;;  %v3092_v33 = vsub.f32 %v7069_v9, %v3050_v48  ;;  %v7792_v61 = vld [vmem:[#allocation34_spill] sm:$0xff] }
 0x650   : > { %2645 = vadd.xlane.f32.xlu1 %v6936_v20  ;;  %v3089_v39 = vsub.f32 %v7057_v26, %v3047_v35  ;;  %v3090_v48 = vsub.f32 %v7059_v52, %v3047_v35 }
 0x651   : > { %v3121_v59 = vmul.f32 1.442695, %v3085_v15  ;;  %v2772_v38 = vpop.f32.mrf.mxu2  ;;  %v3123_v8 = vmul.f32 1.442695, %v3086_v54  ;;  %v3133_v17 = vmul.f32 1.442695, %v3091_v22 }
 0x652   : > { %v2821_v43 = vpop.f32.mrf.mxu3  ;;  %v3135_v31 = vmul.f32 1.442695, %v3092_v33 }
 0x653   : > { %v7200_v24 = vadd.f32 %v2821_v43, %v2772_v38  ;;  %5078 = vpow2.f32 %v3121_v59  ;;  %v3129_v38 = vmul.f32 1.442695, %v3089_v39 }
 0x654   : > { %5080 = vpow2.f32 %v3123_v8  ;;  %v3131_v8 = vmul.f32 1.442695, %v3090_v48 }
 0x655   : > { %3187 = vadd.xlane.f32.xlu2 %v3186_v40  ;;  %5082 = vpow2.f32 %v3133_v17 }
 0x656   : > { %v3056_v20 = vpop.xlane.xlu1 %3055  ;;  %5084 = vpow2.f32 %v3135_v31 }
 0x657   : > { %5086 = vpow2.f32 %v3129_v38  ;;  %v3095_v39 = vsub.f32 %v7085_v49, %v3056_v20 }
 0x658   : > { %1486 = vadd.xlane.f32.xlu1 %v7792_v61  ;;  %5088 = vpow2.f32 %v3131_v8 }
 0x659   : > { %v2775_v36 = vpop.f32.mrf.mxu2  ;;  %v5079_v9 = vpop.eup %5078 }
 0x65a   : > { %v2824_v5 = vpop.f32.mrf.mxu3  ;;  %v5081_v15 = vpop.eup %5080  ;;  %v3227_v54 = vpack.c.bf16 %v5075_v47, %v5079_v9 }
 0x65b   : > { %v7205_v55 = vadd.f32 %v2824_v5, %v2775_v36  ;;  %v3183_v22 = vadd.f32 %v5081_v15, %v5079_v9  ;;  %v3228_v59 = vpack.c.bf16 %v5077_v50, %v5081_v15  ;;  %v5083_v33 = vpop.eup %5082 }
 0x65c   : > { %3302 = vmatmul.bf16.gmra.mxu2 %v3227_v54  ;;  %v5085_v26 = vpop.eup %5084 }
 0x65d   : > { %2642 = vadd.xlane.f32.xlu2 %v7008_v58  ;;  %3184 = vadd.xlane.f32.xlu0 %v3183_v22  ;;  %v3192_v50 = vadd.f32 %v5085_v26, %v5083_v33 }
 0x65e   : > { %3351 = vmatmul.bf16.gmra.mxu3 %v3228_v59 }
 0x65f   : > { %v3053_v61 = vpop.xlane.xlu2 %3052 }
 0x660   : > { %2103 = vadd.xlane.f32.xlu1 %v6630_v44  ;;  %v5087_v44 = vpop.eup %5086  ;;  %v3093_v48 = vsub.f32 %v7075_v27, %v3053_v61 }
 0x661   : > { %v3059_v43 = vpop.xlane.xlu1 %3058  ;;  %v2777_v40 = vpop.f32.mrf.mxu2  ;;  %v3229_v38 = vpack.c.bf16 %v5083_v33, %v5087_v44 }
 0x662   : > { %v3097_v52 = vsub.f32 %v7102_v21, %v3059_v43  ;;  %v3098_v35 = vsub.f32 %v7104_v0, %v3059_v43  ;;  %v2826_v47 = vpop.f32.mrf.mxu3  ;;  %v5089_v36 = vpop.eup %5088  ;;  %v3096_v0 = vsub.f32 %v7087_v19, %v3056_v20  ;;  %v3141_v43 = vmul.f32 1.442695, %v3095_v39 }
 0x663   : > { %v7211_v58 = vadd.f32 %v2826_v47, %v2777_v40  ;;  %v3189_v8 = vadd.f32 %v5089_v36, %v5087_v44  ;;  %v7793_v40 = vld [vmem:[#allocation57_spill] sm:$0xff]  ;;  %v3230_v27 = vpack.c.bf16 %v5085_v26, %v5089_v36 }
 0x664   : > { %v3145_v17 = vmul.f32 1.442695, %v3097_v52  ;;  %v3147_v31 = vmul.f32 1.442695, %v3098_v35  ;;  %v3143_v52 = vmul.f32 1.442695, %v3096_v0 }
 0x665   : > { %3193 = vadd.xlane.f32.xlu2 %v3192_v50  ;;  %2097 = vadd.xlane.f32.xlu0 %v6600_v46  ;;  %v3094_v46 = vsub.f32 %v7077_v28, %v3053_v61 }
 0x666   : > { %5090 = vpow2.f32 %v3145_v17 }
 0x667   : > { %5092 = vpow2.f32 %v3147_v31  ;;  %v3139_v28 = vmul.f32 1.442695, %v3094_v46  ;;  %v7794_v31 = vld [vmem:[#allocation35_spill] sm:$0xff] }
 0x669   : > { %v2780_v21 = vpop.f32.mrf.mxu2 }
 0x66a   : > { %v3062_v5 = vpop.xlane.xlu1 %3061  ;;  %v2829_v9 = vpop.f32.mrf.mxu3 }
 0x66b   : > { %v3099_v15 = vsub.f32 %v7110_v62, %v3062_v5  ;;  %v3100_v54 = vsub.f32 %v7114_v14, %v3062_v5  ;;  %v7219_v22 = vadd.f32 %v2829_v9, %v2780_v21  ;;  %v3137_v62 = vmul.f32 1.442695, %v3093_v48 }
 0x66c   : > { %v7221_v59 = vpop.eup %5090  ;;  %3307 = vmatmul.bf16.gmra.mxu2 %v3229_v38 }
 0x66d   : > { %v7224_v49 = vpop.eup %5092  ;;  %v3149_v19 = vmul.f32 1.442695, %v3099_v15  ;;  %v3151_v20 = vmul.f32 1.442695, %v3100_v54  ;;  %2100 = vadd.xlane.f32.xlu2 %v7793_v40  ;;  %3190 = vadd.xlane.f32.xlu0 %v3189_v8 }
 0x66e   : > { %v7229_v14 = vadd.f32 %v7224_v49, %v7221_v59  ;;  %3356 = vmatmul.bf16.gmra.mxu3 %v3230_v27 }
 0x66f   : > { %5094 = vpow2.f32 %v3149_v19 }
 0x670   : > { %5096 = vpow2.f32 %v3151_v20 }
 0x671   : > { %5098 = vpow2.f32 %v3141_v43  ;;  %v2782_v33 = vpop.f32.mrf.mxu2 }
 0x672   : > { %5100 = vpow2.f32 %v3143_v52  ;;  %v2831_v35 = vpop.f32.mrf.mxu3 }
 0x673   : > { %5102 = vpow2.f32 %v3137_v62  ;;  %v7231_v47 = vadd.f32 %v2831_v35, %v2782_v33 }
 0x674   : > { %5104 = vpow2.f32 %v3139_v28 }
 0x675   : > { %v5095_v26 = vpop.eup %5094  ;;  %2651 = vadd.xlane.f32.xlu2 %v6984_v16  ;;  %1489 = vadd.xlane.f32.xlu0 %v7794_v31 }
 0x676   : > { %v5097_v50 = vpop.eup %5096  ;;  %v3233_v33 = vpack.c.bf16 %v5095_v26, %v7221_v59 }
 0x677   : > { %v5099_v17 = vpop.eup %5098  ;;  %v7235_v44 = vadd.f32 %v5097_v50, %v5095_v26 }
 0x678   : > { %v5101_v61 = vpop.eup %5100 }
 0x679   : > { %v5103_v36 = vpop.eup %5102  ;;  %v3065_v39 = vpop.xlane.xlu0 %3064  ;;  %v3198_v9 = vadd.f32 %v5101_v61, %v5099_v17 }
 0x67a   : > { %v5105_v21 = vpop.eup %5104  ;;  %v3101_v0 = vsub.f32 %v7120_v42, %v3065_v39  ;;  %v3102_v5 = vsub.f32 %v7122_v63, %v3065_v39  ;;  %v3231_v54 = vpack.c.bf16 %v5099_v17, %v5103_v36 }
 0x67b   : > { %v3232_v16 = vpack.c.bf16 %v5101_v61, %v5105_v21  ;;  %v3195_v27 = vadd.f32 %v5105_v21, %v5103_v36  ;;  %v3234_v36 = vpack.c.bf16 %v5097_v50, %v7224_v49 }
 0x67c   : > { %v3153_v48 = vmul.f32 1.442695, %v3101_v0  ;;  %v3155_v15 = vmul.f32 1.442695, %v3102_v5  ;;  %3312 = vmatmul.bf16.gmra.mxu2 %v3231_v54 }
 0x67d   : > { %3199 = vadd.xlane.f32.xlu2 %v3198_v9  ;;  %2648 = vadd.xlane.f32.xlu0 %v6960_v29 }
 0x67e   : > { %5106 = vpow2.f32 %v3153_v48  ;;  %3361 = vmatmul.bf16.gmra.mxu3 %v3232_v16 }
 0x67f   : > { %5108 = vpow2.f32 %v3155_v15 }
 0x682   : > { %v3068_v46 = vpop.xlane.xlu1 %3067 }
 0x683   : > { %v3103_v38 = vsub.f32 %v7130_v11, %v3068_v46  ;;  %v3104_v8 = vsub.f32 %v7132_v53, %v3068_v46 }
 0x684   : > { %v5107_v42 = vpop.eup %5106  ;;  %v2785_v43 = vpop.f32.mrf.mxu2 }
 0x685   : > { %v5109_v63 = vpop.eup %5108  ;;  %v3157_v19 = vmul.f32 1.442695, %v3103_v38  ;;  %v3159_v20 = vmul.f32 1.442695, %v3104_v8  ;;  %v2834_v40 = vpop.f32.mrf.mxu3  ;;  %3196 = vadd.xlane.f32.xlu0 %v3195_v27 }
 0x686   : > { %v7242_v52 = vadd.f32 %v2834_v40, %v2785_v43  ;;  %v7244_v62 = vadd.f32 %v5109_v63, %v5107_v42 }
 0x687   : > { %5110 = vpow2.f32 %v3157_v19 }
 0x688   : > { %5112 = vpow2.f32 %v3159_v20 }
 0x68a   : > { %v3071_v29 = vpop.xlane.xlu0 %3070 }
 0x68b   : > { %v3105_v28 = vsub.f32 %v7138_v57, %v3071_v29  ;;  %v3106_v11 = vsub.f32 %v7140_v6, %v3071_v29 }
 0x68c   : > { %v2787_v53 = vpop.f32.mrf.mxu2  ;;  %3317 = vmatmul.bf16.gmra.mxu2 %v3233_v33  ;;  %v7795_v33 = vld [vmem:[#allocation32_spill] sm:$0xff] }
 0x68d   : > { %v5111_v35 = vpop.eup %5110  ;;  %v3161_v17 = vmul.f32 1.442695, %v3105_v28  ;;  %v3163_v31 = vmul.f32 1.442695, %v3106_v11  ;;  %v2836_v61 = vpop.f32.mrf.mxu3 }
 0x68e   : > { %v5113_v39 = vpop.eup %5112  ;;  %v7250_v21 = vadd.f32 %v2836_v61, %v2787_v53  ;;  %3366 = vmatmul.bf16.gmra.mxu3 %v3234_v36  ;;  %v3235_v46 = vpack.c.bf16 %v5111_v35, %v5107_v42  ;;  %v7797_v36 = vld [vmem:[#allocation31_spill] sm:$0xff] }
 0x68f   : > { %5114 = vpow2.f32 %v3161_v17  ;;  %v7252_v0 = vadd.f32 %v5113_v39, %v5111_v35  ;;  %v3236_v43 = vpack.c.bf16 %v5113_v39, %v5109_v63  ;;  %v7796_v35 = vld [vmem:[#allocation72_spill] sm:$0xff] }
 0x690   : > { %5116 = vpow2.f32 %v3163_v31  ;;  %v2254_v17 = vadd.f32 %v7796_v35, %v7795_v33 }
 0x692   : > { %v3074_v57 = vpop.xlane.xlu1 %3073 }
 0x693   : > { %v3107_v6 = vsub.f32 %v7144_v30, %v3074_v57  ;;  %v3108_v59 = vsub.f32 %v7146_v18, %v3074_v57 }
 0x695   : > { %v5115_v26 = vpop.eup %5114  ;;  %v3165_v5 = vmul.f32 1.442695, %v3107_v6  ;;  %v3167_v9 = vmul.f32 1.442695, %v3108_v59 }
 0x696   : > { %v5117_v48 = vpop.eup %5116 }
 0x697   : > { %5118 = vpow2.f32 %v3165_v5  ;;  %v7256_v49 = vadd.f32 %v5117_v48, %v5115_v26 }
 0x698   : > { %5120 = vpow2.f32 %v3167_v9 }
 0x69a   : > { %v2083_v50 = vpop.xlane.xlu1 %2082  ;;  %v3077_v15 = vpop.xlane.xlu0 %3076 }
 0x69b   : > { %v3109_v54 = vsub.f32 %v7155_v10, %v3077_v15  ;;  %v3110_v16 = vsub.f32 %v7158_v51, %v3077_v15 }
 0x69c   : > { %3322 = vmatmul.bf16.gmra.mxu2 %v3235_v46 }
 0x69d   : > { %v5119_v38 = vpop.eup %5118  ;;  %v3169_v8 = vmul.f32 1.442695, %v3109_v54  ;;  %v3171_v30 = vmul.f32 1.442695, %v3110_v16  ;;  %v2802_v54 = vadd.f32 %v7128_v45, %v7126_v56  ;;  %v7798_v56 = vld [vmem:[#allocation77_spill] sm:$0xff] }
 0x69e   : > { %v5121_v18 = vpop.eup %5120  ;;  %3371 = vmatmul.bf16.gmra.mxu3 %v3236_v43 }
 0x69f   : > { %5122 = vpow2.f32 %v3169_v8  ;;  %v7260_v19 = vadd.f32 %v5121_v18, %v5119_v38  ;;  %v3238_v5 = vpack.c.bf16 %v5121_v18, %v5117_v48 }
 0x6a0   : > { %5124 = vpow2.f32 %v3171_v30 }
 0x6a1   : > { %5126 = vrcp.f32 %v2083_v50 }
 0x6a2   : > { %v2086_v20 = vpop.xlane.xlu0 %2085  ;;  %v3080_v40 = vpop.xlane.xlu2 %3079 }
 0x6a3   : > { %5128 = vrcp.f32 %v2086_v20  ;;  %v2634_v27 = vpop.xlane.xlu1 %2633  ;;  %v3111_v10 = vsub.f32 %v7165_v34, %v3080_v40  ;;  %v3112_v51 = vsub.f32 %v7167_v23, %v3080_v40  ;;  %v3237_v23 = vpack.c.bf16 %v5119_v38, %v5115_v26 }
 0x6a5   : > { %v5123_v42 = vpop.eup %5122  ;;  %v3173_v29 = vmul.f32 1.442695, %v3111_v10  ;;  %v3175_v28 = vmul.f32 1.442695, %v3112_v51 }
 0x6a6   : > { %v5125_v63 = vpop.eup %5124 }
 0x6a7   : > { %v5127_v11 = vpop.eup %5126  ;;  %5130 = vpow2.f32 %v3173_v29  ;;  %v7264_v53 = vadd.f32 %v5125_v63, %v5123_v42 }
 0x6a8   : > { %5132 = vpow2.f32 %v3175_v28  ;;  %v2307_v39 = vmul.f32 %v5127_v11, %v7797_v36 }
 0x6a9   : > { %v5129_v31 = vpop.eup %5128  ;;  %5134 = vrcp.f32 %v2634_v27 }
 0x6aa   : > { %v2631_v61 = vpop.xlane.xlu2 %2630  ;;  %v2308_v57 = vmul.f32 %v5129_v31, %v2254_v17  ;;  %v3179_v20 = vpop.xlane.xlu0 %3178 }
 0x6ab   : > { %v7269_v34 = vpop.xlane.xlu1 %2088  ;;  %5136 = vrcp.f32 %v2631_v61 }
 0x6ac   : > { %v4753_v6 = vpack.i.bf16 %v2308_v57, %v2307_v39  ;;  %3327 = vmatmul.bf16.gmra.mxu2 %v3237_v23  ;;  %v7799_v23 = vld [vmem:[#allocation36_spill] sm:$0xff] }
 0x6ad   : > { %v5131_v59 = vpop.eup %5130 }
 0x6ae   : > { %v5133_v9 = vpop.eup %5132  ;;  %4754 = vrot.lane.b32.xlu1 %v4753_v6, %s5519_s2  ;;  %3376 = vmatmul.bf16.gmra.mxu3 %v3238_v5  ;;  %v3239_v43 = vpack.c.bf16 %v5131_v59, %v5123_v42  ;;  %v7801_v5 = vld [vmem:[#allocation79_spill] sm:$0xff] }
 0x6af   : > { %v7272_v50 = vadd.f32 %v5133_v9, %v5131_v59  ;;  %v5135_v15 = vpop.eup %5134  ;;  %v3240_v18 = vpack.c.bf16 %v5133_v9, %v5125_v63  ;;  %v7800_v59 = vld [vmem:[#allocation78_spill] sm:$0xff] }
 0x6b0   : > { %v2856_v8 = vmul.f32 %v5135_v15, %v2802_v54  ;;  %v2264_v9 = vadd.f32 %v7801_v5, %v7800_v59  ;;  %v7802_v54 = vld [vmem:[#allocation68_spill] sm:$0xff] }
 0x6b1   : > { %v5137_v16 = vpop.eup %5136 }
 0x6b2   : > { %v2855_v26 = vmul.f32 %v5137_v16, %v7108_v25  ;;  %v7283_v25 = vpop.xlane.xlu0 %2091 }
 0x6b3   : > { %v7276_v46 = vpop.xlane.xlu1 %2639 }
 0x6b4   : > { %v4758_v38 = vpack.i.bf16 %v2856_v8, %v2855_v26 }
 0x6b6   : > { %4759 = vrot.lane.b32.xlu0 %v4758_v38, %s5518_s1 }
 0x6b8   : > { %v3182_v48 = vpop.xlane.xlu2 %3181 }
 0x6bb   : > { %v2095_v30 = vpop.xlane.xlu1 %2094 }
 0x6bc   : > { %5138 = vrcp.f32 %v2095_v30  ;;  %3332 = vmatmul.bf16.gmra.mxu2 %v3239_v43  ;;  %v7803_v30 = vld [vmem:[#allocation37_spill] sm:$0xff] }
 0x6bd   : > { %5140 = vrcp.f32 %v3179_v20  ;;  %v7804_v20 = vld [vmem:[#allocation81_spill] sm:$0xff] }
 0x6be   : > { %3381 = vmatmul.bf16.gmra.mxu3 %v3240_v18  ;;  %5142 = vrcp.f32 %v3182_v48 }
 0x6c0   : > { %v2637_v40 = vpop.xlane.xlu2 %2636 }
 0x6c2   : > { %v5139_v27 = vpop.eup %5138 }
 0x6c3   : > { %v7281_v45 = vmul.f32 %v5139_v27, %v7798_v56  ;;  %v5141_v63 = vpop.eup %5140 }
 0x6c4   : > { %v5143_v17 = vpop.eup %5142 }
 0x6c7   : > { %v3298_v10 = vpop.f32.mrf.mxu2 }
 0x6c8   : > { %v3347_v51 = vpop.f32.mrf.mxu3  ;;  %v3188_v29 = vpop.xlane.xlu2 %3187 }
 0x6c9   : > { %v3348_v28 = vadd.f32 %v3347_v51, %v3298_v10 }
 0x6cb   : > { %v3403_v61 = vmul.f32 %v5141_v63, %v3348_v28 }
 0x6cf   : > { %v3300_v11 = vpop.f32.mrf.mxu2 }
 0x6d0   : > { %v3349_v33 = vpop.f32.mrf.mxu3  ;;  %v7285_v42 = vpop.xlane.xlu2 %2642 }
 0x6d1   : > { %v3350_v35 = vadd.f32 %v3349_v33, %v3300_v11  ;;  %v3185_v31 = vpop.xlane.xlu0 %3184 }
 0x6d3   : > { %v3404_v36 = vmul.f32 %v5143_v17, %v3350_v35  ;;  %v4468_v35 = vld [vmem:[#allocation10 + $0x38] sm:$0xff]  ;;  %v2817_v17 = vadd.f32 %v7189_v60, %v7186_v4  ;;  %v4466_v4 = vld [vmem:[#allocation10 + $0x28] sm:$0xff] }
 0x6d4   : > { %3737 = vmatpush.bf16.msra.mxu0 %v4468_v35  ;;  %v4463_v35 = vld [vmem:[#allocation10 + $0x10] sm:$0xff] }
 0x6d5   : > { %v4763_v39 = vpack.i.bf16 %v3404_v36, %v3403_v61 }
 0x6d7   : > { %4764 = vrot.lane.b32.xlu2 %v4763_v39, %s5517_s16 }
 0x6d8   : > { %v7288_v57 = vpop.xlane.xlu2 %3193  ;;  %1492 = vadd.xlane.f32.xlu1 %v7799_v23 }
 0x6d9   : > { %v2098_v6 = vpop.xlane.xlu0 %2097 }
 0x6da   : > { %5144 = vrcp.f32 %v2098_v6  ;;  %v2807_v6 = vadd.f32 %v7152_v1, %v7150_v3  ;;  %v4464_v3 = vld [vmem:[#allocation10 + $0x18] sm:$0xff] }
 0x6df   : > { %v3303_v8 = vpop.f32.mrf.mxu2 }
 0x6e0   : > { %v2101_v15 = vpop.xlane.xlu2 %2100  ;;  %2109 = vadd.xlane.f32.xlu1 %v7802_v54  ;;  %v5145_v16 = vpop.eup %5144  ;;  %1495 = vadd.xlane.f32.xlu0 %v7803_v30 }
 0x6e1   : > { %5146 = vrcp.f32 %v2101_v15  ;;  %v7294_v26 = vmul.f32 %v5145_v16, %v2264_v9  ;;  %v7296_v38 = vpop.xlane.xlu0 %3190  ;;  %v3352_v48 = vpop.f32.mrf.mxu3 }
 0x6e2   : > { %v3353_v5 = vadd.f32 %v3352_v48, %v3303_v8 }
 0x6e3   : > { %v4783_v43 = vpack.i.bf16 %v7294_v26, %v7281_v45  ;;  %v7819_v45 = vld [vmem:[#allocation54_spill] sm:$0xff]  ;;  %v7820_v26 = vld [vmem:[#allocation55_spill] sm:$0xff] }
 0x6e7   : > { %v5147_v18 = vpop.eup %5146  ;;  %v3305_v56 = vpop.f32.mrf.mxu2 }
 0x6e8   : > { %v7302_v27 = vmul.f32 %v5147_v18, %v7804_v20  ;;  %2657 = vadd.xlane.f32.xlu1 %v7002_v32  ;;  %2654 = vadd.xlane.f32.xlu0 %v7028_v13  ;;  %v2652_v28 = vpop.xlane.xlu2 %2651  ;;  %v4465_v20 = vld [vmem:[#allocation10 + $0x20] sm:$0xff] }
 0x6e9   : > { %v7305_v10 = vpop.xlane.xlu0 %1489  ;;  %v3354_v51 = vpop.f32.mrf.mxu3  ;;  %5148 = vrcp.f32 %v2652_v28 }
 0x6ef   : > { %v7309_v11 = vpop.f32.mrf.mxu2  ;;  %v5149_v32 = vpop.eup %5148 }
 0x6f0   : > { %3205 = vadd.xlane.f32.xlu1 %v7235_v44  ;;  %3202 = vadd.xlane.f32.xlu0 %v7229_v14  ;;  %v7319_v61 = vmul.f32 %v5149_v32, %v2817_v17  ;;  %v4467_v14 = vld [vmem:[#allocation10 + $0x30] sm:$0xff]  ;;  %v3200_v54 = vpop.xlane.xlu2 %3199 }
 0x6f1   : > { %v2649_v33 = vpop.xlane.xlu0 %2648  ;;  %v7311_v63 = vpop.f32.mrf.mxu3  ;;  %3738 = vmatpush.bf16.msra.mxu0 %v4467_v14 }
 0x6f2   : > { %5150 = vrcp.f32 %v2649_v33 }
 0x6f3   : > { %5152 = vrcp.f32 %v2637_v40 }
 0x6f4   : > { %5154 = vrcp.f32 %v7276_v46  ;;  %v3355_v46 = vadd.f32 %v3354_v51, %v3305_v56 }
 0x6f5   : > { %5156 = vrcp.f32 %v3188_v29  ;;  %3739 = vmatpush.bf16.msra.mxu0 %v4466_v4  ;;  %v4462_v4 = vld [vmem:[#allocation10 + $0x8] sm:$0xff] }
 0x6f6   : > { %5158 = vrcp.f32 %v3185_v31 }
 0x6f7   : > { %v7317_v44 = vpop.f32.mrf.mxu2  ;;  %5160 = vrcp.f32 %v3200_v54 }
 0x6f8   : > { %v5151_v13 = vpop.eup %5150 }
 0x6f9   : > { %v7322_v36 = vmul.f32 %v5151_v13, %v7181_v41  ;;  %v7324_v39 = vpop.f32.mrf.mxu3  ;;  %v5153_v23 = vpop.eup %5152  ;;  %v7805_v41 = vld [vmem:[#allocation64_spill] sm:$0xff]  ;;  %3740 = vmatpush.bf16.msra.mxu0 %v4465_v20 }
 0x6fa   : > { %v5155_v60 = vpop.eup %5154  ;;  %v2857_v59 = vmul.f32 %v5153_v23, %v7136_v7  ;;  %v3197_v18 = vpop.xlane.xlu0 %3196 }
 0x6fb   : > { %v4803_v40 = vpack.i.bf16 %v7319_v61, %v7322_v36  ;;  %v5157_v29 = vpop.eup %5156  ;;  %v2858_v15 = vmul.f32 %v5155_v60, %v2807_v6  ;;  %5162 = vrcp.f32 %v3197_v18  ;;  %v2646_v23 = vpop.xlane.xlu1 %2645  ;;  %v7806_v60 = vld [vmem:[#allocation33_spill] sm:$0xff] }
 0x6fc   : > { %v3406_v30 = vmul.f32 %v5157_v29, %v3355_v46  ;;  %v5159_v31 = vpop.eup %5158  ;;  %5164 = vrcp.f32 %v7283_v25  ;;  %v7807_v46 = vld [vmem:[#allocation75_spill] sm:$0xff] }
 0x6fd   : > { %v4773_v28 = vpack.i.bf16 %v2858_v15, %v2857_v59  ;;  %v3405_v56 = vmul.f32 %v5159_v31, %v3353_v5  ;;  %3741 = vmatpush.bf16.msra.mxu0 %v4464_v3  ;;  %v5161_v51 = vpop.eup %5160  ;;  %5166 = vrcp.f32 %v7269_v34  ;;  %v2259_v6 = vadd.f32 %v7807_v46, %v7806_v60  ;;  %v7808_v5 = vld [vmem:[#allocation74_spill] sm:$0xff]  ;;  %v7809_v31 = vld [vmem:[#allocation51_spill] sm:$0xff] }
 0x6ff   : > { %v3313_v9 = vpop.f32.mrf.mxu2  ;;  %v4778_v7 = vpack.i.bf16 %v3406_v30, %v3405_v56 }
 0x700   : > { %2106 = vadd.xlane.f32.xlu2 %v7805_v41  ;;  %v4461_v41 = vld [vmem:[#allocation10] sm:$0xff] }
 0x701   : > { %v3362_v16 = vpop.f32.mrf.mxu3  ;;  %v5163_v32 = vpop.eup %5162  ;;  %3742 = vmatpush.bf16.msra.mxu0 %v4463_v35  ;;  %v7812_v35 = vld [vmem:[#allocation39_spill] sm:$0xff] }
 0x702   : > { %v3363_v1 = vadd.f32 %v3362_v16, %v3313_v9  ;;  %v5165_v14 = vpop.eup %5164 }
 0x703   : > { %v5167_v59 = vpop.eup %5166  ;;  %v2310_v34 = vmul.f32 %v5165_v14, %v2259_v6  ;;  %v1487_v15 = vpop.xlane.xlu1 %1486 }
 0x704   : > { %4774 = vrot.lane.b32.xlu0 %v4773_v28, %s5518_s1  ;;  %v7336_v17 = vmul.f32 %v5163_v32, %v3363_v1  ;;  %v2309_v9 = vmul.f32 %v5167_v59, %v7808_v5  ;;  %5168 = vrcp.f32 %v1487_v15  ;;  %v7810_v28 = vld [vmem:[#allocation52_spill] sm:$0xff]  ;;  %v7816_v15 = vld [vmem:[#allocation73_spill] sm:$0xff] }
 0x705   : > { %3743 = vmatpush.bf16.msra.mxu0 %v4462_v4  ;;  %5170 = vrcp.f32 %v7305_v10  ;;  %v1706_v56 = vadd.f32 %v7810_v28, %v7809_v31  ;;  %v7813_v59 = vld [vmem:[#allocation28_spill] sm:$0xff] }
 0x706   : > { %v4768_v29 = vpack.i.bf16 %v2310_v34, %v2309_v9  ;;  %v7814_v9 = vld [vmem:[#allocation94_spill] sm:$0xff]  ;;  %5172 = vrcp.f32 %v7285_v42  ;;  %v2812_v42 = vadd.f32 %v7175_v37, %v7173_v12 }
 0x707   : > { %v3315_v8 = vpop.f32.mrf.mxu2  ;;  %5174 = vrcp.f32 %v2646_v23  ;;  %v7817_v23 = vld [vmem:[#allocation102_spill] sm:$0xff] }
 0x708   : > { %5176 = vrcp.f32 %v7288_v57 }
 0x709   : > { %4779 = vrot.lane.b32.xlu1 %v4778_v7, %s5517_s16  ;;  %v3364_v48 = vpop.f32.mrf.mxu3  ;;  %3744 = vmatpush.bf16.msra.mxu0 %v4461_v41  ;;  %5178 = vrcp.f32 %v7296_v38 }
 0x70a   : > { %v3365_v33 = vadd.f32 %v3364_v48, %v3315_v8  ;;  %v5169_v30 = vpop.eup %5168  ;;  %v7811_v48 = vld [vmem:[#allocation50_spill] sm:$0xff] }
 0x70b   : > { %v7346_v54 = vpop.xlane.xlu1 %2103  ;;  %v5171_v20 = vpop.eup %5170 }
 0x70c   : > { %v7338_v13 = vmul.f32 %v5161_v51, %v3365_v33  ;;  %v1759_v51 = vmul.f32 %v5169_v30, %v7811_v48  ;;  %v1760_v33 = vmul.f32 %v5171_v20, %v1706_v56  ;;  %v5173_v30 = vpop.eup %5172 }
 0x70d   : > { %v5175_v20 = vpop.eup %5174  ;;  %v2859_v31 = vmul.f32 %v5173_v30, %v7817_v23 }
 0x70e   : > { %v4808_v25 = vpack.i.bf16 %v7338_v13, %v7336_v17  ;;  %v2860_v38 = vmul.f32 %v5175_v20, %v2812_v42 }
 0x718   : > { %4769 = vrot.lane.b32.xlu2 %v4768_v29, %s5519_s2  ;;  %v7815_v29 = vld [vmem:[#allocation38_spill] sm:$0xff] }
 0x720   : > { %v4755_v16 = vpop.permute.xlu1 %4754 }
 0x721   : > { %v4757_v3 = vunpack.i.h.bf16 %v4755_v16  ;;  %v4756_v7 = vunpack.i.l.bf16 %v4755_v16  ;;  %v3360_v16 = vadd.f32 %v7324_v39, %v7317_v44  ;;  %v4788_v44 = vpack.i.bf16 %v2860_v38, %v2859_v31  ;;  %v7824_v31 = vld [vmem:[#allocation84_spill] sm:$0xff] }
 0x723   : > { %v3611_v10 = vsel %vm1218_vm0, %v1759_v51, %v4756_v7  ;;  %v3612_v14 = vsel %vm1218_vm0, %v1760_v33, %v4757_v3  ;;  %v7818_v3 = vld [vmem:[#allocation95_spill] sm:$0xff] }
 0x728   : > { %v4760_v18 = vpop.permute.xlu0 %4759 }
 0x729   : > { %v4762_v1 = vunpack.i.h.bf16 %v4760_v18  ;;  %v4761_v8 = vunpack.i.l.bf16 %v4760_v18 }
 0x72b   : > { %v3629_v46 = vsel %vm3627_vm1, %v3612_v14, %v4762_v1  ;;  %v3628_v6 = vsel %vm3627_vm1, %v3611_v10, %v4761_v8  ;;  %v3318_v1 = vpop.f32.mrf.mxu2  ;;  %v3367_v8 = vpop.f32.mrf.mxu3 }
 0x72e   : > { %1501 = vadd.xlane.f32.xlu0 %v7812_v35 }
 0x731   : > { %v4765_v32 = vpop.permute.xlu2 %4764 }
 0x732   : > { %v4767_v4 = vunpack.i.h.bf16 %v4765_v32  ;;  %v4766_v60 = vunpack.i.l.bf16 %v4765_v32 }
 0x733   : > { %2112 = vadd.xlane.f32.xlu1 %v7813_v59  ;;  %v3320_v10 = vpop.f32.mrf.mxu2  ;;  %v3369_v14 = vpop.f32.mrf.mxu3 }
 0x734   : > { %v3646_v34 = vsel %vm3644_vm2, %v3629_v46, %v4767_v4  ;;  %v3645_v41 = vsel %vm3644_vm2, %v3628_v6, %v4766_v60  ;;  %v3370_v60 = vadd.f32 %v3369_v14, %v3320_v10  ;;  %v3368_v46 = vadd.f32 %v3367_v8, %v3318_v1 }
 0x735   : > { %v3661_v5 = vpack.c.bf16 %v3646_v34, %v3645_v41 }
 0x736   : > { %2663 = vadd.xlane.f32.xlu0 %v7814_v9 }
 0x737   : > { %3745 = vmatmul.bf16.vlgmr.msra.gmra.mxu0 %v3661_v5 }
 0x73b   : > { %3211 = vadd.xlane.f32.xlu1 %v7252_v0  ;;  %v5177_v0 = vpop.eup %5176 }
 0x73c   : > { %v3408_v57 = vmul.f32 %v5177_v0, %v3360_v16  ;;  %v5179_v28 = vpop.eup %5178  ;;  %v7822_v16 = vld [vmem:[#allocation86_spill] sm:$0xff]  ;;  %v7823_v0 = vld [vmem:[#allocation53_spill] sm:$0xff] }
 0x73e   : > { %3208 = vadd.xlane.f32.xlu0 %v7244_v62  ;;  %v3358_v62 = vadd.f32 %v7311_v63, %v7309_v11 }
 0x740   : > { %v3407_v56 = vmul.f32 %v5179_v28, %v3358_v62 }
 0x741   : > { %1498 = vadd.xlane.f32.xlu2 %v7815_v29 }
 0x742   : > { %v4793_v7 = vpack.i.bf16 %v3408_v57, %v3407_v56 }
 0x749   : > { %2115 = vadd.xlane.f32.xlu2 %v7816_v15  ;;  %v7821_v15 = vld [vmem:[#allocation85_spill] sm:$0xff] }
 0x74a   : > { %v2274_v30 = vadd.f32 %v7822_v16, %v7821_v15 }
 0x74b   : > { %v1493_v18 = vpop.xlane.xlu1 %1492 }
 0x751   : > { %2660 = vadd.xlane.f32.xlu2 %v7818_v3 }
 0x752   : > { %4789 = vrot.lane.b32.xlu0 %v4788_v44, %s5518_s1 }
 0x753   : > { %v2110_v39 = vpop.xlane.xlu1 %2109  ;;  %v1496_v11 = vpop.xlane.xlu0 %1495 }
 0x754   : > { %4794 = vrot.lane.b32.xlu1 %v4793_v7, %s5517_s16 }
 0x75b   : > { %v2658_v63 = vpop.xlane.xlu1 %2657  ;;  %v2655_v12 = vpop.xlane.xlu0 %2654 }
 0x75c   : > { %5180 = vrcp.f32 %v2658_v63 }
 0x75d   : > { %5182 = vrcp.f32 %v2655_v12  ;;  %v7825_v12 = vld [vmem:[#allocation41_spill] sm:$0xff] }
 0x762   : > { %v5181_v37 = vpop.eup %5180 }
 0x763   : > { %v7379_v48 = vmul.f32 %v5181_v37, %v7200_v24  ;;  %v3206_v51 = vpop.xlane.xlu1 %3205  ;;  %v5183_v33 = vpop.eup %5182  ;;  %v7826_v37 = vld [vmem:[#allocation30_spill] sm:$0xff] }
 0x764   : > { %5184 = vrcp.f32 %v3206_v51  ;;  %v7382_v35 = vmul.f32 %v5183_v33, %v7192_v2  ;;  %v3203_v32 = vpop.xlane.xlu0 %3202 }
 0x765   : > { %5186 = vrcp.f32 %v3203_v32 }
 0x766   : > { %v4818_v4 = vpack.i.bf16 %v7379_v48, %v7382_v35  ;;  %5188 = vrcp.f32 %v1493_v18 }
 0x767   : > { %5190 = vrcp.f32 %v2110_v39 }
 0x768   : > { %5192 = vrcp.f32 %v1496_v11 }
 0x769   : > { %4784 = vrot.lane.b32.xlu2 %v4783_v43, %s5519_s2  ;;  %v1711_v43 = vadd.f32 %v7820_v26, %v7819_v45  ;;  %v7831_v45 = vld [vmem:[#allocation29_spill] sm:$0xff]  ;;  %v7434_v26 = vld [vmem:[%s7635_s4] ss:$0 sm:$0xff] }
 0x76a   : > { %v5185_v24 = vpop.eup %5184 }
 0x76b   : > { %v7390_v6 = vmul.f32 %v5185_v24, %v3370_v60  ;;  %v5187_v59 = vpop.eup %5186  ;;  %v7827_v60 = vld [vmem:[#allocation97_spill] sm:$0xff] }
 0x76c   : > { %v7392_v2 = vmul.f32 %v5187_v59, %v3368_v46  ;;  %v5189_v5 = vpop.eup %5188  ;;  %v7828_v46 = vld [vmem:[#allocation82_spill] sm:$0xff]  ;;  %v7829_v59 = vld [vmem:[#allocation83_spill] sm:$0xff] }
 0x76d   : > { %v5191_v9 = vpop.eup %5190  ;;  %v1761_v42 = vmul.f32 %v5189_v5, %v7823_v0  ;;  %v7830_v5 = vld [vmem:[#allocation40_spill] sm:$0xff] }
 0x76e   : > { %v4823_v34 = vpack.i.bf16 %v7390_v6, %v7392_v2  ;;  %v5193_v29 = vpop.eup %5192  ;;  %v7401_v23 = vmul.f32 %v5191_v9, %v2274_v30 }
 0x76f   : > { %v1762_v18 = vmul.f32 %v5193_v29, %v1711_v43 }
 0x773   : > { %v2107_v41 = vpop.xlane.xlu2 %2106 }
 0x774   : > { %5194 = vrcp.f32 %v2107_v41  ;;  %v2269_v41 = vadd.f32 %v7829_v59, %v7828_v46  ;;  %v7839_v59 = vld [vmem:[#allocation101_spill] sm:$0xff] }
 0x775   : > { %5196 = vrcp.f32 %v7346_v54 }
 0x776   : > { %v4775_v62 = vpop.permute.xlu0 %4774 }
 0x777   : > { %v4777_v39 = vunpack.i.h.bf16 %v4775_v62  ;;  %v4776_v11 = vunpack.i.l.bf16 %v4775_v62 }
 0x77a   : > { %v5195_v20 = vpop.eup %5194 }
 0x77b   : > { %v7404_v57 = vmul.f32 %v5195_v20, %v7824_v31  ;;  %v4770_v28 = vpop.permute.xlu2 %4769  ;;  %v4780_v38 = vpop.permute.xlu1 %4779  ;;  %v7834_v31 = vld [vmem:[#allocation76_spill] sm:$0xff] }
 0x77c   : > { %v4772_v56 = vunpack.i.h.bf16 %v4770_v28  ;;  %v4771_v3 = vunpack.i.l.bf16 %v4770_v28  ;;  %v4782_v7 = vunpack.i.h.bf16 %v4780_v38  ;;  %v4781_v44 = vunpack.i.l.bf16 %v4780_v38  ;;  %1507 = vadd.xlane.f32.xlu0 %v7825_v12  ;;  %v5197_v24 = vpop.eup %5196 }
 0x77d   : > { %v4813_v63 = vpack.i.bf16 %v7401_v23, %v7404_v57  ;;  %v2314_v9 = vmul.f32 %v5197_v24, %v2269_v41 }
 0x77e   : > { %v3614_v1 = vsel %vm1218_vm0, %v1762_v18, %v4772_v56  ;;  %v3613_v8 = vsel %vm1218_vm0, %v1761_v42, %v4771_v3  ;;  %2118 = vadd.xlane.f32.xlu1 %v7826_v37  ;;  %v7835_v56 = vld [vmem:[#allocation58_spill] sm:$0xff]  ;;  %v7836_v3 = vld [vmem:[#allocation59_spill] sm:$0xff] }
 0x77f   : > { %v3630_v51 = vsel %vm3627_vm1, %v3613_v8, %v4776_v11  ;;  %v3631_v33 = vsel %vm3627_vm1, %v3614_v1, %v4777_v39  ;;  %v4798_v29 = vpack.i.bf16 %v2314_v9, %v7302_v27  ;;  %v7838_v8 = vld [vmem:[#allocation56_spill] sm:$0xff] }
 0x780   : > { %v3647_v32 = vsel %vm3644_vm2, %v3630_v51, %v4781_v44  ;;  %v3648_v10 = vsel %vm3644_vm2, %v3631_v33, %v4782_v7  ;;  %v1716_v7 = vadd.f32 %v7836_v3, %v7835_v56 }
 0x781   : > { %v3662_v14 = vpack.c.bf16 %v3648_v10, %v3647_v32 }
 0x783   : > { %3750 = vmatmul.bf16.gmra.mxu0 %v3662_v14 }
 0x784   : > { %2666 = vadd.xlane.f32.xlu0 %v7827_v60 }
 0x78c   : > { %3214 = vadd.xlane.f32.xlu0 %v7256_v49  ;;  %v7832_v49 = vld [vmem:[#allocation96_spill] sm:$0xff] }
 0x792   : > { %1504 = vadd.xlane.f32.xlu2 %v7830_v5 }
 0x797   : > { %4799 = vrot.lane.b32.xlu1 %v4798_v29, %s5519_s2  ;;  %v7840_v29 = vld [vmem:[#allocation100_spill] sm:$0xff] }
 0x79a   : > { %2121 = vadd.xlane.f32.xlu2 %v7831_v45  ;;  %v7841_v45 = vld [vmem:[#allocation80_spill] sm:$0xff] }
 0x7a0   : > { %4804 = vrot.lane.b32.xlu0 %v4803_v40, %s5518_s1  ;;  %v7833_v40 = vld [vmem:[#allocation42_spill] sm:$0xff] }
 0x7a1   : > { %v1502_v54 = vpop.xlane.xlu0 %1501 }
 0x7a2   : > { %2669 = vadd.xlane.f32.xlu2 %v7832_v49  ;;  %5198 = vrcp.f32 %v1502_v54  ;;  %v7842_v54 = vld [vmem:[#allocation88_spill] sm:$0xff] }
 0x7a6   : > { %v2113_v30 = vpop.xlane.xlu1 %2112 }
 0x7a8   : > { %v5199_v42 = vpop.eup %5198 }
 0x7a9   : > { %v2664_v16 = vpop.xlane.xlu0 %2663  ;;  %v1764_v1 = vmul.f32 %v5199_v42, %v1716_v7 }
 0x7aa   : > { %3217 = vadd.xlane.f32.xlu2 %v7260_v19  ;;  %5200 = vrcp.f32 %v2664_v16 }
 0x7ae   : > { %v3212_v62 = vpop.xlane.xlu1 %3211 }
 0x7b0   : > { %v5201_v18 = vpop.eup %5200 }
 0x7b1   : > { %v3209_v19 = vpop.xlane.xlu0 %3208  ;;  %v2866_v39 = vmul.f32 %v5201_v18, %v7211_v58 }
 0x7b4   : > { %v1499_v27 = vpop.xlane.xlu2 %1498  ;;  %v3746_v43 = vpop.f32.mrf.mxu0 }
 0x7b5   : > { %v3747_v15 = vadd.f32 %v7434_v26, %v3746_v43  ;;  %5202 = vrcp.f32 %v1499_v27  ;;  %v7843_v27 = vld [vmem:[#allocation89_spill] sm:$0xff] }
 0x7b6   : > { %v2279_v43 = vadd.f32 %v7843_v27, %v7842_v54 }
 0x7b7   : > { %3786 = vst [vmem:[%s5721_s8] sm:$0xff] %v3747_v15  ;;  %v7844_v15 = vld [vmem:[#allocation87_spill] sm:$0xff] }
 0x7bb   : > { %v5203_v28 = vpop.eup %5202 }
 0x7bc   : > { %v2116_v20 = vpop.xlane.xlu2 %2115  ;;  %v3748_v61 = vpop.f32.mrf.mxu0  ;;  %v1763_v12 = vmul.f32 %v5203_v28, %v7838_v8 }
 0x7bd   : > { %v3749_v36 = vadd.f32 %v7434_v26, %v3748_v61 }
 0x7bf   : > { %3787 = vst [vmem:[%s5721_s8 + $0x8] sm:$0xff] %v3749_v36 }
 0x7c1   : > { %1510 = vadd.xlane.f32.xlu1 %v7833_v40 }
 0x7c2   : > { %4809 = vrot.lane.b32.xlu2 %v4808_v25, %s5517_s16  ;;  %v7837_v25 = vld [vmem:[#allocation43_spill] sm:$0xff] }
 0x7c4   : > { %v2661_v0 = vpop.xlane.xlu2 %2660  ;;  %v4790_v44 = vpop.permute.xlu0 %4789 }
 0x7c5   : > { %5204 = vrcp.f32 %v2661_v0  ;;  %v4792_v33 = vunpack.i.h.bf16 %v4790_v44  ;;  %v4791_v32 = vunpack.i.l.bf16 %v4790_v44 }
 0x7c6   : > { %v4795_v13 = vpop.permute.xlu1 %4794  ;;  %5206 = vrcp.f32 %v2116_v20  ;;  %v3372_v20 = vpop.f32.mrf.mxu3 }
 0x7c7   : > { %v4797_v14 = vunpack.i.h.bf16 %v4795_v13  ;;  %v4796_v60 = vunpack.i.l.bf16 %v4795_v13  ;;  %5208 = vrcp.f32 %v2113_v30  ;;  %v3323_v30 = vpop.f32.mrf.mxu2 }
 0x7c8   : > { %5210 = vrcp.f32 %v3209_v19  ;;  %v3373_v2 = vadd.f32 %v3372_v20, %v3323_v30  ;;  %v7851_v20 = vld [vmem:[#allocation90_spill] sm:$0xff] }
 0x7c9   : > { %2127 = vadd.xlane.f32.xlu1 %v7834_v31  ;;  %5212 = vrcp.f32 %v3212_v62 }
 0x7ca   : > { %1513 = vadd.xlane.f32.xlu0 %v7837_v25 }
 0x7cb   : > { %v5205_v38 = vpop.eup %5204 }
 0x7cc   : > { %v2865_v17 = vmul.f32 %v5205_v38, %v7205_v55  ;;  %v4785_v11 = vpop.permute.xlu2 %4784  ;;  %v5207_v49 = vpop.eup %5206 }
 0x7cd   : > { %v4787_v37 = vunpack.i.h.bf16 %v4785_v11  ;;  %v4786_v51 = vunpack.i.l.bf16 %v4785_v11 }
 0x7ce   : > { %v4833_v10 = vpack.i.bf16 %v2866_v39, %v2865_v17  ;;  %v3374_v36 = vpop.f32.mrf.mxu3 }
 0x7cf   : > { %v3616_v24 = vsel %vm1218_vm0, %v1764_v1, %v4787_v37  ;;  %v3615_v58 = vsel %vm1218_vm0, %v1763_v12, %v4786_v51 }
 0x7d0   : > { %v3632_v55 = vsel %vm3627_vm1, %v3615_v58, %v4791_v32  ;;  %v3633_v46 = vsel %vm3627_vm1, %v3616_v24, %v4792_v33  ;;  %v7846_v33 = vld [vmem:[#allocation61_spill] sm:$0xff]  ;;  %v7847_v32 = vld [vmem:[#allocation62_spill] sm:$0xff] }
 0x7d1   : > { %2675 = vadd.xlane.f32.xlu1 %v7839_v59  ;;  %v3649_v41 = vsel %vm3644_vm2, %v3632_v55, %v4796_v60  ;;  %v3650_v5 = vsel %vm3644_vm2, %v3633_v46, %v4797_v14  ;;  %v7848_v14 = vld [vmem:[#allocation60_spill] sm:$0xff]  ;;  %v7849_v59 = vld [vmem:[#allocation91_spill] sm:$0xff] }
 0x7d2   : > { %v3663_v9 = vpack.c.bf16 %v3650_v5, %v3649_v41  ;;  %2672 = vadd.xlane.f32.xlu0 %v7840_v29  ;;  %v7850_v41 = vld [vmem:[#allocation92_spill] sm:$0xff] }
 0x7d3   : > { %v2284_v5 = vadd.f32 %v7850_v41, %v7849_v59 }
 0x7d4   : > { %3755 = vmatmul.bf16.gmra.mxu0 %v3663_v9 }
 0x7d6   : > { %v3377_v51 = vpop.f32.mrf.mxu3 }
 0x7d9   : > { %3223 = vadd.xlane.f32.xlu1 %v7272_v50  ;;  %v5209_v50 = vpop.eup %5208 }
 0x7da   : > { %3220 = vadd.xlane.f32.xlu0 %v7264_v53  ;;  %v2318_v53 = vmul.f32 %v5207_v49, %v2279_v43  ;;  %v2317_v16 = vmul.f32 %v5209_v50, %v7844_v15  ;;  %v5211_v35 = vpop.eup %5210 }
 0x7db   : > { %v3413_v19 = vmul.f32 %v5211_v35, %v3373_v2 }
 0x7dc   : > { %v4828_v61 = vpack.i.bf16 %v2318_v53, %v2317_v16 }
 0x7de   : > { %v3379_v35 = vpop.f32.mrf.mxu3 }
 0x7eb   : > { %2124 = vadd.xlane.f32.xlu2 %v7841_v45 }
 0x7ee   : > { %4819 = vrot.lane.b32.xlu0 %v4818_v4, %s5518_s1  ;;  %v3325_v4 = vpop.f32.mrf.mxu2 }
 0x7ef   : > { %v3375_v40 = vadd.f32 %v3374_v36, %v3325_v4  ;;  %v1508_v62 = vpop.xlane.xlu0 %1507  ;;  %v7852_v4 = vld [vmem:[#allocation44_spill] sm:$0xff] }
 0x7f1   : > { %v2119_v7 = vpop.xlane.xlu1 %2118 }
 0x7f2   : > { %4824 = vrot.lane.b32.xlu1 %v4823_v34, %s5517_s16  ;;  %v5213_v34 = vpop.eup %5212 }
 0x7f3   : > { %v3414_v42 = vmul.f32 %v5213_v34, %v3375_v40 }
 0x7f5   : > { %v4838_v31 = vpack.i.bf16 %v3414_v42, %v3413_v19 }
 0x7f6   : > { %v3328_v37 = vpop.f32.mrf.mxu2 }
 0x7f7   : > { %v2667_v56 = vpop.xlane.xlu0 %2666  ;;  %v3378_v40 = vadd.f32 %v3377_v51, %v3328_v37  ;;  %v7856_v51 = vld [vmem:[#allocation99_spill] sm:$0xff] }
 0x7f8   : > { %5214 = vrcp.f32 %v2667_v56 }
 0x7fa   : > { %4829 = vrot.lane.b32.xlu1 %v4828_v61, %s5519_s2 }
 0x7fe   : > { %v5215_v57 = vpop.eup %5214 }
 0x7ff   : > { %v3215_v23 = vpop.xlane.xlu0 %3214  ;;  %v2867_v39 = vmul.f32 %v5215_v57, %v7219_v22 }
 0x800   : > { %v3751_v48 = vpop.f32.mrf.mxu0 }
 0x801   : > { %v3752_v6 = vadd.f32 %v7434_v26, %v3751_v48  ;;  %v3330_v48 = vpop.f32.mrf.mxu2 }
 0x802   : > { %4834 = vrot.lane.b32.xlu1 %v4833_v10, %s5518_s1  ;;  %v1721_v10 = vadd.f32 %v7847_v32, %v7846_v33  ;;  %v3380_v2 = vadd.f32 %v3379_v35, %v3330_v48  ;;  %v7857_v33 = vld [vmem:[#allocation98_spill] sm:$0xff] }
 0x803   : > { %3788 = vst [vmem:[%s5721_s8 + $0x10] sm:$0xff] %v3752_v6  ;;  %4814 = vrot.lane.b32.xlu2 %v4813_v63, %s5519_s2  ;;  %v7845_v63 = vld [vmem:[#allocation45_spill] sm:$0xff]  ;;  %v2289_v32 = vadd.f32 %v7857_v33, %v7856_v51 }
 0x805   : > { %v1505_v0 = vpop.xlane.xlu2 %1504 }
 0x808   : > { %v3753_v18 = vpop.f32.mrf.mxu0 }
 0x809   : > { %v3754_v28 = vadd.f32 %v7434_v26, %v3753_v18  ;;  %v4800_v11 = vpop.permute.xlu1 %4799  ;;  %v7854_v18 = vld [vmem:[#allocation46_spill] sm:$0xff] }
 0x80a   : > { %4839 = vrot.lane.b32.xlu1 %v4838_v31, %s5517_s16  ;;  %v4802_v24 = vunpack.i.h.bf16 %v4800_v11 }
 0x80b   : > { %3789 = vst [vmem:[%s5721_s8 + $0x18] sm:$0xff] %v3754_v28 }
 0x80d   : > { %v2122_v38 = vpop.xlane.xlu2 %2121 }
 0x812   : > { %v4805_v8 = vpop.permute.xlu0 %4804 }
 0x813   : > { %v4807_v58 = vunpack.i.h.bf16 %v4805_v8  ;;  %v4806_v22 = vunpack.i.l.bf16 %v4805_v8 }
 0x815   : > { %v2670_v3 = vpop.xlane.xlu2 %2669 }
 0x816   : > { %5216 = vrcp.f32 %v2670_v3 }
 0x817   : > { %5218 = vrcp.f32 %v1505_v0  ;;  %v7853_v0 = vld [vmem:[#allocation47_spill] sm:$0xff] }
 0x818   : > { %1519 = vadd.xlane.f32.xlu0 %v7845_v63  ;;  %5220 = vrcp.f32 %v1508_v62 }
 0x819   : > { %5222 = vrcp.f32 %v2122_v38 }
 0x81a   : > { %5224 = vrcp.f32 %v2119_v7 }
 0x81c   : > { %v5217_v44 = vpop.eup %5216 }
 0x81d   : > { %v2868_v17 = vmul.f32 %v5217_v44, %v7231_v47  ;;  %v3218_v13 = vpop.xlane.xlu2 %3217  ;;  %v5219_v25 = vpop.eup %5218  ;;  %v4801_v47 = vunpack.i.l.bf16 %v4800_v11 }
 0x81e   : > { %v5221_v12 = vpop.eup %5220  ;;  %v1765_v60 = vmul.f32 %v5219_v25, %v7848_v14  ;;  %5226 = vrcp.f32 %v3218_v13 }
 0x81f   : > { %v4848_v1 = vpack.i.bf16 %v2868_v17, %v2867_v39  ;;  %v1766_v55 = vmul.f32 %v5221_v12, %v1721_v10  ;;  %v5223_v46 = vpop.eup %5222  ;;  %5228 = vrcp.f32 %v3215_v23  ;;  %v3333_v10 = vpop.f32.mrf.mxu2 }
 0x820   : > { %v3617_v45 = vsel %vm1218_vm0, %v1765_v60, %v4801_v47  ;;  %v5225_v27 = vpop.eup %5224  ;;  %v2320_v53 = vmul.f32 %v5223_v46, %v2284_v5  ;;  %v7858_v60 = vld [vmem:[#allocation65_spill] sm:$0xff] }
 0x821   : > { %v3618_v29 = vsel %vm1218_vm0, %v1766_v55, %v4802_v24  ;;  %v3634_v50 = vsel %vm3627_vm1, %v3617_v45, %v4806_v22  ;;  %v2319_v61 = vmul.f32 %v5225_v27, %v7851_v20  ;;  %v7859_v24 = vld [vmem:[#allocation66_spill] sm:$0xff]  ;;  %v3382_v22 = vpop.f32.mrf.mxu3  ;;  %v7860_v46 = vld [vmem:[#allocation93_spill] sm:$0xff] }
 0x822   : > { %v3635_v43 = vsel %vm3627_vm1, %v3618_v29, %v4807_v58  ;;  %v1726_v58 = vadd.f32 %v7859_v24, %v7858_v60 }
 0x823   : > { %v4843_v36 = vpack.i.bf16 %v2320_v53, %v2319_v61 }
 0x824   : > { %v5227_v6 = vpop.eup %5226 }
 0x825   : > { %v4810_v9 = vpop.permute.xlu2 %4809  ;;  %v5229_v34 = vpop.eup %5228  ;;  %v3416_v19 = vmul.f32 %v5227_v6, %v3380_v2 }
 0x826   : > { %v4812_v49 = vunpack.i.h.bf16 %v4810_v9  ;;  %v4811_v54 = vunpack.i.l.bf16 %v4810_v9  ;;  %v3415_v62 = vmul.f32 %v5229_v34, %v3378_v40  ;;  %v7861_v9 = vld [vmem:[#allocation63_spill] sm:$0xff]  ;;  %v3383_v40 = vadd.f32 %v3382_v22, %v3333_v10 }
 0x828   : > { %v3651_v15 = vsel %vm3644_vm2, %v3634_v50, %v4811_v54  ;;  %v3652_v16 = vsel %vm3644_vm2, %v3635_v43, %v4812_v49  ;;  %v4853_v31 = vpack.i.bf16 %v3416_v19, %v3415_v62 }
 0x829   : > { %v3664_v30 = vpack.c.bf16 %v3652_v16, %v3651_v15  ;;  %v3384_v6 = vpop.f32.mrf.mxu3 }
 0x82b   : > { %3760 = vmatmul.bf16.gmra.mxu0 %v3664_v30 }
 0x82c   : > { %1516 = vadd.xlane.f32.xlu2 %v7852_v4  ;;  %4844 = vrot.lane.b32.xlu0 %v4843_v36, %s5519_s2  ;;  %v3335_v36 = vpop.f32.mrf.mxu2 }
 0x82d   : > { %v3385_v19 = vadd.f32 %v3384_v6, %v3335_v36 }
 0x834   : > { %1525 = vadd.xlane.f32.xlu2 %v7853_v0  ;;  %v1511_v42 = vpop.xlane.xlu1 %1510  ;;  %1522 = vadd.xlane.f32.xlu1 %v7854_v18 }
 0x835   : > { %4854 = vrot.lane.b32.xlu0 %v4853_v31, %s5517_s16 }
 0x83c   : > { %v2128_v28 = vpop.xlane.xlu1 %2127 }
 0x83d   : > { %v1514_v38 = vpop.xlane.xlu0 %1513 }
 0x844   : > { %v2676_v56 = vpop.xlane.xlu1 %2675 }
 0x845   : > { %5230 = vrcp.f32 %v2676_v56  ;;  %v2673_v3 = vpop.xlane.xlu0 %2672 }
 0x846   : > { %5232 = vrcp.f32 %v2673_v3 }
 0x847   : > { %5234 = vrcp.f32 %v1511_v42  ;;  %v7862_v42 = vld [vmem:[#allocation48_spill] sm:$0xff] }
 0x848   : > { %5236 = vrcp.f32 %v2128_v28 }
 0x849   : > { %5238 = vrcp.f32 %v1514_v38 }
 0x84b   : > { %v5231_v7 = vpop.eup %5230 }
 0x84c   : > { %4849 = vrot.lane.b32.xlu2 %v4848_v1, %s5518_s1  ;;  %v2870_v23 = vmul.f32 %v5231_v7, %v7250_v21  ;;  %v5233_v57 = vpop.eup %5232  ;;  %v3224_v8 = vpop.xlane.xlu1 %3223  ;;  %v7855_v21 = vld [vmem:[#allocation49_spill] sm:$0xff] }
 0x84d   : > { %v2869_v63 = vmul.f32 %v5233_v57, %v7242_v52  ;;  %v3221_v11 = vpop.xlane.xlu0 %3220  ;;  %v5235_v12 = vpop.eup %5234  ;;  %v7864_v57 = vld [vmem:[#allocation25_spill] sm:$0xff] }
 0x84e   : > { %v5237_v52 = vpop.eup %5236  ;;  %v1767_v29 = vmul.f32 %v5235_v12, %v7861_v9 }
 0x84f   : > { %v4863_v39 = vpack.i.bf16 %v2870_v23, %v2869_v63  ;;  %v5239_v37 = vpop.eup %5238  ;;  %v2322_v47 = vmul.f32 %v5237_v52, %v2289_v32  ;;  %v7863_v23 = vld [vmem:[#allocation24_spill] sm:$0xff] }
 0x850   : > { %v1768_v45 = vmul.f32 %v5239_v37, %v1726_v58  ;;  %v1731_v63 = vadd.f32 %v7864_v57, %v7863_v23 }
 0x851   : > { %v3756_v44 = vpop.f32.mrf.mxu0 }
 0x852   : > { %v3757_v17 = vadd.f32 %v7434_v26, %v3756_v44 }
 0x854   : > { %3790 = vst [vmem:[%s5721_s8 + $0x20] sm:$0xff] %v3757_v17 }
 0x859   : > { %v3758_v13 = vpop.f32.mrf.mxu0 }
 0x85a   : > { %v3759_v25 = vadd.f32 %v7434_v26, %v3758_v13 }
 0x85c   : > { %3791 = vst [vmem:[%s5721_s8 + $0x28] sm:$0xff] %v3759_v25 }
 0x85e   : > { %v2125_v1 = vpop.xlane.xlu2 %2124 }
 0x85f   : > { %5240 = vrcp.f32 %v2125_v1  ;;  %1531 = vadd.xlane.f32.xlu0 %v7855_v21 }
 0x860   : > { %v4820_v55 = vpop.permute.xlu0 %4819  ;;  %5242 = vrcp.f32 %v3224_v8 }
 0x861   : > { %v4822_v27 = vunpack.i.h.bf16 %v4820_v55  ;;  %v4821_v43 = vunpack.i.l.bf16 %v4820_v55  ;;  %5244 = vrcp.f32 %v3221_v11  ;;  %v7865_v11 = vld [vmem:[#allocation67_spill] sm:$0xff] }
 0x864   : > { %v4825_v41 = vpop.permute.xlu1 %4824 }
 0x865   : > { %v5241_v14 = vpop.eup %5240  ;;  %v4827_v53 = vunpack.i.h.bf16 %v4825_v41  ;;  %v4826_v15 = vunpack.i.l.bf16 %v4825_v41 }
 0x866   : > { %v2321_v59 = vmul.f32 %v5241_v14, %v7860_v46  ;;  %v4815_v5 = vpop.permute.xlu2 %4814  ;;  %v5243_v2 = vpop.eup %5242  ;;  %v7866_v46 = vld [vmem:[#allocation23_spill] sm:$0xff] }
 0x867   : > { %v4817_v49 = vunpack.i.h.bf16 %v4815_v5  ;;  %v4816_v54 = vunpack.i.l.bf16 %v4815_v5  ;;  %v5245_v34 = vpop.eup %5244  ;;  %v3418_v62 = vmul.f32 %v5243_v2, %v3385_v19 }
 0x868   : > { %v4858_v50 = vpack.i.bf16 %v2322_v47, %v2321_v59  ;;  %v3417_v0 = vmul.f32 %v5245_v34, %v3383_v40  ;;  %v7867_v59 = vld [vmem:[#allocation26_spill] sm:$0xff] }
 0x869   : > { %v3620_v16 = vsel %vm1218_vm0, %v1768_v45, %v4817_v49  ;;  %v3619_v30 = vsel %vm1218_vm0, %v1767_v29, %v4816_v54  ;;  %v1736_v41 = vadd.f32 %v7867_v59, %v7866_v46  ;;  %v7868_v29 = vld [vmem:[#allocation27_spill] sm:$0xff] }
 0x86a   : > { %4859 = vrot.lane.b32.xlu1 %v4858_v50, %s5519_s2  ;;  %v3636_v20 = vsel %vm3627_vm1, %v3619_v30, %v4821_v43  ;;  %v3637_v61 = vsel %vm3627_vm1, %v3620_v16, %v4822_v27  ;;  %v4868_v18 = vpack.i.bf16 %v3418_v62, %v3417_v0 }
 0x86b   : > { %v3653_v48 = vsel %vm3644_vm2, %v3636_v20, %v4826_v15  ;;  %v3654_v35 = vsel %vm3644_vm2, %v3637_v61, %v4827_v53 }
 0x86c   : > { %v3665_v4 = vpack.c.bf16 %v3654_v35, %v3653_v48  ;;  %v4830_v31 = vpop.permute.xlu1 %4829 }
 0x86d   : > { %v4831_v12 = vunpack.i.l.bf16 %v4830_v31 }
 0x86e   : > { %3765 = vmatmul.bf16.gmra.mxu0 %v3665_v4 }
 0x872   : > { %4864 = vrot.lane.b32.xlu1 %v4863_v39, %s5518_s1  ;;  %v4832_v39 = vunpack.i.h.bf16 %v4830_v31 }
 0x874   : > { %v4835_v28 = vpop.permute.xlu1 %4834 }
 0x875   : > { %1528 = vadd.xlane.f32.xlu2 %v7862_v42  ;;  %v4837_v25 = vunpack.i.h.bf16 %v4835_v28  ;;  %v4836_v37 = vunpack.i.l.bf16 %v4835_v28  ;;  %v7869_v28 = vld [vmem:[#allocation70_spill] sm:$0xff] }
 0x87a   : > { %4869 = vrot.lane.b32.xlu1 %v4868_v18, %s5517_s16  ;;  %s5394_s16 = scalar_lea.hbm %s5393_s25, 128 }
 0x87b   : > { %p5395_p1 = scmp.ne.s32.totalorder %s5393_s25, %s5394_s16  ;;  %p5400_p3 = scmp.lt.s32.totalorder %s5398_s12, %s5394_s16 }
 0x87c   : > { %v4840_v3 = vpop.permute.xlu1 %4839 }
 0x87d   : > { %v4842_v32 = vunpack.i.h.bf16 %v4840_v3  ;;  %v4841_v10 = vunpack.i.l.bf16 %v4840_v3  ;;  %p5396_p11 = pnand %p5395_p1, %p5622_p6  ;;  %p5401_p5 = por %p5400_p3, %p5399_p2 }
 0x87f   : > { %p5397_p0 = pneg %p5396_p11 }
 0x881   : > { %p5402_p7 = pnand %p5401_p5, %p5397_p0 }
 0x88b   : > { %v1520_v38 = vpop.xlane.xlu0 %1519 }
 0x88c   : > { %5246 = vrcp.f32 %v1520_v38  ;;  %v7870_v38 = vld [vmem:[#allocation71_spill] sm:$0xff] }
 0x892   : > { %v5247_v56 = vpop.eup %5246 }
 0x893   : > { %v1770_v44 = vmul.f32 %v5247_v56, %v1731_v63  ;;  %v1741_v56 = vadd.f32 %v7870_v38, %v7869_v28 }
 0x895   : > { %v3622_v13 = vsel %vm1218_vm0, %v1770_v44, %v4832_v39  ;;  %v7871_v44 = vld [vmem:[#allocation69_spill] sm:$0xff] }
 0x896   : > { %v3639_v33 = vsel %vm3627_vm1, %v3622_v13, %v4837_v25 }
 0x897   : > { %v3656_v22 = vsel %vm3644_vm2, %v3639_v33, %v4842_v32 }
 0x89e   : > { %v4845_v60 = vpop.permute.xlu0 %4844 }
 0x89f   : > { %v1517_v7 = vpop.xlane.xlu2 %1516  ;;  %v4847_v43 = vunpack.i.h.bf16 %v4845_v60  ;;  %v4846_v50 = vunpack.i.l.bf16 %v4845_v60 }
 0x8a0   : > { %5248 = vrcp.f32 %v1517_v7 }
 0x8a6   : > { %v5249_v17 = vpop.eup %5248 }
 0x8a7   : > { %v1769_v8 = vmul.f32 %v5249_v17, %v7865_v11  ;;  %v1526_v1 = vpop.xlane.xlu2 %1525  ;;  %v1523_v21 = vpop.xlane.xlu1 %1522 }
 0x8a8   : > { %5250 = vrcp.f32 %v1526_v1  ;;  %v3761_v52 = vpop.f32.mrf.mxu0  ;;  %v4855_v20 = vpop.permute.xlu0 %4854 }
 0x8a9   : > { %5252 = vrcp.f32 %v1523_v21  ;;  %v3762_v51 = vadd.f32 %v7434_v26, %v3761_v52  ;;  %v3621_v14 = vsel %vm1218_vm0, %v1769_v8, %v4831_v12  ;;  %v4857_v35 = vunpack.i.h.bf16 %v4855_v20 }
 0x8aa   : > { %v3638_v24 = vsel %vm3627_vm1, %v3621_v14, %v4836_v37  ;;  %v4856_v4 = vunpack.i.l.bf16 %v4855_v20 }
 0x8ab   : > { %3792 = vst [vmem:[%s5721_s8 + $0x30] sm:$0xff] %v3762_v51  ;;  %v3655_v58 = vsel %vm3644_vm2, %v3638_v24, %v4841_v10 }
 0x8ac   : > { %v3666_v55 = vpack.c.bf16 %v3656_v22, %v3655_v58 }
 0x8ae   : > { %v5251_v47 = vpop.eup %5250  ;;  %3770 = vmatmul.bf16.gmra.mxu0 %v3666_v55 }
 0x8af   : > { %v5253_v5 = vpop.eup %5252  ;;  %v1772_v9 = vmul.f32 %v5251_v47, %v1736_v41  ;;  %v4850_v49 = vpop.permute.xlu2 %4849 }
 0x8b0   : > { %v1771_v45 = vmul.f32 %v5253_v5, %v7868_v29  ;;  %v3763_v54 = vpop.f32.mrf.mxu0  ;;  %v4852_v53 = vunpack.i.h.bf16 %v4850_v49  ;;  %v4851_v15 = vunpack.i.l.bf16 %v4850_v49 }
 0x8b1   : > { %v3764_v27 = vadd.f32 %v7434_v26, %v3763_v54  ;;  %v3624_v30 = vsel %vm1218_vm0, %v1772_v9, %v4847_v43 }
 0x8b2   : > { %v3623_v16 = vsel %vm1218_vm0, %v1771_v45, %v4846_v50  ;;  %v3641_v61 = vsel %vm3627_vm1, %v3624_v30, %v4852_v53 }
 0x8b3   : > { %3793 = vst [vmem:[%s5721_s8 + $0x38] sm:$0xff] %v3764_v27  ;;  %v3640_v48 = vsel %vm3627_vm1, %v3623_v16, %v4851_v15  ;;  %v3658_v6 = vsel %vm3644_vm2, %v3641_v61, %v4857_v35 }
 0x8b4   : > { %v3657_v36 = vsel %vm3644_vm2, %v3640_v48, %v4856_v4 }
 0x8b5   : > { %v3667_v2 = vpack.c.bf16 %v3658_v6, %v3657_v36 }
 0x8be   : > { %3775 = vmatmul.bf16.gmra.mxu0 %v3667_v2 }
 0x8d2   : > { %v1532_v40 = vpop.xlane.xlu0 %1531 }
 0x8d3   : > { %5254 = vrcp.f32 %v1532_v40 }
 0x8d9   : > { %v5255_v18 = vpop.eup %5254 }
 0x8da   : > { %v1774_v57 = vmul.f32 %v5255_v18, %v1741_v56 }
 0x8dc   : > { %v4860_v34 = vpop.permute.xlu1 %4859 }
 0x8dd   : > { %v4862_v3 = vunpack.i.h.bf16 %v4860_v34  ;;  %v4861_v63 = vunpack.i.l.bf16 %v4860_v34 }
 0x8df   : > { %v3626_v25 = vsel %vm1218_vm0, %v1774_v57, %v4862_v3 }
 0x8e4   : > { %v4865_v19 = vpop.permute.xlu1 %4864 }
 0x8e5   : > { %v4867_v23 = vunpack.i.h.bf16 %v4865_v19  ;;  %v4866_v13 = vunpack.i.l.bf16 %v4865_v19 }
 0x8e7   : > { %v3643_v1 = vsel %vm3627_vm1, %v3626_v25, %v4867_v23 }
 0x8e8   : > { %v1529_v62 = vpop.xlane.xlu2 %1528 }
 0x8e9   : > { %5256 = vrcp.f32 %v1529_v62 }
 0x8eb   : > { %v3766_v0 = vpop.f32.mrf.mxu0 }
 0x8ec   : > { %v3767_v42 = vadd.f32 %v7434_v26, %v3766_v0  ;;  %v4870_v31 = vpop.permute.xlu1 %4869 }
 0x8ed   : > { %v4872_v17 = vunpack.i.h.bf16 %v4870_v31  ;;  %v4871_v11 = vunpack.i.l.bf16 %v4870_v31 }
 0x8ee   : > { %3794 = vst [vmem:[%s5721_s8 + $0x40] sm:$0xff] %v3767_v42 }
 0x8ef   : > { %v5257_v7 = vpop.eup %5256  ;;  %v3660_v51 = vsel %vm3644_vm2, %v3643_v1, %v4872_v17 }
 0x8f0   : > { %v1773_v39 = vmul.f32 %v5257_v7, %v7871_v44 }
 0x8f2   : > { %v3625_v8 = vsel %vm1218_vm0, %v1773_v39, %v4861_v63 }
 0x8f3   : > { %v3768_v21 = vpop.f32.mrf.mxu0  ;;  %v3642_v12 = vsel %vm3627_vm1, %v3625_v8, %v4866_v13 }
 0x8f4   : > { %v3769_v52 = vadd.f32 %v7434_v26, %v3768_v21  ;;  %v3659_v37 = vsel %vm3644_vm2, %v3642_v12, %v4871_v11 }
 0x8f5   : > { %v3668_v33 = vpack.c.bf16 %v3660_v51, %v3659_v37 }
 0x8f6   : > { %3795 = vst [vmem:[%s5721_s8 + $0x48] sm:$0xff] %v3769_v52 }
 0x8f7   : > { %3780 = vmatmul.bf16.gmra.mxu0 %v3668_v33 }
 0x92b   : > { %v3771_v32 = vpop.f32.mrf.mxu0 }
 0x92c   : > { %v3772_v10 = vadd.f32 %v7434_v26, %v3771_v32 }
 0x92e   : > { %3796 = vst [vmem:[%s5721_s8 + $0x50] sm:$0xff] %v3772_v10 }
 0x933   : > { %v3773_v14 = vpop.f32.mrf.mxu0 }
 0x934   : > { %v3774_v60 = vadd.f32 %v7434_v26, %v3773_v14 }
 0x936   : > { %3797 = vst [vmem:[%s5721_s8 + $0x58] sm:$0xff] %v3774_v60 }
 0x93b   : > { %v3776_v24 = vpop.f32.mrf.mxu0 }
 0x93c   : > { %v3777_v58 = vadd.f32 %v7434_v26, %v3776_v24 }
 0x93e   : > { %3798 = vst [vmem:[%s5721_s8 + $0x60] sm:$0xff] %v3777_v58 }
 0x943   : > { %v3778_v22 = vpop.f32.mrf.mxu0 }
 0x944   : > { %v3779_v55 = vadd.f32 %v7434_v26, %v3778_v22 }
 0x946   : > { %3799 = vst [vmem:[%s5721_s8 + $0x68] sm:$0xff] %v3779_v55 }
 0x974   : > { %v3781_v47 = vpop.f32.mrf.mxu0 }
 0x975   : > { %v3782_v46 = vadd.f32 %v7434_v26, %v3781_v47 }
 0x977   : > { %3800 = vst [vmem:[%s5721_s8 + $0x70] sm:$0xff] %v3782_v46 }
 0x97c   : > { %v3783_v59 = vpop.f32.mrf.mxu0 }
 0x97d   : > { %v3784_v41 = vadd.f32 %v7434_v26, %v3783_v59 }
 0x97f   : > { %3801 = vst [vmem:[%s5721_s8 + $0x78] sm:$0xff] %v3784_v41 }
 0x980   : > { %5405 = shalt.err (!%p5402_p7)
}
 0x981   : > { %s5520_s5 = smov 128   ;;  %s5521_s8 = smov 8  }
 0x982   : > { %4513 = dma.vmem_to_hbm [thread:$0]  (%p5622_p6), %s3818_s10, 2048, %s3820_s30, %s3803_s24, %s5520_s5, %s5520_s5, %s5521_s8  }
 0x983 PF: > { %s7875_s29 = sld [smem:[#allocation17_spill]]  ;;  %p4540_p8 = scmp.ge.s32.totalorder %s5508_s28, 2 }
 0x985   : > { %p4530_p9 = pnand %p4540_p8, %p5628_p10 }
 0x987   : > { %p4531_p12 = pneg %p4530_p9 }
 0x989   : > { %s3834_s3 = sand.u32 1, %s7875_s29  }
 0x98a   : > { %s3835_s11 = scalar_lea.sflag [#allocation6], %s3834_s3 }
 0x98b   : > { %5463 = dma.done.wait (%p4531_p12), %s3835_s11, 2048  }
 0x98c   : > { %5465 = vsyncadd (%p4531_p12), %s3835_s11, 4294965248  ;;  %s23_s28 = sadd.s32 1, %s5508_s28   ;;  %s7877_s24 = sld [smem:[#allocation18_spill]] }
 0x98d   : > { %p20_p13 = scmp.ge.s32.totalorder %s23_s28, 6   ;;  %s7878_s26 = sld [smem:[#allocation21_spill]] }
 0x98e   : > { %s7879_s9 = sld [smem:[#allocation22_spill]]  ;;  %s7880_s18 = smov %s5472_s19 }
 0x98f   : > { %s7881_s19 = smov %s5476_s20  ;;  %s7882_s20 = smov %s5689_s15 }
 0x990   : > { %s7883_s21 = smov %s5484_s22  ;;  %s7884_s22 = smov %s5488_s23 }
 0x991   : > { %s7885_s23 = smov %s5686_s13  ;;  %s7886_s25 = smov %s5504_s27 }
 0x992   :  { %22 = sbr.rel (!%p20_p13) target bundleno = 16 (0x10), region = 102 }
 0x994   : > { %s7887_s27 = smov %s7879_s9 }
 0x997   :  { %3841 = vsyncpa [#allocation5], 1 }
 0x998   :  { %3843 = vsyncpa [#allocation5 + $0x1], 1 }
 0x999   :  { %3844 = vsyncpa [#allocation8], 1 }
 0x99a   :  { %3845 = vsyncpa [#allocation11], 1 }
 0x99b   :  { %3846 = vsyncpa [#allocation6], 1 }
 0x99c   :  { %3848 = vsyncpa [#allocation6 + $0x1], 1 }

</bundles_post_ra>
